<compile_context>
chip_gen: v7x
topology: tpu7x:2x2x1
jax: 0.10.0
libtpu: 0.0.40
codegen_flags: <defaults>
</compile_context>

<pallas_src>
import math
import functools

import jax
import jax.numpy as jnp
from jax import lax
from jax.experimental import pallas as pl
from jax.experimental.pallas import tpu as pltpu


# ----------------------------------------------------------------------------
# tiling / compiler-param helpers
# ----------------------------------------------------------------------------

_TM_PREF = 512            # >= 256 so v6e/v7x 256x256 MXU stays filled
_TN_PREF = 1024
_TK_PREF = 1024
_VMEM_FLOOR = 32 << 20    # override v5e's 16 MiB default scoped limit
_VMEM_CAP = 48 << 20      # headroom under v7x's 64 MiB physical VMEM (2 TCs/chip)
_APPROX_RECIPROCAL = True # softmax denominator; set False for exact validation vs PyTorch


def _row_tile(m, pref=_TM_PREF):           # multiple of 8 (or full dim)
    return m if m <= pref else pref


def _lane_tile(n, pref=_TN_PREF):          # multiple of 128 (or full dim)
    return n if n <= pref else pref


def _k_tile(k, pref=_TK_PREF):
    # reduction axis: only tiles that divide K exactly (partial K blocks would corrupt the acc)
    if k <= pref:
        return k
    for t in (1024, 896, 768, 640, 512, 384, 256, 128):
        if t <= pref and k % t == 0:
            return t
    return k


def _mosaic_params(semantics, est_block_bytes):
    # ~2x for double buffering + margin for compiler-internal scratch, clamped for v5e/v7x.
    limit = int(min(max(2 * est_block_bytes + (4 << 20), _VMEM_FLOOR), _VMEM_CAP))
    return pltpu.CompilerParams(dimension_semantics=semantics, vmem_limit_bytes=limit)


def _quick_gelu(x):                        # CLIP's QuickGELU: x * sigmoid(1.702 x)
    return x * jax.nn.sigmoid(1.702 * x)


# ----------------------------------------------------------------------------
# Pallas kernels
# ----------------------------------------------------------------------------

def _mm_kernel(x_ref, w_ref, *rest, activation, has_bias, has_res):
    rest = list(rest)
    b_ref = rest.pop(0) if has_bias else None
    r_ref = rest.pop(0) if has_res else None
    o_ref, acc_ref = rest

    @pl.when(pl.program_id(2) == 0)
    def _():
        acc_ref[...] = jnp.zeros_like(acc_ref)

    acc_ref[...] += jnp.dot(x_ref[...], w_ref[...], preferred_element_type=jnp.float32)

    @pl.when(pl.program_id(2) == pl.num_programs(2) - 1)
    def _():
        acc = acc_ref[...]
        if has_bias:
            acc = acc + b_ref[...]
        if activation == "quick_gelu":
            acc = _quick_gelu(acc)
        if has_res:
            acc = acc + r_ref[...].astype(jnp.float32)   # fused residual add
        o_ref[...] = acc.astype(o_ref.dtype)


def pallas_matmul(x, w, b=None, residual=None, activation=None, out_dtype=jnp.bfloat16):
    """y = x @ w (+ b) (+ activation) (+ residual).  x:(M,K) bf16, w:(K,N) bf16."""
    M, K = x.shape
    K2, N = w.shape
    assert K == K2
    tm, tn, tk = _row_tile(M), _lane_tile(N), _k_tile(K)
    grid = (pl.cdiv(M, tm), pl.cdiv(N, tn), pl.cdiv(K, tk))

    in_specs = [pl.BlockSpec((tm, tk), lambda i, j, k: (i, k)),
                pl.BlockSpec((tk, tn), lambda i, j, k: (k, j))]
    args = [x, w]
    has_bias = b is not None
    if has_bias:
        in_specs.append(pl.BlockSpec((1, tn), lambda i, j, k: (0, j)))
        args.append(b.reshape(1, N).astype(jnp.float32))
    has_res = residual is not None
    if has_res:
        in_specs.append(pl.BlockSpec((tm, tn), lambda i, j, k: (i, j)))
        args.append(residual)

    est = ((tm * tk + tk * tn + tm * tn) * 2 + tm * tn * 4
           + (tn * 4 if has_bias else 0) + (tm * tn * 2 if has_res else 0))
    kernel = functools.partial(_mm_kernel, activation=activation,
                               has_bias=has_bias, has_res=has_res)
    return pl.pallas_call(
        kernel,
        out_shape=jax.ShapeDtypeStruct((M, N), out_dtype),
        grid=grid,
        in_specs=in_specs,
        out_specs=pl.BlockSpec((tm, tn), lambda i, j, k: (i, j)),
        scratch_shapes=[pltpu.VMEM((tm, tn), jnp.float32)],
        compiler_params=_mosaic_params(("parallel", "parallel", "arbitrary"), est),
    )(*args)


def _ln_mm_kernel(x_ref, g_ref, beta_ref, w_ref, *rest, activation, eps, has_bias):
    if has_bias:
        b_ref, o_ref, xn_ref = rest
    else:
        b_ref = None
        o_ref, xn_ref = rest

    # Compute the LayerNorm once per row-block and cache it (reused across the j/N axis).
    @pl.when(pl.program_id(1) == 0)
    def _():
        x = x_ref[...].astype(jnp.float32)
        mu = jnp.mean(x, axis=-1, keepdims=True)
        var = jnp.mean(jnp.square(x - mu), axis=-1, keepdims=True)
        xn = (x - mu) * lax.rsqrt(var + eps) * g_ref[...] + beta_ref[...]
        xn_ref[...] = xn.astype(xn_ref.dtype)

    acc = jnp.dot(xn_ref[...], w_ref[...], preferred_element_type=jnp.float32)
    if has_bias:
        acc = acc + b_ref[...]
    if activation == "quick_gelu":
        acc = _quick_gelu(acc)
    o_ref[...] = acc.astype(o_ref.dtype)


def pallas_layernorm_matmul(x, g, beta, w, b=None, activation=None, eps=1e-5,
                            out_dtype=jnp.bfloat16):
    """Fused LayerNorm(x) @ w (+ b) (+ activation).  Full K per block (K = model width)."""
    M, K = x.shape
    K2, N = w.shape
    assert K == K2
    tm, tn = _row_tile(M), _lane_tile(N)
    grid = (pl.cdiv(M, tm), pl.cdiv(N, tn))

    in_specs = [
        pl.BlockSpec((tm, K), lambda i, j: (i, 0)),
        pl.BlockSpec((1, K), lambda i, j: (0, 0)),
        pl.BlockSpec((1, K), lambda i, j: (0, 0)),
        pl.BlockSpec((K, tn), lambda i, j: (0, j)),
    ]
    args = [x, g.reshape(1, K).astype(jnp.float32),
            beta.reshape(1, K).astype(jnp.float32), w]
    has_bias = b is not None
    if has_bias:
        in_specs.append(pl.BlockSpec((1, tn), lambda i, j: (0, j)))
        args.append(b.reshape(1, N).astype(jnp.float32))

    est = ((tm * K + K * tn + tm * tn) * 2 + 2 * K * 4
           + (tn * 4 if has_bias else 0) + tm * K * 2)
    kernel = functools.partial(_ln_mm_kernel, activation=activation, eps=eps,
                               has_bias=has_bias)
    return pl.pallas_call(
        kernel,
        out_shape=jax.ShapeDtypeStruct((M, N), out_dtype),
        grid=grid,
        in_specs=in_specs,
        out_specs=pl.BlockSpec((tm, tn), lambda i, j: (i, j)),
        scratch_shapes=[pltpu.VMEM((tm, K), jnp.bfloat16)],
        # j must stay sequential per core so the LN cache written at j==0 is valid for j>0.
        compiler_params=_mosaic_params(("parallel", "arbitrary"), est),
    )(*args)


def _ln_kernel(x_ref, g_ref, b_ref, o_ref, *, eps):
    x = x_ref[...].astype(jnp.float32)
    mu = jnp.mean(x, axis=-1, keepdims=True)
    var = jnp.mean(jnp.square(x - mu), axis=-1, keepdims=True)
    y = (x - mu) * lax.rsqrt(var + eps) * g_ref[...] + b_ref[...]
    o_ref[...] = y.astype(o_ref.dtype)


def pallas_layernorm(x, g, b, eps=1e-5, out_dtype=jnp.bfloat16):
    """Row-tiled LayerNorm over last dim.  x: (M, D)."""
    M, D = x.shape
    tm = _row_tile(M, pref=512)
    est = 2 * tm * D * 2 + 2 * D * 4
    return pl.pallas_call(
        functools.partial(_ln_kernel, eps=eps),
        out_shape=jax.ShapeDtypeStruct((M, D), out_dtype),
        grid=(pl.cdiv(M, tm),),
        in_specs=[
            pl.BlockSpec((tm, D), lambda i: (i, 0)),
            pl.BlockSpec((1, D), lambda i: (0, 0)),
            pl.BlockSpec((1, D), lambda i: (0, 0)),
        ],
        out_specs=pl.BlockSpec((tm, D), lambda i: (i, 0)),
        compiler_params=_mosaic_params(("parallel",), est),
    )(x, g.reshape(1, D).astype(jnp.float32), b.reshape(1, D).astype(jnp.float32))


def _attn_kernel(qkv_ref, o_ref, *, heads, head_dim, width, scale, causal):
    qkv = qkv_ref[0]                                   # (S, 3W) bf16, one batch element
    S = qkv.shape[0]
    if causal:
        row = lax.broadcasted_iota(jnp.int32, (S, S), 0)
        col = lax.broadcasted_iota(jnp.int32, (S, S), 1)
        keep = col <= row
    for h in range(heads):                             # static unroll; heads is small
        q = qkv[:, h * head_dim:(h + 1) * head_dim]
        k = qkv[:, width + h * head_dim: width + (h + 1) * head_dim]
        v = qkv[:, 2 * width + h * head_dim: 2 * width + (h + 1) * head_dim]
        # q @ k^T via dot_general (no k transpose / relayout)
        s = lax.dot_general(q, k, (((1,), (1,)), ((), ())),
                            preferred_element_type=jnp.float32) * scale
        if causal:
            s = jnp.where(keep, s, -1e9)
        m = jnp.max(s, axis=-1, keepdims=True)
        p = jnp.exp(s - m)
        denom = jnp.sum(p, axis=-1, keepdims=True)
        o = lax.dot_general(p.astype(v.dtype), v, (((1,), (0,)), ((), ())),
                            preferred_element_type=jnp.float32)
        # normalize after the PV matmul: S*Dh multiplies instead of S*S
        o = o * pl.reciprocal(denom, approx=_APPROX_RECIPROCAL)
        o_ref[0, :, h * head_dim:(h + 1) * head_dim] = o.astype(o_ref.dtype)


def pallas_attention(qkv, heads, scale, causal):
    """qkv: (B, S, 3W) packed [q | k | v] straight from the fused LN+QKV projection.
    Returns (B, S, W) with heads re-concatenated -> consumed directly by out_proj
    (no head-major HBM transposes, lane-dense W-wide output stores)."""
    B, S, W3 = qkv.shape
    W = W3 // 3
    assert W % heads == 0
    Dh = W // heads
    est = (S * W3 + S * W) * 2 + 2 * S * S * 4
    # TODO(synk): add a head-group grid axis so megacore still has parallelism when B == 1.
    return pl.pallas_call(
        functools.partial(_attn_kernel, heads=heads, head_dim=Dh, width=W,
                          scale=scale, causal=causal),
        out_shape=jax.ShapeDtypeStruct((B, S, W), jnp.bfloat16),
        grid=(B,),
        in_specs=[pl.BlockSpec((1, S, W3), lambda b: (b, 0, 0))],
        out_specs=pl.BlockSpec((1, S, W), lambda b: (b, 0, 0)),
        compiler_params=_mosaic_params(("parallel",), est),
    )(qkv)


# ----------------------------------------------------------------------------
# CLIP building blocks (glue in plain JAX, compute inside Pallas kernels)
# ----------------------------------------------------------------------------

def residual_attention_block(x, lp, heads, causal):
    """x: (B, S, W) bf16.  Weights pre-transposed to (in, out) layout."""
    B, S, W = x.shape
    x2d = x.reshape(B * S, W)

    # attention branch: x + out_proj(attn(ln_1(x))) ; ln_1 fused into QKV projection,
    # residual add fused into out_proj epilogue
    qkv = pallas_layernorm_matmul(x2d, lp["ln_1_g"], lp["ln_1_b"],
                                  lp["in_proj_w"], lp["in_proj_b"])        # (B*S, 3W)
    attn = pallas_attention(qkv.reshape(B, S, 3 * W), heads,
                            1.0 / math.sqrt(W // heads), causal)           # (B, S, W)
    x2d = pallas_matmul(attn.reshape(B * S, W), lp["out_proj_w"], lp["out_proj_b"],
                        residual=x2d)

    # MLP branch: x + c_proj(quick_gelu(c_fc(ln_2(x)))) ; ln_2 fused into c_fc,
    # residual add fused into c_proj epilogue
    h = pallas_layernorm_matmul(x2d, lp["ln_2_g"], lp["ln_2_b"],
                                lp["c_fc_w"], lp["c_fc_b"], activation="quick_gelu")
    x2d = pallas_matmul(h, lp["c_proj_w"], lp["c_proj_b"], residual=x2d)
    return x2d.reshape(B, S, W)


def encode_image(images, p, cfg):
    """images: (B, 3, H, W) NCHW  ->  (B, embed_dim) f32."""
    B = images.shape[0]
    patch, width, heads = cfg["patch"], cfg["v_width"], cfg["v_heads"]
    gh = cfg["image_size"] // patch
    gw = gh

    # patch-embed conv (stride == kernel, no bias) as im2col + tiled matmul
    patches = images.astype(jnp.bfloat16).reshape(B, 3, gh, patch, gw, patch)
    patches = patches.transpose(0, 2, 4, 1, 3, 5).reshape(B * gh * gw, 3 * patch * patch)
    x = pallas_matmul(patches, p["conv1_w"]).reshape(B, gh * gw, width)

    cls = jnp.broadcast_to(p["class_embedding"].reshape(1, 1, width), (B, 1, width))
    x = jnp.concatenate([cls, x], axis=1)                                     # (B, S, W)
    S = gh * gw + 1
    x = x + p["positional_embedding"][None]

    x = pallas_layernorm(x.reshape(B * S, width),
                         p["ln_pre_g"], p["ln_pre_b"]).reshape(B, S, width)

    for lp in p["layers"]:
        x = residual_attention_block(x, lp, heads, causal=False)

    # ln_post applied to CLS token only, fused with the visual projection
    return pallas_layernorm_matmul(x[:, 0, :], p["ln_post_g"], p["ln_post_b"],
                                   p["proj"], out_dtype=jnp.float32)


def encode_text(tokens, p, cfg):
    """tokens: (B, S) int32  ->  (B, embed_dim) f32."""
    B, S = tokens.shape
    width, heads = cfg["t_width"], cfg["t_heads"]

    x = p["token_embedding"][tokens]                                          # gather (XLA glue)
    x = x + p["positional_embedding"][None]

    for lp in p["layers"]:
        x = residual_attention_block(x, lp, heads, causal=True)

    eot = jnp.argmax(tokens, axis=-1)                                         # EOT position
    x_eot = x[jnp.arange(B), eot]                                             # (B, W)  (XLA gather)
    # LayerNorm is per-row, so ln_final(x)[eot] == ln_final(x[eot]) -> fuse with text projection
    return pallas_layernorm_matmul(x_eot, p["ln_final_g"], p["ln_final_b"],
                                   p["text_projection"], out_dtype=jnp.float32)


def clip_wrapper_forward(images, tokens, params, cfg):
    """CLIPWrapper.forward: returns (image_features, text_features).
    train_mode ('linear'/'full') only toggles requires_grad in PyTorch — no forward effect."""
    image_features = encode_image(images, params["visual"], cfg)
    text_features = encode_text(tokens, params["text"], cfg)
    return image_features, text_features


# ----------------------------------------------------------------------------
# Deterministic synthetic parameters (weights pre-transposed to (in, out), bf16)
# ----------------------------------------------------------------------------

def _bf16_normal(key, shape, scale=0.02):
    return (scale * jax.random.normal(key, shape, jnp.float32)).astype(jnp.bfloat16)


def _layer_params(key, width):
    ks = jax.random.split(key, 4)
    return {
        "ln_1_g": jnp.ones((width,), jnp.float32),
        "ln_1_b": jnp.zeros((width,), jnp.float32),
        "in_proj_w": _bf16_normal(ks[0], (width, 3 * width)),     # (in, out)
        "in_proj_b": jnp.zeros((3 * width,), jnp.float32),
        "out_proj_w": _bf16_normal(ks[1], (width, width)),
        "out_proj_b": jnp.zeros((width,), jnp.float32),
        "ln_2_g": jnp.ones((width,), jnp.float32),
        "ln_2_b": jnp.zeros((width,), jnp.float32),
        "c_fc_w": _bf16_normal(ks[2], (width, 4 * width)),
        "c_fc_b": jnp.zeros((4 * width,), jnp.float32),
        "c_proj_w": _bf16_normal(ks[3], (4 * width, width)),
        "c_proj_b": jnp.zeros((width,), jnp.float32),
    }


def init_params(key, cfg):
    kv, kt = jax.random.split(key)
    vks = jax.random.split(kv, 5)
    n_patches = (cfg["image_size"] // cfg["patch"]) ** 2
    visual = {
        # conv weight pre-flattened + transposed to im2col layout (3*p*p, width)
        "conv1_w": _bf16_normal(vks[0], (3 * cfg["patch"] * cfg["patch"], cfg["v_width"])),
        "class_embedding": _bf16_normal(vks[1], (cfg["v_width"],)),
        "positional_embedding": _bf16_normal(vks[2], (n_patches + 1, cfg["v_width"])),
        "ln_pre_g": jnp.ones((cfg["v_width"],), jnp.float32),
        "ln_pre_b": jnp.zeros((cfg["v_width"],), jnp.float32),
        "layers": [_layer_params(k, cfg["v_width"])
                   for k in jax.random.split(vks[3], cfg["v_layers"])],
        "ln_post_g": jnp.ones((cfg["v_width"],), jnp.float32),
        "ln_post_b": jnp.zeros((cfg["v_width"],), jnp.float32),
        "proj": _bf16_normal(vks[4], (cfg["v_width"], cfg["embed_dim"])),
    }
    tks = jax.random.split(kt, 4)
    text = {
        "token_embedding": _bf16_normal(tks[0], (cfg["vocab"], cfg["t_width"])),
        "positional_embedding": _bf16_normal(tks[1], (cfg["context"], cfg["t_width"])),
        "layers": [_layer_params(k, cfg["t_width"])
                   for k in jax.random.split(tks[2], cfg["t_layers"])],
        "ln_final_g": jnp.ones((cfg["t_width"],), jnp.float32),
        "ln_final_b": jnp.zeros((cfg["t_width"],), jnp.float32),
        "text_projection": _bf16_normal(tks[3], (cfg["t_width"], cfg["embed_dim"])),
        # logit_scale exists in CLIP but is unused by this forward (no similarity computed)
        "logit_scale": jnp.array(math.log(1.0 / 0.07), jnp.float32),
    }
    return {"visual": visual, "text": text}


# ----------------------------------------------------------------------------

if __name__ == "__main__":
    cfg = dict(
        image_size=16, patch=8, v_width=32, v_heads=4, v_layers=2,
        context=8, vocab=64, t_width=32, t_heads=4, t_layers=2,
        embed_dim=16,
    )

    key = jax.random.PRNGKey(0)
    kp, ki, kt = jax.random.split(key, 3)
    params = init_params(kp, cfg)

    images = jax.random.normal(ki, (2, 3, cfg["image_size"], cfg["image_size"]), jnp.float32)
    tokens = jax.random.randint(kt, (2, cfg["context"]), 0, cfg["vocab"], dtype=jnp.int32)

    fwd = jax.jit(functools.partial(clip_wrapper_forward, cfg=cfg))
    img_feat, txt_feat = fwd(images, tokens, params)
    img_feat = jax.block_until_ready(img_feat)
    txt_feat = jax.block_until_ready(txt_feat)

    assert img_feat.shape == (2, cfg["embed_dim"])
    assert txt_feat.shape == (2, cfg["embed_dim"])
    assert bool(jnp.all(jnp.isfinite(img_feat))) and bool(jnp.all(jnp.isfinite(txt_feat)))
    print("KERNEL_OK")
</pallas_src>

<mosaic_0001>
module attributes {stable_mosaic.version = 11 : i64} {
  func.func @_mm_kernel(%arg0: i32, %arg1: i32, %arg2: i32, %arg3: memref<8x192xbf16, #tpu.memory_space<vmem>>, %arg4: memref<192x32xbf16, #tpu.memory_space<vmem>>, %arg5: memref<8x32xbf16, #tpu.memory_space<vmem>>, %arg6: memref<8x32xf32, #tpu.memory_space<vmem>>) attributes {dimension_semantics = [#tpu.dimension_semantics<parallel>, #tpu.dimension_semantics<parallel>, #tpu.dimension_semantics<arbitrary>], iteration_bounds = array<i64: 1, 1, 1>, scalar_prefetch = 0 : i64, scratch_operands = 1 : i64, tpu.core_type = #tpu.core_type<tc>, window_params = [{transform_indices = @transform_0, window_bounds = array<i64: 8, 192>}, {transform_indices = @transform_1, window_bounds = array<i64: 192, 32>}, {transform_indices = @transform_2, window_bounds = array<i64: 8, 32>}]} {
    %c0_i32 = arith.constant 0 : i32
    %0 = arith.cmpi eq, %arg2, %c0_i32 : i32
    %1 = arith.extui %0 : i1 to i32
    %c0_i32_0 = arith.constant 0 : i32
    %2 = arith.cmpi ne, %1, %c0_i32_0 : i32
    scf.if %2 {
      %cst_10 = arith.constant 0.000000e+00 : f32
      %12 = vector.broadcast %cst_10 : f32 to vector<8x32xf32>
      %c0_11 = arith.constant 0 : index
      %c0_12 = arith.constant 0 : index
      %13 = vector.load %arg6[%c0_11, %c0_12] : memref<8x32xf32, #tpu.memory_space<vmem>>, vector<8x32xf32>
      tpu.vector_store %arg6[%c0_11, %c0_12], %12 {strides = array<i32>} : memref<8x32xf32, #tpu.memory_space<vmem>>, vector<8x32xf32>,
    } else {
    }
    %c0 = arith.constant 0 : index
    %c0_1 = arith.constant 0 : index
    %3 = vector.load %arg6[%c0, %c0_1] : memref<8x32xf32, #tpu.memory_space<vmem>>, vector<8x32xf32>
    %c0_2 = arith.constant 0 : index
    %c0_3 = arith.constant 0 : index
    %4 = vector.load %arg3[%c0_2, %c0_3] : memref<8x192xbf16, #tpu.memory_space<vmem>>, vector<8x192xbf16>
    %c0_4 = arith.constant 0 : index
    %c0_5 = arith.constant 0 : index
    %5 = vector.load %arg4[%c0_4, %c0_5] : memref<192x32xbf16, #tpu.memory_space<vmem>>, vector<192x32xbf16>
    %cst = arith.constant dense<0.000000e+00> : vector<8x32xf32>
    %6 = tpu.matmul %4, %5, %cst {dimension_numbers = #tpu.dot_dimension_numbers<[1], [0], [0], [1], [0, 0, 1, 1], [], []>} : vector<8x192xbf16>, vector<192x32xbf16>, vector<8x32xf32> -> vector<8x32xf32>
    %7 = arith.addf %3, %6 : vector<8x32xf32>
    %c0_6 = arith.constant 0 : index
    %c0_7 = arith.constant 0 : index
    %8 = vector.load %arg6[%c0_6, %c0_7] : memref<8x32xf32, #tpu.memory_space<vmem>>, vector<8x32xf32>
    tpu.vector_store %arg6[%c0_6, %c0_7], %7 {strides = array<i32>} : memref<8x32xf32, #tpu.memory_space<vmem>>, vector<8x32xf32>,
    %c0_i32_8 = arith.constant 0 : i32
    %9 = arith.cmpi eq, %arg2, %c0_i32_8 : i32
    %10 = arith.extui %9 : i1 to i32
    %c0_i32_9 = arith.constant 0 : i32
    %11 = arith.cmpi ne, %10, %c0_i32_9 : i32
    scf.if %11 {
      %c0_10 = arith.constant 0 : index
      %c0_11 = arith.constant 0 : index
      %12 = vector.load %arg6[%c0_10, %c0_11] : memref<8x32xf32, #tpu.memory_space<vmem>>, vector<8x32xf32>
      %13 = arith.truncf %12 : vector<8x32xf32> to vector<8x32xbf16>
      %c0_12 = arith.constant 0 : index
      %c0_13 = arith.constant 0 : index
      %14 = vector.load %arg5[%c0_12, %c0_13] : memref<8x32xbf16, #tpu.memory_space<vmem>>, vector<8x32xbf16>
      tpu.vector_store %arg5[%c0_12, %c0_13], %13 {strides = array<i32>} : memref<8x32xbf16, #tpu.memory_space<vmem>>, vector<8x32xbf16>,
    } else {
    }
    return
  }
  func.func @transform_0(%arg0: i32, %arg1: i32, %arg2: i32) -> (i32, i32) {
    %c0_i32 = arith.constant 0 : i32
    return %arg0, %arg2 : i32, i32
  }
  func.func @transform_1(%arg0: i32, %arg1: i32, %arg2: i32) -> (i32, i32) {
    %c0_i32 = arith.constant 0 : i32
    return %arg2, %arg1 : i32, i32
  }
  func.func @transform_2(%arg0: i32, %arg1: i32, %arg2: i32) -> (i32, i32) {
    %c0_i32 = arith.constant 0 : i32
    return %arg0, %arg1 : i32, i32
  }
}

module attributes {stable_mosaic.version = 11 : i64} {
  func.func @_ln_kernel(%arg0: i32, %arg1: memref<10x32xbf16, #tpu.memory_space<vmem>>, %arg2: memref<1x32xf32, #tpu.memory_space<vmem>>, %arg3: memref<1x32xf32, #tpu.memory_space<vmem>>, %arg4: memref<10x32xbf16, #tpu.memory_space<vmem>>) attributes {dimension_semantics = [#tpu.dimension_semantics<parallel>], iteration_bounds = array<i64: 1>, scalar_prefetch = 0 : i64, scratch_operands = 0 : i64, tpu.core_type = #tpu.core_type<tc>, window_params = [{transform_indices = @transform_0, window_bounds = array<i64: 10, 32>}, {pipeline_mode = #tpu.pipeline_mode<synchronous>, transform_indices = @transform_1, window_bounds = array<i64: 1, 32>}, {pipeline_mode = #tpu.pipeline_mode<synchronous>, transform_indices = @transform_2, window_bounds = array<i64: 1, 32>}, {transform_indices = @transform_3, window_bounds = array<i64: 10, 32>}]} {
    %c0 = arith.constant 0 : index
    %c0_0 = arith.constant 0 : index
    %0 = vector.load %arg1[%c0, %c0_0] : memref<10x32xbf16, #tpu.memory_space<vmem>>, vector<10x32xbf16>
    %1 = arith.extf %0 : vector<10x32xbf16> to vector<10x32xf32>
    %cst = arith.constant dense<0.000000e+00> : vector<10xf32>
    %2 = vector.multi_reduction <add>, %1, %cst [1] : vector<10x32xf32> to vector<10xf32>
    %3 = vector.shape_cast %2 : vector<10xf32> to vector<10x1xf32>
    %cst_1 = arith.constant 3.200000e+01 : f32
    %4 = vector.broadcast %cst_1 : f32 to vector<10x1xf32>
    %5 = arith.divf %3, %4 : vector<10x1xf32>
    %6 = vector.broadcast %5 : vector<10x1xf32> to vector<10x32xf32>
    %7 = arith.subf %1, %6 : vector<10x32xf32>
    %8 = arith.mulf %7, %7 : vector<10x32xf32>
    %cst_2 = arith.constant dense<0.000000e+00> : vector<10xf32>
    %9 = vector.multi_reduction <add>, %8, %cst_2 [1] : vector<10x32xf32> to vector<10xf32>
    %10 = vector.shape_cast %9 : vector<10xf32> to vector<10x1xf32>
    %cst_3 = arith.constant 3.200000e+01 : f32
    %11 = vector.broadcast %cst_3 : f32 to vector<10x1xf32>
    %12 = arith.divf %10, %11 : vector<10x1xf32>
    %13 = vector.broadcast %5 : vector<10x1xf32> to vector<10x32xf32>
    %14 = arith.subf %1, %13 : vector<10x32xf32>
    %cst_4 = arith.constant 9.99999974E-6 : f32
    %15 = vector.broadcast %cst_4 : f32 to vector<10x1xf32>
    %16 = arith.addf %12, %15 : vector<10x1xf32>
    %17 = math.rsqrt %16 : vector<10x1xf32>
    %18 = vector.broadcast %17 : vector<10x1xf32> to vector<10x32xf32>
    %19 = arith.mulf %14, %18 : vector<10x32xf32>
    %c0_5 = arith.constant 0 : index
    %c0_6 = arith.constant 0 : index
    %20 = vector.load %arg2[%c0_5, %c0_6] : memref<1x32xf32, #tpu.memory_space<vmem>>, vector<1x32xf32>
    %21 = vector.broadcast %20 : vector<1x32xf32> to vector<10x32xf32>
    %22 = arith.mulf %19, %21 : vector<10x32xf32>
    %c0_7 = arith.constant 0 : index
    %c0_8 = arith.constant 0 : index
    %23 = vector.load %arg3[%c0_7, %c0_8] : memref<1x32xf32, #tpu.memory_space<vmem>>, vector<1x32xf32>
    %24 = vector.broadcast %23 : vector<1x32xf32> to vector<10x32xf32>
    %25 = arith.addf %22, %24 : vector<10x32xf32>
    %26 = arith.truncf %25 : vector<10x32xf32> to vector<10x32xbf16>
    %c0_9 = arith.constant 0 : index
    %c0_10 = arith.constant 0 : index
    %27 = vector.load %arg4[%c0_9, %c0_10] : memref<10x32xbf16, #tpu.memory_space<vmem>>, vector<10x32xbf16>
    tpu.vector_store %arg4[%c0_9, %c0_10], %26 {strides = array<i32>} : memref<10x32xbf16, #tpu.memory_space<vmem>>, vector<10x32xbf16>,
    return
  }
  func.func @transform_0(%arg0: i32) -> (i32, i32) {
    %c0_i32 = arith.constant 0 : i32
    %c0_i32_0 = arith.constant 0 : i32
    return %arg0, %c0_i32 : i32, i32
  }
  func.func @transform_1(%arg0: i32) -> (i32, i32) {
    %c0_i32 = arith.constant 0 : i32
    %c0_i32_0 = arith.constant 0 : i32
    %c0_i32_1 = arith.constant 0 : i32
    return %c0_i32, %c0_i32_0 : i32, i32
  }
  func.func @transform_2(%arg0: i32) -> (i32, i32) {
    %c0_i32 = arith.constant 0 : i32
    %c0_i32_0 = arith.constant 0 : i32
    %c0_i32_1 = arith.constant 0 : i32
    return %c0_i32, %c0_i32_0 : i32, i32
  }
  func.func @transform_3(%arg0: i32) -> (i32, i32) {
    %c0_i32 = arith.constant 0 : i32
    %c0_i32_0 = arith.constant 0 : i32
    return %arg0, %c0_i32 : i32, i32
  }
}

module attributes {stable_mosaic.version = 11 : i64} {
  func.func @_ln_mm_kernel(%arg0: i32, %arg1: i32, %arg2: memref<10x32xbf16, #tpu.memory_space<vmem>>, %arg3: memref<1x32xf32, #tpu.memory_space<vmem>>, %arg4: memref<1x32xf32, #tpu.memory_space<vmem>>, %arg5: memref<32x96xbf16, #tpu.memory_space<vmem>>, %arg6: memref<1x96xf32, #tpu.memory_space<vmem>>, %arg7: memref<10x96xbf16, #tpu.memory_space<vmem>>, %arg8: memref<10x32xbf16, #tpu.memory_space<vmem>>) attributes {dimension_semantics = [#tpu.dimension_semantics<parallel>, #tpu.dimension_semantics<arbitrary>], iteration_bounds = array<i64: 1, 1>, scalar_prefetch = 0 : i64, scratch_operands = 1 : i64, tpu.core_type = #tpu.core_type<tc>, window_params = [{transform_indices = @transform_0, window_bounds = array<i64: 10, 32>}, {pipeline_mode = #tpu.pipeline_mode<synchronous>, transform_indices = @transform_1, window_bounds = array<i64: 1, 32>}, {pipeline_mode = #tpu.pipeline_mode<synchronous>, transform_indices = @transform_2, window_bounds = array<i64: 1, 32>}, {transform_indices = @transform_3, window_bounds = array<i64: 32, 96>}, {transform_indices = @transform_4, window_bounds = array<i64: 1, 96>}, {transform_indices = @transform_5, window_bounds = array<i64: 10, 96>}]} {
    %c0_i32 = arith.constant 0 : i32
    %0 = arith.cmpi eq, %arg1, %c0_i32 : i32
    %1 = arith.extui %0 : i1 to i32
    %c0_i32_0 = arith.constant 0 : i32
    %2 = arith.cmpi ne, %1, %c0_i32_0 : i32
    scf.if %2 {
      %c0_8 = arith.constant 0 : index
      %c0_9 = arith.constant 0 : index
      %11 = vector.load %arg2[%c0_8, %c0_9] : memref<10x32xbf16, #tpu.memory_space<vmem>>, vector<10x32xbf16>
      %12 = arith.extf %11 : vector<10x32xbf16> to vector<10x32xf32>
      %cst_10 = arith.constant dense<0.000000e+00> : vector<10xf32>
      %13 = vector.multi_reduction <add>, %12, %cst_10 [1] : vector<10x32xf32> to vector<10xf32>
      %14 = vector.shape_cast %13 : vector<10xf32> to vector<10x1xf32>
      %cst_11 = arith.constant 3.200000e+01 : f32
      %15 = vector.broadcast %cst_11 : f32 to vector<10x1xf32>
      %16 = arith.divf %14, %15 : vector<10x1xf32>
      %17 = vector.broadcast %16 : vector<10x1xf32> to vector<10x32xf32>
      %18 = arith.subf %12, %17 : vector<10x32xf32>
      %19 = arith.mulf %18, %18 : vector<10x32xf32>
      %cst_12 = arith.constant dense<0.000000e+00> : vector<10xf32>
      %20 = vector.multi_reduction <add>, %19, %cst_12 [1] : vector<10x32xf32> to vector<10xf32>
      %21 = vector.shape_cast %20 : vector<10xf32> to vector<10x1xf32>
      %cst_13 = arith.constant 3.200000e+01 : f32
      %22 = vector.broadcast %cst_13 : f32 to vector<10x1xf32>
      %23 = arith.divf %21, %22 : vector<10x1xf32>
      %24 = vector.broadcast %16 : vector<10x1xf32> to vector<10x32xf32>
      %25 = arith.subf %12, %24 : vector<10x32xf32>
      %cst_14 = arith.constant 9.99999974E-6 : f32
      %26 = vector.broadcast %cst_14 : f32 to vector<10x1xf32>
      %27 = arith.addf %23, %26 : vector<10x1xf32>
      %28 = math.rsqrt %27 : vector<10x1xf32>
      %29 = vector.broadcast %28 : vector<10x1xf32> to vector<10x32xf32>
      %30 = arith.mulf %25, %29 : vector<10x32xf32>
      %c0_15 = arith.constant 0 : index
      %c0_16 = arith.constant 0 : index
      %31 = vector.load %arg3[%c0_15, %c0_16] : memref<1x32xf32, #tpu.memory_space<vmem>>, vector<1x32xf32>
      %32 = vector.broadcast %31 : vector<1x32xf32> to vector<10x32xf32>
      %33 = arith.mulf %30, %32 : vector<10x32xf32>
      %c0_17 = arith.constant 0 : index
      %c0_18 = arith.constant 0 : index
      %34 = vector.load %arg4[%c0_17, %c0_18] : memref<1x32xf32, #tpu.memory_space<vmem>>, vector<1x32xf32>
      %35 = vector.broadcast %34 : vector<1x32xf32> to vector<10x32xf32>
      %36 = arith.addf %33, %35 : vector<10x32xf32>
      %37 = arith.truncf %36 : vector<10x32xf32> to vector<10x32xbf16>
      %c0_19 = arith.constant 0 : index
      %c0_20 = arith.constant 0 : index
      %38 = vector.load %arg8[%c0_19, %c0_20] : memref<10x32xbf16, #tpu.memory_space<vmem>>, vector<10x32xbf16>
      tpu.vector_store %arg8[%c0_19, %c0_20], %37 {strides = array<i32>} : memref<10x32xbf16, #tpu.memory_space<vmem>>, vector<10x32xbf16>,
    } else {
    }
    %c0 = arith.constant 0 : index
    %c0_1 = arith.constant 0 : index
    %3 = vector.load %arg8[%c0, %c0_1] : memref<10x32xbf16, #tpu.memory_space<vmem>>, vector<10x32xbf16>
    %c0_2 = arith.constant 0 : index
    %c0_3 = arith.constant 0 : index
    %4 = vector.load %arg5[%c0_2, %c0_3] : memref<32x96xbf16, #tpu.memory_space<vmem>>, vector<32x96xbf16>
    %cst = arith.constant dense<0.000000e+00> : vector<10x96xf32>
    %5 = tpu.matmul %3, %4, %cst {dimension_numbers = #tpu.dot_dimension_numbers<[1], [0], [0], [1], [0, 0, 1, 1], [], []>} : vector<10x32xbf16>, vector<32x96xbf16>, vector<10x96xf32> -> vector<10x96xf32>
    %c0_4 = arith.constant 0 : index
    %c0_5 = arith.constant 0 : index
    %6 = vector.load %arg6[%c0_4, %c0_5] : memref<1x96xf32, #tpu.memory_space<vmem>>, vector<1x96xf32>
    %7 = vector.broadcast %6 : vector<1x96xf32> to vector<10x96xf32>
    %8 = arith.addf %5, %7 : vector<10x96xf32>
    %9 = arith.truncf %8 : vector<10x96xf32> to vector<10x96xbf16>
    %c0_6 = arith.constant 0 : index
    %c0_7 = arith.constant 0 : index
    %10 = vector.load %arg7[%c0_6, %c0_7] : memref<10x96xbf16, #tpu.memory_space<vmem>>, vector<10x96xbf16>
    tpu.vector_store %arg7[%c0_6, %c0_7], %9 {strides = array<i32>} : memref<10x96xbf16, #tpu.memory_space<vmem>>, vector<10x96xbf16>,
    return
  }
  func.func @transform_0(%arg0: i32, %arg1: i32) -> (i32, i32) {
    %c0_i32 = arith.constant 0 : i32
    %c0_i32_0 = arith.constant 0 : i32
    return %arg0, %c0_i32 : i32, i32
  }
  func.func @transform_1(%arg0: i32, %arg1: i32) -> (i32, i32) {
    %c0_i32 = arith.constant 0 : i32
    %c0_i32_0 = arith.constant 0 : i32
    %c0_i32_1 = arith.constant 0 : i32
    return %c0_i32, %c0_i32_0 : i32, i32
  }
  func.func @transform_2(%arg0: i32, %arg1: i32) -> (i32, i32) {
    %c0_i32 = arith.constant 0 : i32
    %c0_i32_0 = arith.constant 0 : i32
    %c0_i32_1 = arith.constant 0 : i32
    return %c0_i32, %c0_i32_0 : i32, i32
  }
  func.func @transform_3(%arg0: i32, %arg1: i32) -> (i32, i32) {
    %c0_i32 = arith.constant 0 : i32
    %c0_i32_0 = arith.constant 0 : i32
    return %c0_i32, %arg1 : i32, i32
  }
  func.func @transform_4(%arg0: i32, %arg1: i32) -> (i32, i32) {
    %c0_i32 = arith.constant 0 : i32
    %c0_i32_0 = arith.constant 0 : i32
    return %c0_i32, %arg1 : i32, i32
  }
  func.func @transform_5(%arg0: i32, %arg1: i32) -> (i32, i32) {
    %c0_i32 = arith.constant 0 : i32
    return %arg0, %arg1 : i32, i32
  }
}

module attributes {stable_mosaic.version = 11 : i64} {
  func.func @_attn_kernel(%arg0: i32, %arg1: memref<1x5x96xbf16, #tpu.memory_space<vmem>>, %arg2: memref<1x5x32xbf16, #tpu.memory_space<vmem>>) attributes {dimension_semantics = [#tpu.dimension_semantics<parallel>], iteration_bounds = array<i64: 2>, scalar_prefetch = 0 : i64, scratch_operands = 0 : i64, tpu.core_type = #tpu.core_type<tc>, window_params = [{transform_indices = @transform_0, window_bounds = array<i64: 1, 5, 96>}, {transform_indices = @transform_1, window_bounds = array<i64: 1, 5, 32>}]} {
    %c0 = arith.constant 0 : index
    %c0_0 = arith.constant 0 : index
    %c0_1 = arith.constant 0 : index
    %0 = vector.load %arg1[%c0, %c0_0, %c0_1] : memref<1x5x96xbf16, #tpu.memory_space<vmem>>, vector<1x5x96xbf16>
    %1 = vector.shape_cast %0 : vector<1x5x96xbf16> to vector<5x96xbf16>
    %2 = vector.extract_strided_slice %1 {offsets = [0, 0], sizes = [5, 8], strides = [1, 1]} : vector<5x96xbf16> to vector<5x8xbf16>
    %3 = vector.extract_strided_slice %1 {offsets = [0, 32], sizes = [5, 8], strides = [1, 1]} : vector<5x96xbf16> to vector<5x8xbf16>
    %4 = vector.extract_strided_slice %1 {offsets = [0, 64], sizes = [5, 8], strides = [1, 1]} : vector<5x96xbf16> to vector<5x8xbf16>
    %cst = arith.constant dense<0.000000e+00> : vector<5x5xf32>
    %5 = tpu.matmul %2, %3, %cst {dimension_numbers = #tpu.dot_dimension_numbers<[1], [1], [0], [0], [0, 0, 1, 0], [], []>} : vector<5x8xbf16>, vector<5x8xbf16>, vector<5x5xf32> -> vector<5x5xf32>
    %cst_2 = arith.constant 0.353553385 : f32
    %6 = vector.broadcast %cst_2 : f32 to vector<5x5xf32>
    %7 = arith.mulf %5, %6 : vector<5x5xf32>
    %cst_3 = arith.constant dense<0xFF800000> : vector<5xf32>
    %8 = vector.multi_reduction <maximumf>, %7, %cst_3 [1] : vector<5x5xf32> to vector<5xf32>
    %9 = vector.shape_cast %8 : vector<5xf32> to vector<5x1xf32>
    %10 = vector.broadcast %9 : vector<5x1xf32> to vector<5x5xf32>
    %11 = arith.subf %7, %10 : vector<5x5xf32>
    %12 = math.exp %11 : vector<5x5xf32>
    %cst_4 = arith.constant dense<0.000000e+00> : vector<5xf32>
    %13 = vector.multi_reduction <add>, %12, %cst_4 [1] : vector<5x5xf32> to vector<5xf32>
    %14 = vector.shape_cast %13 : vector<5xf32> to vector<5x1xf32>
    %15 = arith.truncf %12 : vector<5x5xf32> to vector<5x5xbf16>
    %cst_5 = arith.constant dense<0.000000e+00> : vector<5x8xf32>
    %16 = tpu.matmul %15, %4, %cst_5 {dimension_numbers = #tpu.dot_dimension_numbers<[1], [0], [0], [1], [0, 0, 1, 1], [], []>} : vector<5x5xbf16>, vector<5x8xbf16>, vector<5x8xf32> -> vector<5x8xf32>
    %17 = tpu.reciprocal %14 {approx = true} : vector<5x1xf32> -> vector<5x1xf32>
    %18 = vector.broadcast %17 : vector<5x1xf32> to vector<5x8xf32>
    %19 = arith.mulf %16, %18 : vector<5x8xf32>
    %20 = arith.truncf %19 : vector<5x8xf32> to vector<5x8xbf16>
    %c0_6 = arith.constant 0 : index
    %c0_7 = arith.constant 0 : index
    %c0_8 = arith.constant 0 : index
    %21 = vector.load %arg2[%c0_6, %c0_7, %c0_8] : memref<1x5x32xbf16, #tpu.memory_space<vmem>>, vector<1x5x8xbf16>
    %22 = vector.shape_cast %21 : vector<1x5x8xbf16> to vector<5x8xbf16>
    %23 = vector.shape_cast %20 : vector<5x8xbf16> to vector<1x5x8xbf16>
    tpu.vector_store %arg2[%c0_6, %c0_7, %c0_8], %23 {strides = array<i32>} : memref<1x5x32xbf16, #tpu.memory_space<vmem>>, vector<1x5x8xbf16>,
    %24 = vector.extract_strided_slice %1 {offsets = [0, 8], sizes = [5, 8], strides = [1, 1]} : vector<5x96xbf16> to vector<5x8xbf16>
    %25 = vector.extract_strided_slice %1 {offsets = [0, 40], sizes = [5, 8], strides = [1, 1]} : vector<5x96xbf16> to vector<5x8xbf16>
    %26 = vector.extract_strided_slice %1 {offsets = [0, 72], sizes = [5, 8], strides = [1, 1]} : vector<5x96xbf16> to vector<5x8xbf16>
    %cst_9 = arith.constant dense<0.000000e+00> : vector<5x5xf32>
    %27 = tpu.matmul %24, %25, %cst_9 {dimension_numbers = #tpu.dot_dimension_numbers<[1], [1], [0], [0], [0, 0, 1, 0], [], []>} : vector<5x8xbf16>, vector<5x8xbf16>, vector<5x5xf32> -> vector<5x5xf32>
    %cst_10 = arith.constant 0.353553385 : f32
    %28 = vector.broadcast %cst_10 : f32 to vector<5x5xf32>
    %29 = arith.mulf %27, %28 : vector<5x5xf32>
    %cst_11 = arith.constant dense<0xFF800000> : vector<5xf32>
    %30 = vector.multi_reduction <maximumf>, %29, %cst_11 [1] : vector<5x5xf32> to vector<5xf32>
    %31 = vector.shape_cast %30 : vector<5xf32> to vector<5x1xf32>
    %32 = vector.broadcast %31 : vector<5x1xf32> to vector<5x5xf32>
    %33 = arith.subf %29, %32 : vector<5x5xf32>
    %34 = math.exp %33 : vector<5x5xf32>
    %cst_12 = arith.constant dense<0.000000e+00> : vector<5xf32>
    %35 = vector.multi_reduction <add>, %34, %cst_12 [1] : vector<5x5xf32> to vector<5xf32>
    %36 = vector.shape_cast %35 : vector<5xf32> to vector<5x1xf32>
    %37 = arith.truncf %34 : vector<5x5xf32> to vector<5x5xbf16>
    %cst_13 = arith.constant dense<0.000000e+00> : vector<5x8xf32>
    %38 = tpu.matmul %37, %26, %cst_13 {dimension_numbers = #tpu.dot_dimension_numbers<[1], [0], [0], [1], [0, 0, 1, 1], [], []>} : vector<5x5xbf16>, vector<5x8xbf16>, vector<5x8xf32> -> vector<5x8xf32>
    %39 = tpu.reciprocal %36 {approx = true} : vector<5x1xf32> -> vector<5x1xf32>
    %40 = vector.broadcast %39 : vector<5x1xf32> to vector<5x8xf32>
    %41 = arith.mulf %38, %40 : vector<5x8xf32>
    %42 = arith.truncf %41 : vector<5x8xf32> to vector<5x8xbf16>
    %c0_14 = arith.constant 0 : index
    %c0_15 = arith.constant 0 : index
    %c8 = arith.constant 8 : index
    %43 = vector.load %arg2[%c0_14, %c0_15, %c8] : memref<1x5x32xbf16, #tpu.memory_space<vmem>>, vector<1x5x8xbf16>
    %44 = vector.shape_cast %43 : vector<1x5x8xbf16> to vector<5x8xbf16>
    %45 = vector.shape_cast %42 : vector<5x8xbf16> to vector<1x5x8xbf16>
    tpu.vector_store %arg2[%c0_14, %c0_15, %c8], %45 {strides = array<i32>} : memref<1x5x32xbf16, #tpu.memory_space<vmem>>, vector<1x5x8xbf16>,
    %46 = vector.extract_strided_slice %1 {offsets = [0, 16], sizes = [5, 8], strides = [1, 1]} : vector<5x96xbf16> to vector<5x8xbf16>
    %47 = vector.extract_strided_slice %1 {offsets = [0, 48], sizes = [5, 8], strides = [1, 1]} : vector<5x96xbf16> to vector<5x8xbf16>
    %48 = vector.extract_strided_slice %1 {offsets = [0, 80], sizes = [5, 8], strides = [1, 1]} : vector<5x96xbf16> to vector<5x8xbf16>
    %cst_16 = arith.constant dense<0.000000e+00> : vector<5x5xf32>
    %49 = tpu.matmul %46, %47, %cst_16 {dimension_numbers = #tpu.dot_dimension_numbers<[1], [1], [0], [0], [0, 0, 1, 0], [], []>} : vector<5x8xbf16>, vector<5x8xbf16>, vector<5x5xf32> -> vector<5x5xf32>
    %cst_17 = arith.constant 0.353553385 : f32
    %50 = vector.broadcast %cst_17 : f32 to vector<5x5xf32>
    %51 = arith.mulf %49, %50 : vector<5x5xf32>
    %cst_18 = arith.constant dense<0xFF800000> : vector<5xf32>
    %52 = vector.multi_reduction <maximumf>, %51, %cst_18 [1] : vector<5x5xf32> to vector<5xf32>
    %53 = vector.shape_cast %52 : vector<5xf32> to vector<5x1xf32>
    %54 = vector.broadcast %53 : vector<5x1xf32> to vector<5x5xf32>
    %55 = arith.subf %51, %54 : vector<5x5xf32>
    %56 = math.exp %55 : vector<5x5xf32>
    %cst_19 = arith.constant dense<0.000000e+00> : vector<5xf32>
    %57 = vector.multi_reduction <add>, %56, %cst_19 [1] : vector<5x5xf32> to vector<5xf32>
    %58 = vector.shape_cast %57 : vector<5xf32> to vector<5x1xf32>
    %59 = arith.truncf %56 : vector<5x5xf32> to vector<5x5xbf16>
    %cst_20 = arith.constant dense<0.000000e+00> : vector<5x8xf32>
    %60 = tpu.matmul %59, %48, %cst_20 {dimension_numbers = #tpu.dot_dimension_numbers<[1], [0], [0], [1], [0, 0, 1, 1], [], []>} : vector<5x5xbf16>, vector<5x8xbf16>, vector<5x8xf32> -> vector<5x8xf32>
    %61 = tpu.reciprocal %58 {approx = true} : vector<5x1xf32> -> vector<5x1xf32>
    %62 = vector.broadcast %61 : vector<5x1xf32> to vector<5x8xf32>
    %63 = arith.mulf %60, %62 : vector<5x8xf32>
    %64 = arith.truncf %63 : vector<5x8xf32> to vector<5x8xbf16>
    %c0_21 = arith.constant 0 : index
    %c0_22 = arith.constant 0 : index
    %c16 = arith.constant 16 : index
    %65 = vector.load %arg2[%c0_21, %c0_22, %c16] : memref<1x5x32xbf16, #tpu.memory_space<vmem>>, vector<1x5x8xbf16>
    %66 = vector.shape_cast %65 : vector<1x5x8xbf16> to vector<5x8xbf16>
    %67 = vector.shape_cast %64 : vector<5x8xbf16> to vector<1x5x8xbf16>
    tpu.vector_store %arg2[%c0_21, %c0_22, %c16], %67 {strides = array<i32>} : memref<1x5x32xbf16, #tpu.memory_space<vmem>>, vector<1x5x8xbf16>,
    %68 = vector.extract_strided_slice %1 {offsets = [0, 24], sizes = [5, 8], strides = [1, 1]} : vector<5x96xbf16> to vector<5x8xbf16>
    %69 = vector.extract_strided_slice %1 {offsets = [0, 56], sizes = [5, 8], strides = [1, 1]} : vector<5x96xbf16> to vector<5x8xbf16>
    %70 = vector.extract_strided_slice %1 {offsets = [0, 88], sizes = [5, 8], strides = [1, 1]} : vector<5x96xbf16> to vector<5x8xbf16>
    %cst_23 = arith.constant dense<0.000000e+00> : vector<5x5xf32>
    %71 = tpu.matmul %68, %69, %cst_23 {dimension_numbers = #tpu.dot_dimension_numbers<[1], [1], [0], [0], [0, 0, 1, 0], [], []>} : vector<5x8xbf16>, vector<5x8xbf16>, vector<5x5xf32> -> vector<5x5xf32>
    %cst_24 = arith.constant 0.353553385 : f32
    %72 = vector.broadcast %cst_24 : f32 to vector<5x5xf32>
    %73 = arith.mulf %71, %72 : vector<5x5xf32>
    %cst_25 = arith.constant dense<0xFF800000> : vector<5xf32>
    %74 = vector.multi_reduction <maximumf>, %73, %cst_25 [1] : vector<5x5xf32> to vector<5xf32>
    %75 = vector.shape_cast %74 : vector<5xf32> to vector<5x1xf32>
    %76 = vector.broadcast %75 : vector<5x1xf32> to vector<5x5xf32>
    %77 = arith.subf %73, %76 : vector<5x5xf32>
    %78 = math.exp %77 : vector<5x5xf32>
    %cst_26 = arith.constant dense<0.000000e+00> : vector<5xf32>
    %79 = vector.multi_reduction <add>, %78, %cst_26 [1] : vector<5x5xf32> to vector<5xf32>
    %80 = vector.shape_cast %79 : vector<5xf32> to vector<5x1xf32>
    %81 = arith.truncf %78 : vector<5x5xf32> to vector<5x5xbf16>
    %cst_27 = arith.constant dense<0.000000e+00> : vector<5x8xf32>
    %82 = tpu.matmul %81, %70, %cst_27 {dimension_numbers = #tpu.dot_dimension_numbers<[1], [0], [0], [1], [0, 0, 1, 1], [], []>} : vector<5x5xbf16>, vector<5x8xbf16>, vector<5x8xf32> -> vector<5x8xf32>
    %83 = tpu.reciprocal %80 {approx = true} : vector<5x1xf32> -> vector<5x1xf32>
    %84 = vector.broadcast %83 : vector<5x1xf32> to vector<5x8xf32>
    %85 = arith.mulf %82, %84 : vector<5x8xf32>
    %86 = arith.truncf %85 : vector<5x8xf32> to vector<5x8xbf16>
    %c0_28 = arith.constant 0 : index
    %c0_29 = arith.constant 0 : index
    %c24 = arith.constant 24 : index
    %87 = vector.load %arg2[%c0_28, %c0_29, %c24] : memref<1x5x32xbf16, #tpu.memory_space<vmem>>, vector<1x5x8xbf16>
    %88 = vector.shape_cast %87 : vector<1x5x8xbf16> to vector<5x8xbf16>
    %89 = vector.shape_cast %86 : vector<5x8xbf16> to vector<1x5x8xbf16>
    tpu.vector_store %arg2[%c0_28, %c0_29, %c24], %89 {strides = array<i32>} : memref<1x5x32xbf16, #tpu.memory_space<vmem>>, vector<1x5x8xbf16>,
    return
  }
  func.func @transform_0(%arg0: i32) -> (i32, i32, i32) {
    %c0_i32 = arith.constant 0 : i32
    %c0_i32_0 = arith.constant 0 : i32
    %c0_i32_1 = arith.constant 0 : i32
    return %arg0, %c0_i32, %c0_i32_0 : i32, i32, i32
  }
  func.func @transform_1(%arg0: i32) -> (i32, i32, i32) {
    %c0_i32 = arith.constant 0 : i32
    %c0_i32_0 = arith.constant 0 : i32
    %c0_i32_1 = arith.constant 0 : i32
    return %arg0, %c0_i32, %c0_i32_0 : i32, i32, i32
  }
}

module attributes {stable_mosaic.version = 11 : i64} {
  func.func @_mm_kernel(%arg0: i32, %arg1: i32, %arg2: i32, %arg3: memref<10x32xbf16, #tpu.memory_space<vmem>>, %arg4: memref<32x32xbf16, #tpu.memory_space<vmem>>, %arg5: memref<1x32xf32, #tpu.memory_space<vmem>>, %arg6: memref<10x32xbf16, #tpu.memory_space<vmem>>, %arg7: memref<10x32xbf16, #tpu.memory_space<vmem>>, %arg8: memref<10x32xf32, #tpu.memory_space<vmem>>) attributes {dimension_semantics = [#tpu.dimension_semantics<parallel>, #tpu.dimension_semantics<parallel>, #tpu.dimension_semantics<arbitrary>], iteration_bounds = array<i64: 1, 1, 1>, scalar_prefetch = 0 : i64, scratch_operands = 1 : i64, tpu.core_type = #tpu.core_type<tc>, window_params = [{transform_indices = @transform_0, window_bounds = array<i64: 10, 32>}, {transform_indices = @transform_1, window_bounds = array<i64: 32, 32>}, {transform_indices = @transform_2, window_bounds = array<i64: 1, 32>}, {transform_indices = @transform_3, window_bounds = array<i64: 10, 32>}, {transform_indices = @transform_4, window_bounds = array<i64: 10, 32>}]} {
    %c0_i32 = arith.constant 0 : i32
    %0 = arith.cmpi eq, %arg2, %c0_i32 : i32
    %1 = arith.extui %0 : i1 to i32
    %c0_i32_0 = arith.constant 0 : i32
    %2 = arith.cmpi ne, %1, %c0_i32_0 : i32
    scf.if %2 {
      %cst_10 = arith.constant 0.000000e+00 : f32
      %12 = vector.broadcast %cst_10 : f32 to vector<10x32xf32>
      %c0_11 = arith.constant 0 : index
      %c0_12 = arith.constant 0 : index
      %13 = vector.load %arg8[%c0_11, %c0_12] : memref<10x32xf32, #tpu.memory_space<vmem>>, vector<10x32xf32>
      tpu.vector_store %arg8[%c0_11, %c0_12], %12 {strides = array<i32>} : memref<10x32xf32, #tpu.memory_space<vmem>>, vector<10x32xf32>,
    } else {
    }
    %c0 = arith.constant 0 : index
    %c0_1 = arith.constant 0 : index
    %3 = vector.load %arg8[%c0, %c0_1] : memref<10x32xf32, #tpu.memory_space<vmem>>, vector<10x32xf32>
    %c0_2 = arith.constant 0 : index
    %c0_3 = arith.constant 0 : index
    %4 = vector.load %arg3[%c0_2, %c0_3] : memref<10x32xbf16, #tpu.memory_space<vmem>>, vector<10x32xbf16>
    %c0_4 = arith.constant 0 : index
    %c0_5 = arith.constant 0 : index
    %5 = vector.load %arg4[%c0_4, %c0_5] : memref<32x32xbf16, #tpu.memory_space<vmem>>, vector<32x32xbf16>
    %cst = arith.constant dense<0.000000e+00> : vector<10x32xf32>
    %6 = tpu.matmul %4, %5, %cst {dimension_numbers = #tpu.dot_dimension_numbers<[1], [0], [0], [1], [0, 0, 1, 1], [], []>} : vector<10x32xbf16>, vector<32x32xbf16>, vector<10x32xf32> -> vector<10x32xf32>
    %7 = arith.addf %3, %6 : vector<10x32xf32>
    %c0_6 = arith.constant 0 : index
    %c0_7 = arith.constant 0 : index
    %8 = vector.load %arg8[%c0_6, %c0_7] : memref<10x32xf32, #tpu.memory_space<vmem>>, vector<10x32xf32>
    tpu.vector_store %arg8[%c0_6, %c0_7], %7 {strides = array<i32>} : memref<10x32xf32, #tpu.memory_space<vmem>>, vector<10x32xf32>,
    %c0_i32_8 = arith.constant 0 : i32
    %9 = arith.cmpi eq, %arg2, %c0_i32_8 : i32
    %10 = arith.extui %9 : i1 to i32
    %c0_i32_9 = arith.constant 0 : i32
    %11 = arith.cmpi ne, %10, %c0_i32_9 : i32
    scf.if %11 {
      %c0_10 = arith.constant 0 : index
      %c0_11 = arith.constant 0 : index
      %12 = vector.load %arg8[%c0_10, %c0_11] : memref<10x32xf32, #tpu.memory_space<vmem>>, vector<10x32xf32>
      %c0_12 = arith.constant 0 : index
      %c0_13 = arith.constant 0 : index
      %13 = vector.load %arg5[%c0_12, %c0_13] : memref<1x32xf32, #tpu.memory_space<vmem>>, vector<1x32xf32>
      %14 = vector.broadcast %13 : vector<1x32xf32> to vector<10x32xf32>
      %15 = arith.addf %12, %14 : vector<10x32xf32>
      %c0_14 = arith.constant 0 : index
      %c0_15 = arith.constant 0 : index
      %16 = vector.load %arg6[%c0_14, %c0_15] : memref<10x32xbf16, #tpu.memory_space<vmem>>, vector<10x32xbf16>
      %17 = arith.extf %16 : vector<10x32xbf16> to vector<10x32xf32>
      %18 = arith.addf %15, %17 : vector<10x32xf32>
      %19 = arith.truncf %18 : vector<10x32xf32> to vector<10x32xbf16>
      %c0_16 = arith.constant 0 : index
      %c0_17 = arith.constant 0 : index
      %20 = vector.load %arg7[%c0_16, %c0_17] : memref<10x32xbf16, #tpu.memory_space<vmem>>, vector<10x32xbf16>
      tpu.vector_store %arg7[%c0_16, %c0_17], %19 {strides = array<i32>} : memref<10x32xbf16, #tpu.memory_space<vmem>>, vector<10x32xbf16>,
    } else {
    }
    return
  }
  func.func @transform_0(%arg0: i32, %arg1: i32, %arg2: i32) -> (i32, i32) {
    %c0_i32 = arith.constant 0 : i32
    return %arg0, %arg2 : i32, i32
  }
  func.func @transform_1(%arg0: i32, %arg1: i32, %arg2: i32) -> (i32, i32) {
    %c0_i32 = arith.constant 0 : i32
    return %arg2, %arg1 : i32, i32
  }
  func.func @transform_2(%arg0: i32, %arg1: i32, %arg2: i32) -> (i32, i32) {
    %c0_i32 = arith.constant 0 : i32
    %c0_i32_0 = arith.constant 0 : i32
    return %c0_i32, %arg1 : i32, i32
  }
  func.func @transform_3(%arg0: i32, %arg1: i32, %arg2: i32) -> (i32, i32) {
    %c0_i32 = arith.constant 0 : i32
    return %arg0, %arg1 : i32, i32
  }
  func.func @transform_4(%arg0: i32, %arg1: i32, %arg2: i32) -> (i32, i32) {
    %c0_i32 = arith.constant 0 : i32
    return %arg0, %arg1 : i32, i32
  }
}

module attributes {stable_mosaic.version = 11 : i64} {
  func.func @_ln_mm_kernel(%arg0: i32, %arg1: i32, %arg2: memref<10x32xbf16, #tpu.memory_space<vmem>>, %arg3: memref<1x32xf32, #tpu.memory_space<vmem>>, %arg4: memref<1x32xf32, #tpu.memory_space<vmem>>, %arg5: memref<32x128xbf16, #tpu.memory_space<vmem>>, %arg6: memref<1x128xf32, #tpu.memory_space<vmem>>, %arg7: memref<10x128xbf16, #tpu.memory_space<vmem>>, %arg8: memref<10x32xbf16, #tpu.memory_space<vmem>>) attributes {dimension_semantics = [#tpu.dimension_semantics<parallel>, #tpu.dimension_semantics<arbitrary>], iteration_bounds = array<i64: 1, 1>, scalar_prefetch = 0 : i64, scratch_operands = 1 : i64, tpu.core_type = #tpu.core_type<tc>, window_params = [{transform_indices = @transform_0, window_bounds = array<i64: 10, 32>}, {pipeline_mode = #tpu.pipeline_mode<synchronous>, transform_indices = @transform_1, window_bounds = array<i64: 1, 32>}, {pipeline_mode = #tpu.pipeline_mode<synchronous>, transform_indices = @transform_2, window_bounds = array<i64: 1, 32>}, {transform_indices = @transform_3, window_bounds = array<i64: 32, 128>}, {transform_indices = @transform_4, window_bounds = array<i64: 1, 128>}, {transform_indices = @transform_5, window_bounds = array<i64: 10, 128>}]} {
    %c0_i32 = arith.constant 0 : i32
    %0 = arith.cmpi eq, %arg1, %c0_i32 : i32
    %1 = arith.extui %0 : i1 to i32
    %c0_i32_0 = arith.constant 0 : i32
    %2 = arith.cmpi ne, %1, %c0_i32_0 : i32
    scf.if %2 {
      %c0_10 = arith.constant 0 : index
      %c0_11 = arith.constant 0 : index
      %19 = vector.load %arg2[%c0_10, %c0_11] : memref<10x32xbf16, #tpu.memory_space<vmem>>, vector<10x32xbf16>
      %20 = arith.extf %19 : vector<10x32xbf16> to vector<10x32xf32>
      %cst_12 = arith.constant dense<0.000000e+00> : vector<10xf32>
      %21 = vector.multi_reduction <add>, %20, %cst_12 [1] : vector<10x32xf32> to vector<10xf32>
      %22 = vector.shape_cast %21 : vector<10xf32> to vector<10x1xf32>
      %cst_13 = arith.constant 3.200000e+01 : f32
      %23 = vector.broadcast %cst_13 : f32 to vector<10x1xf32>
      %24 = arith.divf %22, %23 : vector<10x1xf32>
      %25 = vector.broadcast %24 : vector<10x1xf32> to vector<10x32xf32>
      %26 = arith.subf %20, %25 : vector<10x32xf32>
      %27 = arith.mulf %26, %26 : vector<10x32xf32>
      %cst_14 = arith.constant dense<0.000000e+00> : vector<10xf32>
      %28 = vector.multi_reduction <add>, %27, %cst_14 [1] : vector<10x32xf32> to vector<10xf32>
      %29 = vector.shape_cast %28 : vector<10xf32> to vector<10x1xf32>
      %cst_15 = arith.constant 3.200000e+01 : f32
      %30 = vector.broadcast %cst_15 : f32 to vector<10x1xf32>
      %31 = arith.divf %29, %30 : vector<10x1xf32>
      %32 = vector.broadcast %24 : vector<10x1xf32> to vector<10x32xf32>
      %33 = arith.subf %20, %32 : vector<10x32xf32>
      %cst_16 = arith.constant 9.99999974E-6 : f32
      %34 = vector.broadcast %cst_16 : f32 to vector<10x1xf32>
      %35 = arith.addf %31, %34 : vector<10x1xf32>
      %36 = math.rsqrt %35 : vector<10x1xf32>
      %37 = vector.broadcast %36 : vector<10x1xf32> to vector<10x32xf32>
      %38 = arith.mulf %33, %37 : vector<10x32xf32>
      %c0_17 = arith.constant 0 : index
      %c0_18 = arith.constant 0 : index
      %39 = vector.load %arg3[%c0_17, %c0_18] : memref<1x32xf32, #tpu.memory_space<vmem>>, vector<1x32xf32>
      %40 = vector.broadcast %39 : vector<1x32xf32> to vector<10x32xf32>
      %41 = arith.mulf %38, %40 : vector<10x32xf32>
      %c0_19 = arith.constant 0 : index
      %c0_20 = arith.constant 0 : index
      %42 = vector.load %arg4[%c0_19, %c0_20] : memref<1x32xf32, #tpu.memory_space<vmem>>, vector<1x32xf32>
      %43 = vector.broadcast %42 : vector<1x32xf32> to vector<10x32xf32>
      %44 = arith.addf %41, %43 : vector<10x32xf32>
      %45 = arith.truncf %44 : vector<10x32xf32> to vector<10x32xbf16>
      %c0_21 = arith.constant 0 : index
      %c0_22 = arith.constant 0 : index
      %46 = vector.load %arg8[%c0_21, %c0_22] : memref<10x32xbf16, #tpu.memory_space<vmem>>, vector<10x32xbf16>
      tpu.vector_store %arg8[%c0_21, %c0_22], %45 {strides = array<i32>} : memref<10x32xbf16, #tpu.memory_space<vmem>>, vector<10x32xbf16>,
    } else {
    }
    %c0 = arith.constant 0 : index
    %c0_1 = arith.constant 0 : index
    %3 = vector.load %arg8[%c0, %c0_1] : memref<10x32xbf16, #tpu.memory_space<vmem>>, vector<10x32xbf16>
    %c0_2 = arith.constant 0 : index
    %c0_3 = arith.constant 0 : index
    %4 = vector.load %arg5[%c0_2, %c0_3] : memref<32x128xbf16, #tpu.memory_space<vmem>>, vector<32x128xbf16>
    %cst = arith.constant dense<0.000000e+00> : vector<10x128xf32>
    %5 = tpu.matmul %3, %4, %cst {dimension_numbers = #tpu.dot_dimension_numbers<[1], [0], [0], [1], [0, 0, 1, 1], [], []>} : vector<10x32xbf16>, vector<32x128xbf16>, vector<10x128xf32> -> vector<10x128xf32>
    %c0_4 = arith.constant 0 : index
    %c0_5 = arith.constant 0 : index
    %6 = vector.load %arg6[%c0_4, %c0_5] : memref<1x128xf32, #tpu.memory_space<vmem>>, vector<1x128xf32>
    %7 = vector.broadcast %6 : vector<1x128xf32> to vector<10x128xf32>
    %8 = arith.addf %5, %7 : vector<10x128xf32>
    %cst_6 = arith.constant 1.702000e+00 : f32
    %9 = vector.broadcast %cst_6 : f32 to vector<10x128xf32>
    %10 = arith.mulf %9, %8 : vector<10x128xf32>
    %11 = arith.negf %10 : vector<10x128xf32>
    %12 = math.exp %11 : vector<10x128xf32>
    %cst_7 = arith.constant 1.000000e+00 : f32
    %13 = vector.broadcast %cst_7 : f32 to vector<10x128xf32>
    %14 = arith.addf %13, %12 : vector<10x128xf32>
    %15 = arith.divf %13, %14 : vector<10x128xf32>
    %16 = arith.mulf %8, %15 : vector<10x128xf32>
    %17 = arith.truncf %16 : vector<10x128xf32> to vector<10x128xbf16>
    %c0_8 = arith.constant 0 : index
    %c0_9 = arith.constant 0 : index
    %18 = vector.load %arg7[%c0_8, %c0_9] : memref<10x128xbf16, #tpu.memory_space<vmem>>, vector<10x128xbf16>
    tpu.vector_store %arg7[%c0_8, %c0_9], %17 {strides = array<i32>} : memref<10x128xbf16, #tpu.memory_space<vmem>>, vector<10x128xbf16>,
    return
  }
  func.func @transform_0(%arg0: i32, %arg1: i32) -> (i32, i32) {
    %c0_i32 = arith.constant 0 : i32
    %c0_i32_0 = arith.constant 0 : i32
    return %arg0, %c0_i32 : i32, i32
  }
  func.func @transform_1(%arg0: i32, %arg1: i32) -> (i32, i32) {
    %c0_i32 = arith.constant 0 : i32
    %c0_i32_0 = arith.constant 0 : i32
    %c0_i32_1 = arith.constant 0 : i32
    return %c0_i32, %c0_i32_0 : i32, i32
  }
  func.func @transform_2(%arg0: i32, %arg1: i32) -> (i32, i32) {
    %c0_i32 = arith.constant 0 : i32
    %c0_i32_0 = arith.constant 0 : i32
    %c0_i32_1 = arith.constant 0 : i32
    return %c0_i32, %c0_i32_0 : i32, i32
  }
  func.func @transform_3(%arg0: i32, %arg1: i32) -> (i32, i32) {
    %c0_i32 = arith.constant 0 : i32
    %c0_i32_0 = arith.constant 0 : i32
    return %c0_i32, %arg1 : i32, i32
  }
  func.func @transform_4(%arg0: i32, %arg1: i32) -> (i32, i32) {
    %c0_i32 = arith.constant 0 : i32
    %c0_i32_0 = arith.constant 0 : i32
    return %c0_i32, %arg1 : i32, i32
  }
  func.func @transform_5(%arg0: i32, %arg1: i32) -> (i32, i32) {
    %c0_i32 = arith.constant 0 : i32
    return %arg0, %arg1 : i32, i32
  }
}

module attributes {stable_mosaic.version = 11 : i64} {
  func.func @_mm_kernel(%arg0: i32, %arg1: i32, %arg2: i32, %arg3: memref<10x128xbf16, #tpu.memory_space<vmem>>, %arg4: memref<128x32xbf16, #tpu.memory_space<vmem>>, %arg5: memref<1x32xf32, #tpu.memory_space<vmem>>, %arg6: memref<10x32xbf16, #tpu.memory_space<vmem>>, %arg7: memref<10x32xbf16, #tpu.memory_space<vmem>>, %arg8: memref<10x32xf32, #tpu.memory_space<vmem>>) attributes {dimension_semantics = [#tpu.dimension_semantics<parallel>, #tpu.dimension_semantics<parallel>, #tpu.dimension_semantics<arbitrary>], iteration_bounds = array<i64: 1, 1, 1>, scalar_prefetch = 0 : i64, scratch_operands = 1 : i64, tpu.core_type = #tpu.core_type<tc>, window_params = [{transform_indices = @transform_0, window_bounds = array<i64: 10, 128>}, {transform_indices = @transform_1, window_bounds = array<i64: 128, 32>}, {transform_indices = @transform_2, window_bounds = array<i64: 1, 32>}, {transform_indices = @transform_3, window_bounds = array<i64: 10, 32>}, {transform_indices = @transform_4, window_bounds = array<i64: 10, 32>}]} {
    %c0_i32 = arith.constant 0 : i32
    %0 = arith.cmpi eq, %arg2, %c0_i32 : i32
    %1 = arith.extui %0 : i1 to i32
    %c0_i32_0 = arith.constant 0 : i32
    %2 = arith.cmpi ne, %1, %c0_i32_0 : i32
    scf.if %2 {
      %cst_10 = arith.constant 0.000000e+00 : f32
      %12 = vector.broadcast %cst_10 : f32 to vector<10x32xf32>
      %c0_11 = arith.constant 0 : index
      %c0_12 = arith.constant 0 : index
      %13 = vector.load %arg8[%c0_11, %c0_12] : memref<10x32xf32, #tpu.memory_space<vmem>>, vector<10x32xf32>
      tpu.vector_store %arg8[%c0_11, %c0_12], %12 {strides = array<i32>} : memref<10x32xf32, #tpu.memory_space<vmem>>, vector<10x32xf32>,
    } else {
    }
    %c0 = arith.constant 0 : index
    %c0_1 = arith.constant 0 : index
    %3 = vector.load %arg8[%c0, %c0_1] : memref<10x32xf32, #tpu.memory_space<vmem>>, vector<10x32xf32>
    %c0_2 = arith.constant 0 : index
    %c0_3 = arith.constant 0 : index
    %4 = vector.load %arg3[%c0_2, %c0_3] : memref<10x128xbf16, #tpu.memory_space<vmem>>, vector<10x128xbf16>
    %c0_4 = arith.constant 0 : index
    %c0_5 = arith.constant 0 : index
    %5 = vector.load %arg4[%c0_4, %c0_5] : memref<128x32xbf16, #tpu.memory_space<vmem>>, vector<128x32xbf16>
    %cst = arith.constant dense<0.000000e+00> : vector<10x32xf32>
    %6 = tpu.matmul %4, %5, %cst {dimension_numbers = #tpu.dot_dimension_numbers<[1], [0], [0], [1], [0, 0, 1, 1], [], []>} : vector<10x128xbf16>, vector<128x32xbf16>, vector<10x32xf32> -> vector<10x32xf32>
    %7 = arith.addf %3, %6 : vector<10x32xf32>
    %c0_6 = arith.constant 0 : index
    %c0_7 = arith.constant 0 : index
    %8 = vector.load %arg8[%c0_6, %c0_7] : memref<10x32xf32, #tpu.memory_space<vmem>>, vector<10x32xf32>
    tpu.vector_store %arg8[%c0_6, %c0_7], %7 {strides = array<i32>} : memref<10x32xf32, #tpu.memory_space<vmem>>, vector<10x32xf32>,
    %c0_i32_8 = arith.constant 0 : i32
    %9 = arith.cmpi eq, %arg2, %c0_i32_8 : i32
    %10 = arith.extui %9 : i1 to i32
    %c0_i32_9 = arith.constant 0 : i32
    %11 = arith.cmpi ne, %10, %c0_i32_9 : i32
    scf.if %11 {
      %c0_10 = arith.constant 0 : index
      %c0_11 = arith.constant 0 : index
      %12 = vector.load %arg8[%c0_10, %c0_11] : memref<10x32xf32, #tpu.memory_space<vmem>>, vector<10x32xf32>
      %c0_12 = arith.constant 0 : index
      %c0_13 = arith.constant 0 : index
      %13 = vector.load %arg5[%c0_12, %c0_13] : memref<1x32xf32, #tpu.memory_space<vmem>>, vector<1x32xf32>
      %14 = vector.broadcast %13 : vector<1x32xf32> to vector<10x32xf32>
      %15 = arith.addf %12, %14 : vector<10x32xf32>
      %c0_14 = arith.constant 0 : index
      %c0_15 = arith.constant 0 : index
      %16 = vector.load %arg6[%c0_14, %c0_15] : memref<10x32xbf16, #tpu.memory_space<vmem>>, vector<10x32xbf16>
      %17 = arith.extf %16 : vector<10x32xbf16> to vector<10x32xf32>
      %18 = arith.addf %15, %17 : vector<10x32xf32>
      %19 = arith.truncf %18 : vector<10x32xf32> to vector<10x32xbf16>
      %c0_16 = arith.constant 0 : index
      %c0_17 = arith.constant 0 : index
      %20 = vector.load %arg7[%c0_16, %c0_17] : memref<10x32xbf16, #tpu.memory_space<vmem>>, vector<10x32xbf16>
      tpu.vector_store %arg7[%c0_16, %c0_17], %19 {strides = array<i32>} : memref<10x32xbf16, #tpu.memory_space<vmem>>, vector<10x32xbf16>,
    } else {
    }
    return
  }
  func.func @transform_0(%arg0: i32, %arg1: i32, %arg2: i32) -> (i32, i32) {
    %c0_i32 = arith.constant 0 : i32
    return %arg0, %arg2 : i32, i32
  }
  func.func @transform_1(%arg0: i32, %arg1: i32, %arg2: i32) -> (i32, i32) {
    %c0_i32 = arith.constant 0 : i32
    return %arg2, %arg1 : i32, i32
  }
  func.func @transform_2(%arg0: i32, %arg1: i32, %arg2: i32) -> (i32, i32) {
    %c0_i32 = arith.constant 0 : i32
    %c0_i32_0 = arith.constant 0 : i32
    return %c0_i32, %arg1 : i32, i32
  }
  func.func @transform_3(%arg0: i32, %arg1: i32, %arg2: i32) -> (i32, i32) {
    %c0_i32 = arith.constant 0 : i32
    return %arg0, %arg1 : i32, i32
  }
  func.func @transform_4(%arg0: i32, %arg1: i32, %arg2: i32) -> (i32, i32) {
    %c0_i32 = arith.constant 0 : i32
    return %arg0, %arg1 : i32, i32
  }
}

module attributes {stable_mosaic.version = 11 : i64} {
  func.func @_ln_mm_kernel(%arg0: i32, %arg1: i32, %arg2: memref<2x32xbf16, #tpu.memory_space<vmem>>, %arg3: memref<1x32xf32, #tpu.memory_space<vmem>>, %arg4: memref<1x32xf32, #tpu.memory_space<vmem>>, %arg5: memref<32x16xbf16, #tpu.memory_space<vmem>>, %arg6: memref<2x16xf32, #tpu.memory_space<vmem>>, %arg7: memref<2x32xbf16, #tpu.memory_space<vmem>>) attributes {dimension_semantics = [#tpu.dimension_semantics<parallel>, #tpu.dimension_semantics<arbitrary>], iteration_bounds = array<i64: 1, 1>, scalar_prefetch = 0 : i64, scratch_operands = 1 : i64, tpu.core_type = #tpu.core_type<tc>, window_params = [{transform_indices = @transform_0, window_bounds = array<i64: 2, 32>}, {pipeline_mode = #tpu.pipeline_mode<synchronous>, transform_indices = @transform_1, window_bounds = array<i64: 1, 32>}, {pipeline_mode = #tpu.pipeline_mode<synchronous>, transform_indices = @transform_2, window_bounds = array<i64: 1, 32>}, {transform_indices = @transform_3, window_bounds = array<i64: 32, 16>}, {transform_indices = @transform_4, window_bounds = array<i64: 2, 16>}]} {
    %c0_i32 = arith.constant 0 : i32
    %0 = arith.cmpi eq, %arg1, %c0_i32 : i32
    %1 = arith.extui %0 : i1 to i32
    %c0_i32_0 = arith.constant 0 : i32
    %2 = arith.cmpi ne, %1, %c0_i32_0 : i32
    scf.if %2 {
      %c0_6 = arith.constant 0 : index
      %c0_7 = arith.constant 0 : index
      %7 = vector.load %arg2[%c0_6, %c0_7] : memref<2x32xbf16, #tpu.memory_space<vmem>>, vector<2x32xbf16>
      %8 = arith.extf %7 : vector<2x32xbf16> to vector<2x32xf32>
      %cst_8 = arith.constant dense<0.000000e+00> : vector<2xf32>
      %9 = vector.multi_reduction <add>, %8, %cst_8 [1] : vector<2x32xf32> to vector<2xf32>
      %10 = vector.shape_cast %9 : vector<2xf32> to vector<2x1xf32>
      %cst_9 = arith.constant 3.200000e+01 : f32
      %11 = vector.broadcast %cst_9 : f32 to vector<2x1xf32>
      %12 = arith.divf %10, %11 : vector<2x1xf32>
      %13 = vector.broadcast %12 : vector<2x1xf32> to vector<2x32xf32>
      %14 = arith.subf %8, %13 : vector<2x32xf32>
      %15 = arith.mulf %14, %14 : vector<2x32xf32>
      %cst_10 = arith.constant dense<0.000000e+00> : vector<2xf32>
      %16 = vector.multi_reduction <add>, %15, %cst_10 [1] : vector<2x32xf32> to vector<2xf32>
      %17 = vector.shape_cast %16 : vector<2xf32> to vector<2x1xf32>
      %cst_11 = arith.constant 3.200000e+01 : f32
      %18 = vector.broadcast %cst_11 : f32 to vector<2x1xf32>
      %19 = arith.divf %17, %18 : vector<2x1xf32>
      %20 = vector.broadcast %12 : vector<2x1xf32> to vector<2x32xf32>
      %21 = arith.subf %8, %20 : vector<2x32xf32>
      %cst_12 = arith.constant 9.99999974E-6 : f32
      %22 = vector.broadcast %cst_12 : f32 to vector<2x1xf32>
      %23 = arith.addf %19, %22 : vector<2x1xf32>
      %24 = math.rsqrt %23 : vector<2x1xf32>
      %25 = vector.broadcast %24 : vector<2x1xf32> to vector<2x32xf32>
      %26 = arith.mulf %21, %25 : vector<2x32xf32>
      %c0_13 = arith.constant 0 : index
      %c0_14 = arith.constant 0 : index
      %27 = vector.load %arg3[%c0_13, %c0_14] : memref<1x32xf32, #tpu.memory_space<vmem>>, vector<1x32xf32>
      %28 = vector.broadcast %27 : vector<1x32xf32> to vector<2x32xf32>
      %29 = arith.mulf %26, %28 : vector<2x32xf32>
      %c0_15 = arith.constant 0 : index
      %c0_16 = arith.constant 0 : index
      %30 = vector.load %arg4[%c0_15, %c0_16] : memref<1x32xf32, #tpu.memory_space<vmem>>, vector<1x32xf32>
      %31 = vector.broadcast %30 : vector<1x32xf32> to vector<2x32xf32>
      %32 = arith.addf %29, %31 : vector<2x32xf32>
      %33 = arith.truncf %32 : vector<2x32xf32> to vector<2x32xbf16>
      %c0_17 = arith.constant 0 : index
      %c0_18 = arith.constant 0 : index
      %34 = vector.load %arg7[%c0_17, %c0_18] : memref<2x32xbf16, #tpu.memory_space<vmem>>, vector<2x32xbf16>
      tpu.vector_store %arg7[%c0_17, %c0_18], %33 {strides = array<i32>} : memref<2x32xbf16, #tpu.memory_space<vmem>>, vector<2x32xbf16>,
    } else {
    }
    %c0 = arith.constant 0 : index
    %c0_1 = arith.constant 0 : index
    %3 = vector.load %arg7[%c0, %c0_1] : memref<2x32xbf16, #tpu.memory_space<vmem>>, vector<2x32xbf16>
    %c0_2 = arith.constant 0 : index
    %c0_3 = arith.constant 0 : index
    %4 = vector.load %arg5[%c0_2, %c0_3] : memref<32x16xbf16, #tpu.memory_space<vmem>>, vector<32x16xbf16>
    %cst = arith.constant dense<0.000000e+00> : vector<2x16xf32>
    %5 = tpu.matmul %3, %4, %cst {dimension_numbers = #tpu.dot_dimension_numbers<[1], [0], [0], [1], [0, 0, 1, 1], [], []>} : vector<2x32xbf16>, vector<32x16xbf16>, vector<2x16xf32> -> vector<2x16xf32>
    %c0_4 = arith.constant 0 : index
    %c0_5 = arith.constant 0 : index
    %6 = vector.load %arg6[%c0_4, %c0_5] : memref<2x16xf32, #tpu.memory_space<vmem>>, vector<2x16xf32>
    tpu.vector_store %arg6[%c0_4, %c0_5], %5 {strides = array<i32>} : memref<2x16xf32, #tpu.memory_space<vmem>>, vector<2x16xf32>,
    return
  }
  func.func @transform_0(%arg0: i32, %arg1: i32) -> (i32, i32) {
    %c0_i32 = arith.constant 0 : i32
    %c0_i32_0 = arith.constant 0 : i32
    return %arg0, %c0_i32 : i32, i32
  }
  func.func @transform_1(%arg0: i32, %arg1: i32) -> (i32, i32) {
    %c0_i32 = arith.constant 0 : i32
    %c0_i32_0 = arith.constant 0 : i32
    %c0_i32_1 = arith.constant 0 : i32
    return %c0_i32, %c0_i32_0 : i32, i32
  }
  func.func @transform_2(%arg0: i32, %arg1: i32) -> (i32, i32) {
    %c0_i32 = arith.constant 0 : i32
    %c0_i32_0 = arith.constant 0 : i32
    %c0_i32_1 = arith.constant 0 : i32
    return %c0_i32, %c0_i32_0 : i32, i32
  }
  func.func @transform_3(%arg0: i32, %arg1: i32) -> (i32, i32) {
    %c0_i32 = arith.constant 0 : i32
    %c0_i32_0 = arith.constant 0 : i32
    return %c0_i32, %arg1 : i32, i32
  }
  func.func @transform_4(%arg0: i32, %arg1: i32) -> (i32, i32) {
    %c0_i32 = arith.constant 0 : i32
    return %arg0, %arg1 : i32, i32
  }
}

module attributes {stable_mosaic.version = 11 : i64} {
  func.func @_attn_kernel(%arg0: i32, %arg1: memref<1x8x96xbf16, #tpu.memory_space<vmem>>, %arg2: memref<1x8x32xbf16, #tpu.memory_space<vmem>>) attributes {dimension_semantics = [#tpu.dimension_semantics<parallel>], iteration_bounds = array<i64: 2>, scalar_prefetch = 0 : i64, scratch_operands = 0 : i64, tpu.core_type = #tpu.core_type<tc>, window_params = [{transform_indices = @transform_0, window_bounds = array<i64: 1, 8, 96>}, {transform_indices = @transform_1, window_bounds = array<i64: 1, 8, 32>}]} {
    %c0 = arith.constant 0 : index
    %c0_0 = arith.constant 0 : index
    %c0_1 = arith.constant 0 : index
    %0 = vector.load %arg1[%c0, %c0_0, %c0_1] : memref<1x8x96xbf16, #tpu.memory_space<vmem>>, vector<1x8x96xbf16>
    %1 = vector.shape_cast %0 : vector<1x8x96xbf16> to vector<8x96xbf16>
    %2 = tpu.iota {dimensions = array<i32: 0>} : vector<8x8xi32>
    %3 = tpu.iota {dimensions = array<i32: 1>} : vector<8x8xi32>
    %4 = arith.cmpi sle, %3, %2 : vector<8x8xi32>
    %5 = vector.extract_strided_slice %1 {offsets = [0, 0], sizes = [8, 8], strides = [1, 1]} : vector<8x96xbf16> to vector<8x8xbf16>
    %6 = vector.extract_strided_slice %1 {offsets = [0, 32], sizes = [8, 8], strides = [1, 1]} : vector<8x96xbf16> to vector<8x8xbf16>
    %7 = vector.extract_strided_slice %1 {offsets = [0, 64], sizes = [8, 8], strides = [1, 1]} : vector<8x96xbf16> to vector<8x8xbf16>
    %cst = arith.constant dense<0.000000e+00> : vector<8x8xf32>
    %8 = tpu.matmul %5, %6, %cst {dimension_numbers = #tpu.dot_dimension_numbers<[1], [1], [0], [0], [0, 0, 1, 0], [], []>} : vector<8x8xbf16>, vector<8x8xbf16>, vector<8x8xf32> -> vector<8x8xf32>
    %cst_2 = arith.constant 0.353553385 : f32
    %9 = vector.broadcast %cst_2 : f32 to vector<8x8xf32>
    %10 = arith.mulf %8, %9 : vector<8x8xf32>
    %cst_3 = arith.constant -1.000000e+09 : f32
    %11 = vector.broadcast %cst_3 : f32 to vector<8x8xf32>
    %12 = arith.select %4, %10, %11 : vector<8x8xi1>, vector<8x8xf32>
    %cst_4 = arith.constant dense<0xFF800000> : vector<8xf32>
    %13 = vector.multi_reduction <maximumf>, %12, %cst_4 [1] : vector<8x8xf32> to vector<8xf32>
    %14 = vector.shape_cast %13 : vector<8xf32> to vector<8x1xf32>
    %15 = vector.broadcast %14 : vector<8x1xf32> to vector<8x8xf32>
    %16 = arith.subf %12, %15 : vector<8x8xf32>
    %17 = math.exp %16 : vector<8x8xf32>
    %cst_5 = arith.constant dense<0.000000e+00> : vector<8xf32>
    %18 = vector.multi_reduction <add>, %17, %cst_5 [1] : vector<8x8xf32> to vector<8xf32>
    %19 = vector.shape_cast %18 : vector<8xf32> to vector<8x1xf32>
    %20 = arith.truncf %17 : vector<8x8xf32> to vector<8x8xbf16>
    %cst_6 = arith.constant dense<0.000000e+00> : vector<8x8xf32>
    %21 = tpu.matmul %20, %7, %cst_6 {dimension_numbers = #tpu.dot_dimension_numbers<[1], [0], [0], [1], [0, 0, 1, 1], [], []>} : vector<8x8xbf16>, vector<8x8xbf16>, vector<8x8xf32> -> vector<8x8xf32>
    %22 = tpu.reciprocal %19 {approx = true} : vector<8x1xf32> -> vector<8x1xf32>
    %23 = vector.broadcast %22 : vector<8x1xf32> to vector<8x8xf32>
    %24 = arith.mulf %21, %23 : vector<8x8xf32>
    %25 = arith.truncf %24 : vector<8x8xf32> to vector<8x8xbf16>
    %c0_7 = arith.constant 0 : index
    %c0_8 = arith.constant 0 : index
    %c0_9 = arith.constant 0 : index
    %26 = vector.load %arg2[%c0_7, %c0_8, %c0_9] : memref<1x8x32xbf16, #tpu.memory_space<vmem>>, vector<1x8x8xbf16>
    %27 = vector.shape_cast %26 : vector<1x8x8xbf16> to vector<8x8xbf16>
    %28 = vector.shape_cast %25 : vector<8x8xbf16> to vector<1x8x8xbf16>
    tpu.vector_store %arg2[%c0_7, %c0_8, %c0_9], %28 {strides = array<i32>} : memref<1x8x32xbf16, #tpu.memory_space<vmem>>, vector<1x8x8xbf16>,
    %29 = vector.extract_strided_slice %1 {offsets = [0, 8], sizes = [8, 8], strides = [1, 1]} : vector<8x96xbf16> to vector<8x8xbf16>
    %30 = vector.extract_strided_slice %1 {offsets = [0, 40], sizes = [8, 8], strides = [1, 1]} : vector<8x96xbf16> to vector<8x8xbf16>
    %31 = vector.extract_strided_slice %1 {offsets = [0, 72], sizes = [8, 8], strides = [1, 1]} : vector<8x96xbf16> to vector<8x8xbf16>
    %cst_10 = arith.constant dense<0.000000e+00> : vector<8x8xf32>
    %32 = tpu.matmul %29, %30, %cst_10 {dimension_numbers = #tpu.dot_dimension_numbers<[1], [1], [0], [0], [0, 0, 1, 0], [], []>} : vector<8x8xbf16>, vector<8x8xbf16>, vector<8x8xf32> -> vector<8x8xf32>
    %cst_11 = arith.constant 0.353553385 : f32
    %33 = vector.broadcast %cst_11 : f32 to vector<8x8xf32>
    %34 = arith.mulf %32, %33 : vector<8x8xf32>
    %cst_12 = arith.constant -1.000000e+09 : f32
    %35 = vector.broadcast %cst_12 : f32 to vector<8x8xf32>
    %36 = arith.select %4, %34, %35 : vector<8x8xi1>, vector<8x8xf32>
    %cst_13 = arith.constant dense<0xFF800000> : vector<8xf32>
    %37 = vector.multi_reduction <maximumf>, %36, %cst_13 [1] : vector<8x8xf32> to vector<8xf32>
    %38 = vector.shape_cast %37 : vector<8xf32> to vector<8x1xf32>
    %39 = vector.broadcast %38 : vector<8x1xf32> to vector<8x8xf32>
    %40 = arith.subf %36, %39 : vector<8x8xf32>
    %41 = math.exp %40 : vector<8x8xf32>
    %cst_14 = arith.constant dense<0.000000e+00> : vector<8xf32>
    %42 = vector.multi_reduction <add>, %41, %cst_14 [1] : vector<8x8xf32> to vector<8xf32>
    %43 = vector.shape_cast %42 : vector<8xf32> to vector<8x1xf32>
    %44 = arith.truncf %41 : vector<8x8xf32> to vector<8x8xbf16>
    %cst_15 = arith.constant dense<0.000000e+00> : vector<8x8xf32>
    %45 = tpu.matmul %44, %31, %cst_15 {dimension_numbers = #tpu.dot_dimension_numbers<[1], [0], [0], [1], [0, 0, 1, 1], [], []>} : vector<8x8xbf16>, vector<8x8xbf16>, vector<8x8xf32> -> vector<8x8xf32>
    %46 = tpu.reciprocal %43 {approx = true} : vector<8x1xf32> -> vector<8x1xf32>
    %47 = vector.broadcast %46 : vector<8x1xf32> to vector<8x8xf32>
    %48 = arith.mulf %45, %47 : vector<8x8xf32>
    %49 = arith.truncf %48 : vector<8x8xf32> to vector<8x8xbf16>
    %c0_16 = arith.constant 0 : index
    %c0_17 = arith.constant 0 : index
    %c8 = arith.constant 8 : index
    %50 = vector.load %arg2[%c0_16, %c0_17, %c8] : memref<1x8x32xbf16, #tpu.memory_space<vmem>>, vector<1x8x8xbf16>
    %51 = vector.shape_cast %50 : vector<1x8x8xbf16> to vector<8x8xbf16>
    %52 = vector.shape_cast %49 : vector<8x8xbf16> to vector<1x8x8xbf16>
    tpu.vector_store %arg2[%c0_16, %c0_17, %c8], %52 {strides = array<i32>} : memref<1x8x32xbf16, #tpu.memory_space<vmem>>, vector<1x8x8xbf16>,
    %53 = vector.extract_strided_slice %1 {offsets = [0, 16], sizes = [8, 8], strides = [1, 1]} : vector<8x96xbf16> to vector<8x8xbf16>
    %54 = vector.extract_strided_slice %1 {offsets = [0, 48], sizes = [8, 8], strides = [1, 1]} : vector<8x96xbf16> to vector<8x8xbf16>
    %55 = vector.extract_strided_slice %1 {offsets = [0, 80], sizes = [8, 8], strides = [1, 1]} : vector<8x96xbf16> to vector<8x8xbf16>
    %cst_18 = arith.constant dense<0.000000e+00> : vector<8x8xf32>
    %56 = tpu.matmul %53, %54, %cst_18 {dimension_numbers = #tpu.dot_dimension_numbers<[1], [1], [0], [0], [0, 0, 1, 0], [], []>} : vector<8x8xbf16>, vector<8x8xbf16>, vector<8x8xf32> -> vector<8x8xf32>
    %cst_19 = arith.constant 0.353553385 : f32
    %57 = vector.broadcast %cst_19 : f32 to vector<8x8xf32>
    %58 = arith.mulf %56, %57 : vector<8x8xf32>
    %cst_20 = arith.constant -1.000000e+09 : f32
    %59 = vector.broadcast %cst_20 : f32 to vector<8x8xf32>
    %60 = arith.select %4, %58, %59 : vector<8x8xi1>, vector<8x8xf32>
    %cst_21 = arith.constant dense<0xFF800000> : vector<8xf32>
    %61 = vector.multi_reduction <maximumf>, %60, %cst_21 [1] : vector<8x8xf32> to vector<8xf32>
    %62 = vector.shape_cast %61 : vector<8xf32> to vector<8x1xf32>
    %63 = vector.broadcast %62 : vector<8x1xf32> to vector<8x8xf32>
    %64 = arith.subf %60, %63 : vector<8x8xf32>
    %65 = math.exp %64 : vector<8x8xf32>
    %cst_22 = arith.constant dense<0.000000e+00> : vector<8xf32>
    %66 = vector.multi_reduction <add>, %65, %cst_22 [1] : vector<8x8xf32> to vector<8xf32>
    %67 = vector.shape_cast %66 : vector<8xf32> to vector<8x1xf32>
    %68 = arith.truncf %65 : vector<8x8xf32> to vector<8x8xbf16>
    %cst_23 = arith.constant dense<0.000000e+00> : vector<8x8xf32>
    %69 = tpu.matmul %68, %55, %cst_23 {dimension_numbers = #tpu.dot_dimension_numbers<[1], [0], [0], [1], [0, 0, 1, 1], [], []>} : vector<8x8xbf16>, vector<8x8xbf16>, vector<8x8xf32> -> vector<8x8xf32>
    %70 = tpu.reciprocal %67 {approx = true} : vector<8x1xf32> -> vector<8x1xf32>
    %71 = vector.broadcast %70 : vector<8x1xf32> to vector<8x8xf32>
    %72 = arith.mulf %69, %71 : vector<8x8xf32>
    %73 = arith.truncf %72 : vector<8x8xf32> to vector<8x8xbf16>
    %c0_24 = arith.constant 0 : index
    %c0_25 = arith.constant 0 : index
    %c16 = arith.constant 16 : index
    %74 = vector.load %arg2[%c0_24, %c0_25, %c16] : memref<1x8x32xbf16, #tpu.memory_space<vmem>>, vector<1x8x8xbf16>
    %75 = vector.shape_cast %74 : vector<1x8x8xbf16> to vector<8x8xbf16>
    %76 = vector.shape_cast %73 : vector<8x8xbf16> to vector<1x8x8xbf16>
    tpu.vector_store %arg2[%c0_24, %c0_25, %c16], %76 {strides = array<i32>} : memref<1x8x32xbf16, #tpu.memory_space<vmem>>, vector<1x8x8xbf16>,
    %77 = vector.extract_strided_slice %1 {offsets = [0, 24], sizes = [8, 8], strides = [1, 1]} : vector<8x96xbf16> to vector<8x8xbf16>
    %78 = vector.extract_strided_slice %1 {offsets = [0, 56], sizes = [8, 8], strides = [1, 1]} : vector<8x96xbf16> to vector<8x8xbf16>
    %79 = vector.extract_strided_slice %1 {offsets = [0, 88], sizes = [8, 8], strides = [1, 1]} : vector<8x96xbf16> to vector<8x8xbf16>
    %cst_26 = arith.constant dense<0.000000e+00> : vector<8x8xf32>
    %80 = tpu.matmul %77, %78, %cst_26 {dimension_numbers = #tpu.dot_dimension_numbers<[1], [1], [0], [0], [0, 0, 1, 0], [], []>} : vector<8x8xbf16>, vector<8x8xbf16>, vector<8x8xf32> -> vector<8x8xf32>
    %cst_27 = arith.constant 0.353553385 : f32
    %81 = vector.broadcast %cst_27 : f32 to vector<8x8xf32>
    %82 = arith.mulf %80, %81 : vector<8x8xf32>
    %cst_28 = arith.constant -1.000000e+09 : f32
    %83 = vector.broadcast %cst_28 : f32 to vector<8x8xf32>
    %84 = arith.select %4, %82, %83 : vector<8x8xi1>, vector<8x8xf32>
    %cst_29 = arith.constant dense<0xFF800000> : vector<8xf32>
    %85 = vector.multi_reduction <maximumf>, %84, %cst_29 [1] : vector<8x8xf32> to vector<8xf32>
    %86 = vector.shape_cast %85 : vector<8xf32> to vector<8x1xf32>
    %87 = vector.broadcast %86 : vector<8x1xf32> to vector<8x8xf32>
    %88 = arith.subf %84, %87 : vector<8x8xf32>
    %89 = math.exp %88 : vector<8x8xf32>
    %cst_30 = arith.constant dense<0.000000e+00> : vector<8xf32>
    %90 = vector.multi_reduction <add>, %89, %cst_30 [1] : vector<8x8xf32> to vector<8xf32>
    %91 = vector.shape_cast %90 : vector<8xf32> to vector<8x1xf32>
    %92 = arith.truncf %89 : vector<8x8xf32> to vector<8x8xbf16>
    %cst_31 = arith.constant dense<0.000000e+00> : vector<8x8xf32>
    %93 = tpu.matmul %92, %79, %cst_31 {dimension_numbers = #tpu.dot_dimension_numbers<[1], [0], [0], [1], [0, 0, 1, 1], [], []>} : vector<8x8xbf16>, vector<8x8xbf16>, vector<8x8xf32> -> vector<8x8xf32>
    %94 = tpu.reciprocal %91 {approx = true} : vector<8x1xf32> -> vector<8x1xf32>
    %95 = vector.broadcast %94 : vector<8x1xf32> to vector<8x8xf32>
    %96 = arith.mulf %93, %95 : vector<8x8xf32>
    %97 = arith.truncf %96 : vector<8x8xf32> to vector<8x8xbf16>
    %c0_32 = arith.constant 0 : index
    %c0_33 = arith.constant 0 : index
    %c24 = arith.constant 24 : index
    %98 = vector.load %arg2[%c0_32, %c0_33, %c24] : memref<1x8x32xbf16, #tpu.memory_space<vmem>>, vector<1x8x8xbf16>
    %99 = vector.shape_cast %98 : vector<1x8x8xbf16> to vector<8x8xbf16>
    %100 = vector.shape_cast %97 : vector<8x8xbf16> to vector<1x8x8xbf16>
    tpu.vector_store %arg2[%c0_32, %c0_33, %c24], %100 {strides = array<i32>} : memref<1x8x32xbf16, #tpu.memory_space<vmem>>, vector<1x8x8xbf16>,
    return
  }
  func.func @transform_0(%arg0: i32) -> (i32, i32, i32) {
    %c0_i32 = arith.constant 0 : i32
    %c0_i32_0 = arith.constant 0 : i32
    %c0_i32_1 = arith.constant 0 : i32
    return %arg0, %c0_i32, %c0_i32_0 : i32, i32, i32
  }
  func.func @transform_1(%arg0: i32) -> (i32, i32, i32) {
    %c0_i32 = arith.constant 0 : i32
    %c0_i32_0 = arith.constant 0 : i32
    %c0_i32_1 = arith.constant 0 : i32
    return %arg0, %c0_i32, %c0_i32_0 : i32, i32, i32
  }
}

module attributes {stable_mosaic.version = 11 : i64} {
  func.func @_mm_kernel(%arg0: i32, %arg1: i32, %arg2: i32, %arg3: memref<16x32xbf16, #tpu.memory_space<vmem>>, %arg4: memref<32x32xbf16, #tpu.memory_space<vmem>>, %arg5: memref<1x32xf32, #tpu.memory_space<vmem>>, %arg6: memref<16x32xbf16, #tpu.memory_space<vmem>>, %arg7: memref<16x32xbf16, #tpu.memory_space<vmem>>, %arg8: memref<16x32xf32, #tpu.memory_space<vmem>>) attributes {dimension_semantics = [#tpu.dimension_semantics<parallel>, #tpu.dimension_semantics<parallel>, #tpu.dimension_semantics<arbitrary>], iteration_bounds = array<i64: 1, 1, 1>, scalar_prefetch = 0 : i64, scratch_operands = 1 : i64, tpu.core_type = #tpu.core_type<tc>, window_params = [{transform_indices = @transform_0, window_bounds = array<i64: 16, 32>}, {transform_indices = @transform_1, window_bounds = array<i64: 32, 32>}, {transform_indices = @transform_2, window_bounds = array<i64: 1, 32>}, {transform_indices = @transform_3, window_bounds = array<i64: 16, 32>}, {transform_indices = @transform_4, window_bounds = array<i64: 16, 32>}]} {
    %c0_i32 = arith.constant 0 : i32
    %0 = arith.cmpi eq, %arg2, %c0_i32 : i32
    %1 = arith.extui %0 : i1 to i32
    %c0_i32_0 = arith.constant 0 : i32
    %2 = arith.cmpi ne, %1, %c0_i32_0 : i32
    scf.if %2 {
      %cst_10 = arith.constant 0.000000e+00 : f32
      %12 = vector.broadcast %cst_10 : f32 to vector<16x32xf32>
      %c0_11 = arith.constant 0 : index
      %c0_12 = arith.constant 0 : index
      %13 = vector.load %arg8[%c0_11, %c0_12] : memref<16x32xf32, #tpu.memory_space<vmem>>, vector<16x32xf32>
      tpu.vector_store %arg8[%c0_11, %c0_12], %12 {strides = array<i32>} : memref<16x32xf32, #tpu.memory_space<vmem>>, vector<16x32xf32>,
    } else {
    }
    %c0 = arith.constant 0 : index
    %c0_1 = arith.constant 0 : index
    %3 = vector.load %arg8[%c0, %c0_1] : memref<16x32xf32, #tpu.memory_space<vmem>>, vector<16x32xf32>
    %c0_2 = arith.constant 0 : index
    %c0_3 = arith.constant 0 : index
    %4 = vector.load %arg3[%c0_2, %c0_3] : memref<16x32xbf16, #tpu.memory_space<vmem>>, vector<16x32xbf16>
    %c0_4 = arith.constant 0 : index
    %c0_5 = arith.constant 0 : index
    %5 = vector.load %arg4[%c0_4, %c0_5] : memref<32x32xbf16, #tpu.memory_space<vmem>>, vector<32x32xbf16>
    %cst = arith.constant dense<0.000000e+00> : vector<16x32xf32>
    %6 = tpu.matmul %4, %5, %cst {dimension_numbers = #tpu.dot_dimension_numbers<[1], [0], [0], [1], [0, 0, 1, 1], [], []>} : vector<16x32xbf16>, vector<32x32xbf16>, vector<16x32xf32> -> vector<16x32xf32>
    %7 = arith.addf %3, %6 : vector<16x32xf32>
    %c0_6 = arith.constant 0 : index
    %c0_7 = arith.constant 0 : index
    %8 = vector.load %arg8[%c0_6, %c0_7] : memref<16x32xf32, #tpu.memory_space<vmem>>, vector<16x32xf32>
    tpu.vector_store %arg8[%c0_6, %c0_7], %7 {strides = array<i32>} : memref<16x32xf32, #tpu.memory_space<vmem>>, vector<16x32xf32>,
    %c0_i32_8 = arith.constant 0 : i32
    %9 = arith.cmpi eq, %arg2, %c0_i32_8 : i32
    %10 = arith.extui %9 : i1 to i32
    %c0_i32_9 = arith.constant 0 : i32
    %11 = arith.cmpi ne, %10, %c0_i32_9 : i32
    scf.if %11 {
      %c0_10 = arith.constant 0 : index
      %c0_11 = arith.constant 0 : index
      %12 = vector.load %arg8[%c0_10, %c0_11] : memref<16x32xf32, #tpu.memory_space<vmem>>, vector<16x32xf32>
      %c0_12 = arith.constant 0 : index
      %c0_13 = arith.constant 0 : index
      %13 = vector.load %arg5[%c0_12, %c0_13] : memref<1x32xf32, #tpu.memory_space<vmem>>, vector<1x32xf32>
      %14 = vector.broadcast %13 : vector<1x32xf32> to vector<16x32xf32>
      %15 = arith.addf %12, %14 : vector<16x32xf32>
      %c0_14 = arith.constant 0 : index
      %c0_15 = arith.constant 0 : index
      %16 = vector.load %arg6[%c0_14, %c0_15] : memref<16x32xbf16, #tpu.memory_space<vmem>>, vector<16x32xbf16>
      %17 = arith.extf %16 : vector<16x32xbf16> to vector<16x32xf32>
      %18 = arith.addf %15, %17 : vector<16x32xf32>
      %19 = arith.truncf %18 : vector<16x32xf32> to vector<16x32xbf16>
      %c0_16 = arith.constant 0 : index
      %c0_17 = arith.constant 0 : index
      %20 = vector.load %arg7[%c0_16, %c0_17] : memref<16x32xbf16, #tpu.memory_space<vmem>>, vector<16x32xbf16>
      tpu.vector_store %arg7[%c0_16, %c0_17], %19 {strides = array<i32>} : memref<16x32xbf16, #tpu.memory_space<vmem>>, vector<16x32xbf16>,
    } else {
    }
    return
  }
  func.func @transform_0(%arg0: i32, %arg1: i32, %arg2: i32) -> (i32, i32) {
    %c0_i32 = arith.constant 0 : i32
    return %arg0, %arg2 : i32, i32
  }
  func.func @transform_1(%arg0: i32, %arg1: i32, %arg2: i32) -> (i32, i32) {
    %c0_i32 = arith.constant 0 : i32
    return %arg2, %arg1 : i32, i32
  }
  func.func @transform_2(%arg0: i32, %arg1: i32, %arg2: i32) -> (i32, i32) {
    %c0_i32 = arith.constant 0 : i32
    %c0_i32_0 = arith.constant 0 : i32
    return %c0_i32, %arg1 : i32, i32
  }
  func.func @transform_3(%arg0: i32, %arg1: i32, %arg2: i32) -> (i32, i32) {
    %c0_i32 = arith.constant 0 : i32
    return %arg0, %arg1 : i32, i32
  }
  func.func @transform_4(%arg0: i32, %arg1: i32, %arg2: i32) -> (i32, i32) {
    %c0_i32 = arith.constant 0 : i32
    return %arg0, %arg1 : i32, i32
  }
}

module attributes {stable_mosaic.version = 11 : i64} {
  func.func @_ln_mm_kernel(%arg0: i32, %arg1: i32, %arg2: memref<16x32xbf16, #tpu.memory_space<vmem>>, %arg3: memref<1x32xf32, #tpu.memory_space<vmem>>, %arg4: memref<1x32xf32, #tpu.memory_space<vmem>>, %arg5: memref<32x96xbf16, #tpu.memory_space<vmem>>, %arg6: memref<1x96xf32, #tpu.memory_space<vmem>>, %arg7: memref<16x96xbf16, #tpu.memory_space<vmem>>, %arg8: memref<16x32xbf16, #tpu.memory_space<vmem>>) attributes {dimension_semantics = [#tpu.dimension_semantics<parallel>, #tpu.dimension_semantics<arbitrary>], iteration_bounds = array<i64: 1, 1>, scalar_prefetch = 0 : i64, scratch_operands = 1 : i64, tpu.core_type = #tpu.core_type<tc>, window_params = [{transform_indices = @transform_0, window_bounds = array<i64: 16, 32>}, {pipeline_mode = #tpu.pipeline_mode<synchronous>, transform_indices = @transform_1, window_bounds = array<i64: 1, 32>}, {pipeline_mode = #tpu.pipeline_mode<synchronous>, transform_indices = @transform_2, window_bounds = array<i64: 1, 32>}, {transform_indices = @transform_3, window_bounds = array<i64: 32, 96>}, {transform_indices = @transform_4, window_bounds = array<i64: 1, 96>}, {transform_indices = @transform_5, window_bounds = array<i64: 16, 96>}]} {
    %c0_i32 = arith.constant 0 : i32
    %0 = arith.cmpi eq, %arg1, %c0_i32 : i32
    %1 = arith.extui %0 : i1 to i32
    %c0_i32_0 = arith.constant 0 : i32
    %2 = arith.cmpi ne, %1, %c0_i32_0 : i32
    scf.if %2 {
      %c0_8 = arith.constant 0 : index
      %c0_9 = arith.constant 0 : index
      %11 = vector.load %arg2[%c0_8, %c0_9] : memref<16x32xbf16, #tpu.memory_space<vmem>>, vector<16x32xbf16>
      %12 = arith.extf %11 : vector<16x32xbf16> to vector<16x32xf32>
      %cst_10 = arith.constant dense<0.000000e+00> : vector<16xf32>
      %13 = vector.multi_reduction <add>, %12, %cst_10 [1] : vector<16x32xf32> to vector<16xf32>
      %14 = vector.shape_cast %13 : vector<16xf32> to vector<16x1xf32>
      %cst_11 = arith.constant 3.200000e+01 : f32
      %15 = vector.broadcast %cst_11 : f32 to vector<16x1xf32>
      %16 = arith.divf %14, %15 : vector<16x1xf32>
      %17 = vector.broadcast %16 : vector<16x1xf32> to vector<16x32xf32>
      %18 = arith.subf %12, %17 : vector<16x32xf32>
      %19 = arith.mulf %18, %18 : vector<16x32xf32>
      %cst_12 = arith.constant dense<0.000000e+00> : vector<16xf32>
      %20 = vector.multi_reduction <add>, %19, %cst_12 [1] : vector<16x32xf32> to vector<16xf32>
      %21 = vector.shape_cast %20 : vector<16xf32> to vector<16x1xf32>
      %cst_13 = arith.constant 3.200000e+01 : f32
      %22 = vector.broadcast %cst_13 : f32 to vector<16x1xf32>
      %23 = arith.divf %21, %22 : vector<16x1xf32>
      %24 = vector.broadcast %16 : vector<16x1xf32> to vector<16x32xf32>
      %25 = arith.subf %12, %24 : vector<16x32xf32>
      %cst_14 = arith.constant 9.99999974E-6 : f32
      %26 = vector.broadcast %cst_14 : f32 to vector<16x1xf32>
      %27 = arith.addf %23, %26 : vector<16x1xf32>
      %28 = math.rsqrt %27 : vector<16x1xf32>
      %29 = vector.broadcast %28 : vector<16x1xf32> to vector<16x32xf32>
      %30 = arith.mulf %25, %29 : vector<16x32xf32>
      %c0_15 = arith.constant 0 : index
      %c0_16 = arith.constant 0 : index
      %31 = vector.load %arg3[%c0_15, %c0_16] : memref<1x32xf32, #tpu.memory_space<vmem>>, vector<1x32xf32>
      %32 = vector.broadcast %31 : vector<1x32xf32> to vector<16x32xf32>
      %33 = arith.mulf %30, %32 : vector<16x32xf32>
      %c0_17 = arith.constant 0 : index
      %c0_18 = arith.constant 0 : index
      %34 = vector.load %arg4[%c0_17, %c0_18] : memref<1x32xf32, #tpu.memory_space<vmem>>, vector<1x32xf32>
      %35 = vector.broadcast %34 : vector<1x32xf32> to vector<16x32xf32>
      %36 = arith.addf %33, %35 : vector<16x32xf32>
      %37 = arith.truncf %36 : vector<16x32xf32> to vector<16x32xbf16>
      %c0_19 = arith.constant 0 : index
      %c0_20 = arith.constant 0 : index
      %38 = vector.load %arg8[%c0_19, %c0_20] : memref<16x32xbf16, #tpu.memory_space<vmem>>, vector<16x32xbf16>
      tpu.vector_store %arg8[%c0_19, %c0_20], %37 {strides = array<i32>} : memref<16x32xbf16, #tpu.memory_space<vmem>>, vector<16x32xbf16>,
    } else {
    }
    %c0 = arith.constant 0 : index
    %c0_1 = arith.constant 0 : index
    %3 = vector.load %arg8[%c0, %c0_1] : memref<16x32xbf16, #tpu.memory_space<vmem>>, vector<16x32xbf16>
    %c0_2 = arith.constant 0 : index
    %c0_3 = arith.constant 0 : index
    %4 = vector.load %arg5[%c0_2, %c0_3] : memref<32x96xbf16, #tpu.memory_space<vmem>>, vector<32x96xbf16>
    %cst = arith.constant dense<0.000000e+00> : vector<16x96xf32>
    %5 = tpu.matmul %3, %4, %cst {dimension_numbers = #tpu.dot_dimension_numbers<[1], [0], [0], [1], [0, 0, 1, 1], [], []>} : vector<16x32xbf16>, vector<32x96xbf16>, vector<16x96xf32> -> vector<16x96xf32>
    %c0_4 = arith.constant 0 : index
    %c0_5 = arith.constant 0 : index
    %6 = vector.load %arg6[%c0_4, %c0_5] : memref<1x96xf32, #tpu.memory_space<vmem>>, vector<1x96xf32>
    %7 = vector.broadcast %6 : vector<1x96xf32> to vector<16x96xf32>
    %8 = arith.addf %5, %7 : vector<16x96xf32>
    %9 = arith.truncf %8 : vector<16x96xf32> to vector<16x96xbf16>
    %c0_6 = arith.constant 0 : index
    %c0_7 = arith.constant 0 : index
    %10 = vector.load %arg7[%c0_6, %c0_7] : memref<16x96xbf16, #tpu.memory_space<vmem>>, vector<16x96xbf16>
    tpu.vector_store %arg7[%c0_6, %c0_7], %9 {strides = array<i32>} : memref<16x96xbf16, #tpu.memory_space<vmem>>, vector<16x96xbf16>,
    return
  }
  func.func @transform_0(%arg0: i32, %arg1: i32) -> (i32, i32) {
    %c0_i32 = arith.constant 0 : i32
    %c0_i32_0 = arith.constant 0 : i32
    return %arg0, %c0_i32 : i32, i32
  }
  func.func @transform_1(%arg0: i32, %arg1: i32) -> (i32, i32) {
    %c0_i32 = arith.constant 0 : i32
    %c0_i32_0 = arith.constant 0 : i32
    %c0_i32_1 = arith.constant 0 : i32
    return %c0_i32, %c0_i32_0 : i32, i32
  }
  func.func @transform_2(%arg0: i32, %arg1: i32) -> (i32, i32) {
    %c0_i32 = arith.constant 0 : i32
    %c0_i32_0 = arith.constant 0 : i32
    %c0_i32_1 = arith.constant 0 : i32
    return %c0_i32, %c0_i32_0 : i32, i32
  }
  func.func @transform_3(%arg0: i32, %arg1: i32) -> (i32, i32) {
    %c0_i32 = arith.constant 0 : i32
    %c0_i32_0 = arith.constant 0 : i32
    return %c0_i32, %arg1 : i32, i32
  }
  func.func @transform_4(%arg0: i32, %arg1: i32) -> (i32, i32) {
    %c0_i32 = arith.constant 0 : i32
    %c0_i32_0 = arith.constant 0 : i32
    return %c0_i32, %arg1 : i32, i32
  }
  func.func @transform_5(%arg0: i32, %arg1: i32) -> (i32, i32) {
    %c0_i32 = arith.constant 0 : i32
    return %arg0, %arg1 : i32, i32
  }
}

module attributes {stable_mosaic.version = 11 : i64} {
  func.func @_ln_mm_kernel(%arg0: i32, %arg1: i32, %arg2: memref<16x32xbf16, #tpu.memory_space<vmem>>, %arg3: memref<1x32xf32, #tpu.memory_space<vmem>>, %arg4: memref<1x32xf32, #tpu.memory_space<vmem>>, %arg5: memref<32x128xbf16, #tpu.memory_space<vmem>>, %arg6: memref<1x128xf32, #tpu.memory_space<vmem>>, %arg7: memref<16x128xbf16, #tpu.memory_space<vmem>>, %arg8: memref<16x32xbf16, #tpu.memory_space<vmem>>) attributes {dimension_semantics = [#tpu.dimension_semantics<parallel>, #tpu.dimension_semantics<arbitrary>], iteration_bounds = array<i64: 1, 1>, scalar_prefetch = 0 : i64, scratch_operands = 1 : i64, tpu.core_type = #tpu.core_type<tc>, window_params = [{transform_indices = @transform_0, window_bounds = array<i64: 16, 32>}, {pipeline_mode = #tpu.pipeline_mode<synchronous>, transform_indices = @transform_1, window_bounds = array<i64: 1, 32>}, {pipeline_mode = #tpu.pipeline_mode<synchronous>, transform_indices = @transform_2, window_bounds = array<i64: 1, 32>}, {transform_indices = @transform_3, window_bounds = array<i64: 32, 128>}, {transform_indices = @transform_4, window_bounds = array<i64: 1, 128>}, {transform_indices = @transform_5, window_bounds = array<i64: 16, 128>}]} {
    %c0_i32 = arith.constant 0 : i32
    %0 = arith.cmpi eq, %arg1, %c0_i32 : i32
    %1 = arith.extui %0 : i1 to i32
    %c0_i32_0 = arith.constant 0 : i32
    %2 = arith.cmpi ne, %1, %c0_i32_0 : i32
    scf.if %2 {
      %c0_10 = arith.constant 0 : index
      %c0_11 = arith.constant 0 : index
      %19 = vector.load %arg2[%c0_10, %c0_11] : memref<16x32xbf16, #tpu.memory_space<vmem>>, vector<16x32xbf16>
      %20 = arith.extf %19 : vector<16x32xbf16> to vector<16x32xf32>
      %cst_12 = arith.constant dense<0.000000e+00> : vector<16xf32>
      %21 = vector.multi_reduction <add>, %20, %cst_12 [1] : vector<16x32xf32> to vector<16xf32>
      %22 = vector.shape_cast %21 : vector<16xf32> to vector<16x1xf32>
      %cst_13 = arith.constant 3.200000e+01 : f32
      %23 = vector.broadcast %cst_13 : f32 to vector<16x1xf32>
      %24 = arith.divf %22, %23 : vector<16x1xf32>
      %25 = vector.broadcast %24 : vector<16x1xf32> to vector<16x32xf32>
      %26 = arith.subf %20, %25 : vector<16x32xf32>
      %27 = arith.mulf %26, %26 : vector<16x32xf32>
      %cst_14 = arith.constant dense<0.000000e+00> : vector<16xf32>
      %28 = vector.multi_reduction <add>, %27, %cst_14 [1] : vector<16x32xf32> to vector<16xf32>
      %29 = vector.shape_cast %28 : vector<16xf32> to vector<16x1xf32>
      %cst_15 = arith.constant 3.200000e+01 : f32
      %30 = vector.broadcast %cst_15 : f32 to vector<16x1xf32>
      %31 = arith.divf %29, %30 : vector<16x1xf32>
      %32 = vector.broadcast %24 : vector<16x1xf32> to vector<16x32xf32>
      %33 = arith.subf %20, %32 : vector<16x32xf32>
      %cst_16 = arith.constant 9.99999974E-6 : f32
      %34 = vector.broadcast %cst_16 : f32 to vector<16x1xf32>
      %35 = arith.addf %31, %34 : vector<16x1xf32>
      %36 = math.rsqrt %35 : vector<16x1xf32>
      %37 = vector.broadcast %36 : vector<16x1xf32> to vector<16x32xf32>
      %38 = arith.mulf %33, %37 : vector<16x32xf32>
      %c0_17 = arith.constant 0 : index
      %c0_18 = arith.constant 0 : index
      %39 = vector.load %arg3[%c0_17, %c0_18] : memref<1x32xf32, #tpu.memory_space<vmem>>, vector<1x32xf32>
      %40 = vector.broadcast %39 : vector<1x32xf32> to vector<16x32xf32>
      %41 = arith.mulf %38, %40 : vector<16x32xf32>
      %c0_19 = arith.constant 0 : index
      %c0_20 = arith.constant 0 : index
      %42 = vector.load %arg4[%c0_19, %c0_20] : memref<1x32xf32, #tpu.memory_space<vmem>>, vector<1x32xf32>
      %43 = vector.broadcast %42 : vector<1x32xf32> to vector<16x32xf32>
      %44 = arith.addf %41, %43 : vector<16x32xf32>
      %45 = arith.truncf %44 : vector<16x32xf32> to vector<16x32xbf16>
      %c0_21 = arith.constant 0 : index
      %c0_22 = arith.constant 0 : index
      %46 = vector.load %arg8[%c0_21, %c0_22] : memref<16x32xbf16, #tpu.memory_space<vmem>>, vector<16x32xbf16>
      tpu.vector_store %arg8[%c0_21, %c0_22], %45 {strides = array<i32>} : memref<16x32xbf16, #tpu.memory_space<vmem>>, vector<16x32xbf16>,
    } else {
    }
    %c0 = arith.constant 0 : index
    %c0_1 = arith.constant 0 : index
    %3 = vector.load %arg8[%c0, %c0_1] : memref<16x32xbf16, #tpu.memory_space<vmem>>, vector<16x32xbf16>
    %c0_2 = arith.constant 0 : index
    %c0_3 = arith.constant 0 : index
    %4 = vector.load %arg5[%c0_2, %c0_3] : memref<32x128xbf16, #tpu.memory_space<vmem>>, vector<32x128xbf16>
    %cst = arith.constant dense<0.000000e+00> : vector<16x128xf32>
    %5 = tpu.matmul %3, %4, %cst {dimension_numbers = #tpu.dot_dimension_numbers<[1], [0], [0], [1], [0, 0, 1, 1], [], []>} : vector<16x32xbf16>, vector<32x128xbf16>, vector<16x128xf32> -> vector<16x128xf32>
    %c0_4 = arith.constant 0 : index
    %c0_5 = arith.constant 0 : index
    %6 = vector.load %arg6[%c0_4, %c0_5] : memref<1x128xf32, #tpu.memory_space<vmem>>, vector<1x128xf32>
    %7 = vector.broadcast %6 : vector<1x128xf32> to vector<16x128xf32>
    %8 = arith.addf %5, %7 : vector<16x128xf32>
    %cst_6 = arith.constant 1.702000e+00 : f32
    %9 = vector.broadcast %cst_6 : f32 to vector<16x128xf32>
    %10 = arith.mulf %9, %8 : vector<16x128xf32>
    %11 = arith.negf %10 : vector<16x128xf32>
    %12 = math.exp %11 : vector<16x128xf32>
    %cst_7 = arith.constant 1.000000e+00 : f32
    %13 = vector.broadcast %cst_7 : f32 to vector<16x128xf32>
    %14 = arith.addf %13, %12 : vector<16x128xf32>
    %15 = arith.divf %13, %14 : vector<16x128xf32>
    %16 = arith.mulf %8, %15 : vector<16x128xf32>
    %17 = arith.truncf %16 : vector<16x128xf32> to vector<16x128xbf16>
    %c0_8 = arith.constant 0 : index
    %c0_9 = arith.constant 0 : index
    %18 = vector.load %arg7[%c0_8, %c0_9] : memref<16x128xbf16, #tpu.memory_space<vmem>>, vector<16x128xbf16>
    tpu.vector_store %arg7[%c0_8, %c0_9], %17 {strides = array<i32>} : memref<16x128xbf16, #tpu.memory_space<vmem>>, vector<16x128xbf16>,
    return
  }
  func.func @transform_0(%arg0: i32, %arg1: i32) -> (i32, i32) {
    %c0_i32 = arith.constant 0 : i32
    %c0_i32_0 = arith.constant 0 : i32
    return %arg0, %c0_i32 : i32, i32
  }
  func.func @transform_1(%arg0: i32, %arg1: i32) -> (i32, i32) {
    %c0_i32 = arith.constant 0 : i32
    %c0_i32_0 = arith.constant 0 : i32
    %c0_i32_1 = arith.constant 0 : i32
    return %c0_i32, %c0_i32_0 : i32, i32
  }
  func.func @transform_2(%arg0: i32, %arg1: i32) -> (i32, i32) {
    %c0_i32 = arith.constant 0 : i32
    %c0_i32_0 = arith.constant 0 : i32
    %c0_i32_1 = arith.constant 0 : i32
    return %c0_i32, %c0_i32_0 : i32, i32
  }
  func.func @transform_3(%arg0: i32, %arg1: i32) -> (i32, i32) {
    %c0_i32 = arith.constant 0 : i32
    %c0_i32_0 = arith.constant 0 : i32
    return %c0_i32, %arg1 : i32, i32
  }
  func.func @transform_4(%arg0: i32, %arg1: i32) -> (i32, i32) {
    %c0_i32 = arith.constant 0 : i32
    %c0_i32_0 = arith.constant 0 : i32
    return %c0_i32, %arg1 : i32, i32
  }
  func.func @transform_5(%arg0: i32, %arg1: i32) -> (i32, i32) {
    %c0_i32 = arith.constant 0 : i32
    return %arg0, %arg1 : i32, i32
  }
}

module attributes {stable_mosaic.version = 11 : i64} {
  func.func @_mm_kernel(%arg0: i32, %arg1: i32, %arg2: i32, %arg3: memref<16x128xbf16, #tpu.memory_space<vmem>>, %arg4: memref<128x32xbf16, #tpu.memory_space<vmem>>, %arg5: memref<1x32xf32, #tpu.memory_space<vmem>>, %arg6: memref<16x32xbf16, #tpu.memory_space<vmem>>, %arg7: memref<16x32xbf16, #tpu.memory_space<vmem>>, %arg8: memref<16x32xf32, #tpu.memory_space<vmem>>) attributes {dimension_semantics = [#tpu.dimension_semantics<parallel>, #tpu.dimension_semantics<parallel>, #tpu.dimension_semantics<arbitrary>], iteration_bounds = array<i64: 1, 1, 1>, scalar_prefetch = 0 : i64, scratch_operands = 1 : i64, tpu.core_type = #tpu.core_type<tc>, window_params = [{transform_indices = @transform_0, window_bounds = array<i64: 16, 128>}, {transform_indices = @transform_1, window_bounds = array<i64: 128, 32>}, {transform_indices = @transform_2, window_bounds = array<i64: 1, 32>}, {transform_indices = @transform_3, window_bounds = array<i64: 16, 32>}, {transform_indices = @transform_4, window_bounds = array<i64: 16, 32>}]} {
    %c0_i32 = arith.constant 0 : i32
    %0 = arith.cmpi eq, %arg2, %c0_i32 : i32
    %1 = arith.extui %0 : i1 to i32
    %c0_i32_0 = arith.constant 0 : i32
    %2 = arith.cmpi ne, %1, %c0_i32_0 : i32
    scf.if %2 {
      %cst_10 = arith.constant 0.000000e+00 : f32
      %12 = vector.broadcast %cst_10 : f32 to vector<16x32xf32>
      %c0_11 = arith.constant 0 : index
      %c0_12 = arith.constant 0 : index
      %13 = vector.load %arg8[%c0_11, %c0_12] : memref<16x32xf32, #tpu.memory_space<vmem>>, vector<16x32xf32>
      tpu.vector_store %arg8[%c0_11, %c0_12], %12 {strides = array<i32>} : memref<16x32xf32, #tpu.memory_space<vmem>>, vector<16x32xf32>,
    } else {
    }
    %c0 = arith.constant 0 : index
    %c0_1 = arith.constant 0 : index
    %3 = vector.load %arg8[%c0, %c0_1] : memref<16x32xf32, #tpu.memory_space<vmem>>, vector<16x32xf32>
    %c0_2 = arith.constant 0 : index
    %c0_3 = arith.constant 0 : index
    %4 = vector.load %arg3[%c0_2, %c0_3] : memref<16x128xbf16, #tpu.memory_space<vmem>>, vector<16x128xbf16>
    %c0_4 = arith.constant 0 : index
    %c0_5 = arith.constant 0 : index
    %5 = vector.load %arg4[%c0_4, %c0_5] : memref<128x32xbf16, #tpu.memory_space<vmem>>, vector<128x32xbf16>
    %cst = arith.constant dense<0.000000e+00> : vector<16x32xf32>
    %6 = tpu.matmul %4, %5, %cst {dimension_numbers = #tpu.dot_dimension_numbers<[1], [0], [0], [1], [0, 0, 1, 1], [], []>} : vector<16x128xbf16>, vector<128x32xbf16>, vector<16x32xf32> -> vector<16x32xf32>
    %7 = arith.addf %3, %6 : vector<16x32xf32>
    %c0_6 = arith.constant 0 : index
    %c0_7 = arith.constant 0 : index
    %8 = vector.load %arg8[%c0_6, %c0_7] : memref<16x32xf32, #tpu.memory_space<vmem>>, vector<16x32xf32>
    tpu.vector_store %arg8[%c0_6, %c0_7], %7 {strides = array<i32>} : memref<16x32xf32, #tpu.memory_space<vmem>>, vector<16x32xf32>,
    %c0_i32_8 = arith.constant 0 : i32
    %9 = arith.cmpi eq, %arg2, %c0_i32_8 : i32
    %10 = arith.extui %9 : i1 to i32
    %c0_i32_9 = arith.constant 0 : i32
    %11 = arith.cmpi ne, %10, %c0_i32_9 : i32
    scf.if %11 {
      %c0_10 = arith.constant 0 : index
      %c0_11 = arith.constant 0 : index
      %12 = vector.load %arg8[%c0_10, %c0_11] : memref<16x32xf32, #tpu.memory_space<vmem>>, vector<16x32xf32>
      %c0_12 = arith.constant 0 : index
      %c0_13 = arith.constant 0 : index
      %13 = vector.load %arg5[%c0_12, %c0_13] : memref<1x32xf32, #tpu.memory_space<vmem>>, vector<1x32xf32>
      %14 = vector.broadcast %13 : vector<1x32xf32> to vector<16x32xf32>
      %15 = arith.addf %12, %14 : vector<16x32xf32>
      %c0_14 = arith.constant 0 : index
      %c0_15 = arith.constant 0 : index
      %16 = vector.load %arg6[%c0_14, %c0_15] : memref<16x32xbf16, #tpu.memory_space<vmem>>, vector<16x32xbf16>
      %17 = arith.extf %16 : vector<16x32xbf16> to vector<16x32xf32>
      %18 = arith.addf %15, %17 : vector<16x32xf32>
      %19 = arith.truncf %18 : vector<16x32xf32> to vector<16x32xbf16>
      %c0_16 = arith.constant 0 : index
      %c0_17 = arith.constant 0 : index
      %20 = vector.load %arg7[%c0_16, %c0_17] : memref<16x32xbf16, #tpu.memory_space<vmem>>, vector<16x32xbf16>
      tpu.vector_store %arg7[%c0_16, %c0_17], %19 {strides = array<i32>} : memref<16x32xbf16, #tpu.memory_space<vmem>>, vector<16x32xbf16>,
    } else {
    }
    return
  }
  func.func @transform_0(%arg0: i32, %arg1: i32, %arg2: i32) -> (i32, i32) {
    %c0_i32 = arith.constant 0 : i32
    return %arg0, %arg2 : i32, i32
  }
  func.func @transform_1(%arg0: i32, %arg1: i32, %arg2: i32) -> (i32, i32) {
    %c0_i32 = arith.constant 0 : i32
    return %arg2, %arg1 : i32, i32
  }
  func.func @transform_2(%arg0: i32, %arg1: i32, %arg2: i32) -> (i32, i32) {
    %c0_i32 = arith.constant 0 : i32
    %c0_i32_0 = arith.constant 0 : i32
    return %c0_i32, %arg1 : i32, i32
  }
  func.func @transform_3(%arg0: i32, %arg1: i32, %arg2: i32) -> (i32, i32) {
    %c0_i32 = arith.constant 0 : i32
    return %arg0, %arg1 : i32, i32
  }
  func.func @transform_4(%arg0: i32, %arg1: i32, %arg2: i32) -> (i32, i32) {
    %c0_i32 = arith.constant 0 : i32
    return %arg0, %arg1 : i32, i32
  }
}

</mosaic_0001>

<bundles_post_ra>
// kernel: clip_wrapper_forward.25
= control target key start
LH: loop header
LB: loop body
LE: loop exit
PB: predicated region body
PF: predicated region fallthrough
CT: control target
= control target key end

     0   :  { %vm18_vm0 = vcmask 261120   ;;  %vm22_vm1 = vcmask 254976   ;;  %vm73_vm2 = vcmask 257024   ;;  %vm75_vm3 = vcmask 253952   ;;  %s131_s0 = inlined_call_operand.vmem [shape: bf16[10,32], index: 0, kind: input, shape index: {}]   ;;  %s132_s1 = inlined_call_operand.vmem [shape: f32[1,32], index: 1, kind: input, shape index: {}]   ;;  %s133_s2 = inlined_call_operand.vmem [shape: f32[1,32], index: 2, kind: input, shape index: {}]   ;;  %s134_s3 = inlined_call_operand.vmem [shape: bf16[10,32], index: 3, kind: output, shape index: {}]  }
   0x1   :  { %v14_v0 = vld [vmem:[%s131_s0] sm:$0xf]  ;;  %v15_v1 = vld [vmem:[%s131_s0 + $0x4] sm:$0x1] }
   0x2   :  { %v16_v2 = vunpack.c.l.bf16 %v14_v0  ;;  %v17_v3 = vunpack.c.l.bf16 %v15_v1  ;;  %v81_v23 = vld [vmem:[%s132_s1] ss:$0 sm:$0xff] }
   0x3   :  { %v82_v25 = vld [vmem:[%s133_s2] ss:$0 sm:$0xff] }
   0x4   :  { %v19_v4 = vsel %vm18_vm0, %v16_v2, 0.0  ;;  %v23_v5 = vsel %vm22_vm1, %v17_v3, 0.0 }
   0x5   :  { %20 = vadd.xlane.f32.xlu0 %v19_v4 }
   0x9   :  { %24 = vadd.xlane.f32.xlu0 %v23_v5 }
  0x92   :  { %v21_v6 = vpop.xlane.xlu0 %20 }
  0x93   :  { %v27_v7 = vmul.f32 0.03125, %v21_v6 }
  0x95   :  { %v29_v8 = vsub.f32 %v16_v2, %v27_v7 }
  0x96   :  { %v25_v9 = vpop.xlane.xlu0 %24 }
  0x97   :  { %v28_v10 = vmul.f32 0.03125, %v25_v9  ;;  %v31_v11 = vmul.f32 %v29_v8, %v29_v8 }
  0x99   :  { %v30_v12 = vsub.f32 %v17_v3, %v28_v10  ;;  %v33_v13 = vsel %vm18_vm0, %v31_v11, 0.0 }
  0x9a   :  { %34 = vadd.xlane.f32.xlu1 %v33_v13 }
  0x9b   :  { %v32_v14 = vmul.f32 %v30_v12, %v30_v12 }
  0x9d   :  { %v36_v15 = vsel %vm22_vm1, %v32_v14, 0.0 }
  0x9e   :  { %37 = vadd.xlane.f32.xlu1 %v36_v15 }
 0x127   :  { %v35_v16 = vpop.xlane.xlu1 %34 }
 0x128   :  { %v39_v17 = vmul.f32 0.03125, %v35_v16 }
 0x12a   :  { %v41_v18 = vadd.f32 1e-05, %v39_v17 }
 0x12b   :  { %v38_v19 = vpop.xlane.xlu1 %37 }
 0x12c   :  { %87 = vrsqrt.f32 %v41_v18  ;;  %v40_v20 = vmul.f32 0.03125, %v38_v19 }
 0x12e   :  { %v42_v21 = vadd.f32 1e-05, %v40_v20 }
 0x130   :  { %89 = vrsqrt.f32 %v42_v21 }
 0x136   :  { %v88_v22 = vpop.eup %87 }
 0x137   :  { %v45_v24 = vmul.f32 %v88_v22, %v29_v8 }
 0x139   :  { %v54_v26 = vmul.f32 %v81_v23, %v45_v24 }
 0x13a   :  { %v90_v27 = vpop.eup %89 }
 0x13b   :  { %v63_v28 = vadd.f32 %v82_v25, %v54_v26  ;;  %v46_v29 = vmul.f32 %v90_v27, %v30_v12 }
 0x13d   :  { %v85_v30 = vpack.c.bf16 %v63_v28, %v63_v28  ;;  %v55_v31 = vmul.f32 %v81_v23, %v46_v29 }
 0x13f   :  { %74 = vst.msk [vmem:[%s134_s3] sm:$0xf] %vm73_vm2, %v85_v30  ;;  %v64_v32 = vadd.f32 %v82_v25, %v55_v31 }
 0x141   :  { %v86_v33 = vpack.c.bf16 %v64_v32, %v64_v32 }
 0x143   :  { %76 = vst.msk [vmem:[%s134_s3 + $0x4] sm:$0x1] %vm75_vm3, %v86_v33 }

// kernel: clip_wrapper_forward.26
= control target key start
LH: loop header
LB: loop body
LE: loop exit
PB: predicated region body
PF: predicated region fallthrough
CT: control target
= control target key end

     0   :  { %vm29_vm0 = vcmask 261120   ;;  %vm33_vm1 = vcmask 254976   ;;  %v214_v17 = vmov 0.0   ;;  %vm215_vm2 = vmmov 0   ;;  %s276_s0 = inlined_call_operand.vmem [shape: bf16[10,32], index: 0, kind: input, shape index: {}]   ;;  %s277_s3 = inlined_call_operand.vmem [shape: bf16[32,96], index: 3, kind: input, shape index: {}]   ;;  %s278_s1 = inlined_call_operand.vmem [shape: f32[1,32], index: 1, kind: input, shape index: {}]   ;;  %s279_s2 = inlined_call_operand.vmem [shape: f32[1,32], index: 2, kind: input, shape index: {}]   ;;  %s280_s4 = inlined_call_operand.vmem [shape: f32[1,96], index: 4, kind: input, shape index: {}]   ;;  %s281_s5 = inlined_call_operand.vmem [shape: bf16[10,96], index: 5, kind: output, shape index: {}]  }
   0x1   :  { %v25_v0 = vld [vmem:[%s276_s0] sm:$0xf]  ;;  %v26_v1 = vld [vmem:[%s276_s0 + $0x4] sm:$0x1]  ;;  %197 = vmatprep.subr.bf16.mxu0 %v214_v17  ;;  %v208_v18 = vld [vmem:[%s277_s3 + $0x8] sm:$0xff]   ;;  %201 = vmatprep.mubr.msk.bf16.mxu0 %vm215_vm2, %v214_v17  ;;  %vm84_vm3 = vcmask 257024  }
   0x2   :  { %v27_v2 = vunpack.c.l.bf16 %v25_v0  ;;  %v28_v3 = vunpack.c.l.bf16 %v26_v1  ;;  %v207_v16 = vld [vmem:[%s277_s3] sm:$0xff]   ;;  %vm86_vm4 = vcmask 253952   ;;  %vm171_vm5 = vcmask 781312  }
   0x3   :  { %198 = vmatpush3.bf16.msra.mxu0 %v207_v16  ;;  %v179_v26 = vld [vmem:[%s278_s1] ss:$0 sm:$0xff]  ;;  %vm173_vm6 = vcmask 778240  }
   0x4   :  { %v30_v4 = vsel %vm29_vm0, %v27_v2, 0.0  ;;  %v34_v5 = vsel %vm33_vm1, %v28_v3, 0.0  ;;  %199 = vmatprep.subr.bf16.mxu0 %v214_v17  ;;  %v180_v28 = vld [vmem:[%s279_s2] ss:$0 sm:$0xff] }
   0x5   :  { %31 = vadd.xlane.f32.xlu0 %v30_v4  ;;  %v183_v38 = vld [vmem:[%s280_s4] ss:$0 sm:$0xff] }
   0x7   :  { %200 = vmatpush3.bf16.msra.mxu0 %v208_v18 }
   0x9   :  { %35 = vadd.xlane.f32.xlu0 %v34_v5 }
  0x92   :  { %v32_v6 = vpop.xlane.xlu0 %31 }
  0x93   :  { %v38_v7 = vmul.f32 0.03125, %v32_v6 }
  0x95   :  { %v40_v8 = vsub.f32 %v27_v2, %v38_v7 }
  0x96   :  { %v36_v9 = vpop.xlane.xlu0 %35 }
  0x97   :  { %v39_v10 = vmul.f32 0.03125, %v36_v9  ;;  %v42_v11 = vmul.f32 %v40_v8, %v40_v8 }
  0x99   :  { %v41_v12 = vsub.f32 %v28_v3, %v39_v10  ;;  %v44_v13 = vsel %vm29_vm0, %v42_v11, 0.0 }
  0x9a   :  { %45 = vadd.xlane.f32.xlu1 %v44_v13 }
  0x9b   :  { %v43_v14 = vmul.f32 %v41_v12, %v41_v12 }
  0x9d   :  { %v47_v15 = vsel %vm33_vm1, %v43_v14, 0.0 }
  0x9e   :  { %48 = vadd.xlane.f32.xlu1 %v47_v15 }
 0x127   :  { %v46_v19 = vpop.xlane.xlu1 %45 }
 0x128   :  { %v50_v20 = vmul.f32 0.03125, %v46_v19 }
 0x12a   :  { %v52_v21 = vadd.f32 1e-05, %v50_v20 }
 0x12b   :  { %v49_v22 = vpop.xlane.xlu1 %48 }
 0x12c   :  { %210 = vrsqrt.f32 %v52_v21  ;;  %v51_v23 = vmul.f32 0.03125, %v49_v22 }
 0x12e   :  { %v53_v24 = vadd.f32 1e-05, %v51_v23 }
 0x130   :  { %212 = vrsqrt.f32 %v53_v24 }
 0x136   :  { %v211_v25 = vpop.eup %210 }
 0x137   :  { %v56_v27 = vmul.f32 %v211_v25, %v40_v8 }
 0x139   :  { %v65_v29 = vmul.f32 %v179_v26, %v56_v27 }
 0x13a   :  { %v213_v30 = vpop.eup %212 }
 0x13b   :  { %v74_v31 = vadd.f32 %v180_v28, %v65_v29  ;;  %v57_v32 = vmul.f32 %v213_v30, %v41_v12 }
 0x13d   :  { %v190_v33 = vpack.c.bf16 %v74_v31, %v74_v31  ;;  %v66_v34 = vmul.f32 %v179_v26, %v57_v32 }
 0x13f   :  { %85 = vst.msk [vmem:[#allocation2] sm:$0xf] %vm84_vm3, %v190_v33  ;;  %v75_v35 = vadd.f32 %v180_v28, %v66_v34 }
 0x141   :  { %v191_v36 = vpack.c.bf16 %v75_v35, %v75_v35 }
 0x143   :  { %87 = vst.msk [vmem:[#allocation2 + $0x4] sm:$0x1] %vm86_vm4, %v191_v36 }
 0x14a   :  { %v209_v37 = vld [vmem:[#allocation2] sm:$0x1f]  }
 0x14b   :  { %202 = vmatmul.mubr.msk.bf16.vlgmr.msra.gmra.mrb[0].mxu0 %vm29_vm0, %v209_v37 }
 0x21e   :  { %v156_v39 = vpop.f32.mrb[0].mxu0 }
 0x21f   :  { %v157_v40 = vadd.f32 %v183_v38, %v156_v39  ;;  %v203_v41 = vpop.f32.mrb[1].mxu0 }
 0x220   :  { %v159_v42 = vpop.f32.mrb[2].mxu0 }
 0x221   :  { %v192_v43 = vpack.c.bf16 %v157_v40, %v157_v40  ;;  %v160_v44 = vadd.f32 %v183_v38, %v159_v42  ;;  %v204_v45 = vpop.f32.mrb[3].mxu0 }
 0x223   :  { %172 = vst.msk [vmem:[%s281_s5] sm:$0xf] %vm171_vm5, %v192_v43  ;;  %v193_v46 = vpack.c.bf16 %v160_v44, %v160_v44 }
 0x225   :  { %174 = vst.msk [vmem:[%s281_s5 + $0x4] sm:$0x1] %vm173_vm6, %v193_v46 }

// kernel: clip_wrapper_forward.24
= control target key start
LH: loop header
LB: loop body
LE: loop exit
PB: predicated region body
PF: predicated region fallthrough
CT: control target
= control target key end

     0   :  { %vm16_vm0 = vcmask 261120   ;;  %v211_v0 = vmov 0   ;;  %v212_v2 = vmov 0.0   ;;  %vm122_vm1 = vcmask 523264   ;;  %s272_s1 = inlined_call_operand.vmem [shape: bf16[192,32], index: 1, kind: input, shape index: {}]   ;;  %s273_s0 = inlined_call_operand.vmem [shape: bf16[8,192], index: 0, kind: input, shape index: {}]   ;;  %s274_s2 = inlined_call_operand.vmem [shape: bf16[8,32], index: 2, kind: output, shape index: {}]  }
   0x1   :  { %126 = vmatprep.subr.bf16.mxu0 %v211_v0  ;;  %v197_v1 = vld [vmem:[%s272_s1] sm:$0xff]   ;;  %17 = vst.msk [vmem:[#allocation2] sm:$0xff] %vm16_vm0, %v212_v2  ;;  %v198_v3 = vld [vmem:[%s272_s1 + $0x8] sm:$0xff]   ;;  %v199_v4 = vld [vmem:[%s272_s1 + $0x10] sm:$0xff]   ;;  %vm174_vm2 = vcmask 257024  }
   0x2   :  { %127 = vmatpush1.bf16.msra.mxu0 %v197_v1  ;;  %v200_v5 = vld [vmem:[%s272_s1 + $0x18] sm:$0xff]   ;;  %v19_v6 = vld [vmem:[%s273_s0] sm:$0xff]  ;;  %v202_v9 = vld [vmem:[%s272_s1 + $0x28] sm:$0xff]  }
   0x3   :  { %128 = vmatprep.subr.bf16.mxu0 %v211_v0  ;;  %v181_v7 = vcombine.high %v19_v6, %v19_v6  ;;  %v201_v8 = vld [vmem:[%s272_s1 + $0x20] sm:$0xff]   ;;  %v203_v10 = vld [vmem:[%s272_s1 + $0x30] sm:$0xff]   ;;  %v204_v11 = vld [vmem:[%s272_s1 + $0x38] sm:$0xff]   ;;  %v180_v16 = vcombine.low %v19_v6, %v19_v6 }
   0x4   :  { %v205_v12 = vld [vmem:[%s272_s1 + $0x40] sm:$0xff]   ;;  %v206_v13 = vld [vmem:[%s272_s1 + $0x48] sm:$0xff]   ;;  %v207_v14 = vld [vmem:[%s272_s1 + $0x50] sm:$0xff]  }
   0x5   :  { %194 = vmatprep.mubr.msk.bf16.mxu0 %vm122_vm1, %v181_v7  ;;  %v208_v15 = vld [vmem:[%s272_s1 + $0x58] sm:$0xff]  }
   0x6   :  { %129 = vmatpush1.bf16.msra.mxu0 %v198_v3 }
   0x7   :  { %130 = vmatprep.subr.bf16.mxu0 %v211_v0 }
   0x8   :  { %v18_v17 = vld [vmem:[#allocation2] sm:$0xff] }
   0xa   :  { %131 = vmatpush1.bf16.msra.mxu0 %v199_v4 }
   0xb   :  { %132 = vmatprep.subr.bf16.mxu0 %v211_v0 }
   0xe   :  { %133 = vmatpush1.bf16.msra.mxu0 %v200_v5 }
   0xf   :  { %134 = vmatprep.subr.bf16.mxu0 %v211_v0 }
  0x12   :  { %135 = vmatpush1.bf16.msra.mxu0 %v201_v8 }
  0x13   :  { %136 = vmatprep.subr.bf16.mxu0 %v211_v0 }
  0x16   :  { %137 = vmatpush1.bf16.msra.mxu0 %v202_v9 }
  0x17   :  { %138 = vmatprep.subr.bf16.mxu0 %v211_v0 }
  0x1a   :  { %139 = vmatpush1.bf16.msra.mxu0 %v203_v10 }
  0x1b   :  { %140 = vmatprep.subr.bf16.mxu0 %v211_v0 }
  0x1e   :  { %141 = vmatpush1.bf16.msra.mxu0 %v204_v11 }
  0x1f   :  { %142 = vmatprep.subr.bf16.mxu0 %v211_v0 }
  0x22   :  { %143 = vmatpush1.bf16.msra.mxu0 %v205_v12 }
  0x23   :  { %144 = vmatprep.subr.bf16.mxu0 %v211_v0 }
  0x26   :  { %145 = vmatpush1.bf16.msra.mxu0 %v206_v13 }
  0x27   :  { %146 = vmatprep.subr.bf16.mxu0 %v211_v0 }
  0x2a   :  { %147 = vmatpush1.bf16.msra.mxu0 %v207_v14 }
  0x2b   :  { %148 = vmatprep.subr.bf16.mxu0 %v211_v0 }
  0x2e   :  { %149 = vmatpush1.bf16.msra.mxu0 %v208_v15 }
  0x31   :  { %159 = vmatmul.mubr.bf16.vlgmr.msra.gmra.mrb[0].mxu0 %v180_v16 }
 0x104   :  { %v160_v18 = vpop.f32.mrb[0].mxu0 }
 0x105   :  { %v166_v19 = vadd.f32 %v160_v18, %v18_v17  ;;  %v162_v20 = vpop.f32.mrb[1].mxu0 }
 0x106   :  { %v163_v21 = vpop.f32.mrb[2].mxu0 }
 0x107   :  { %168 = vst.msk [vmem:[#allocation2] sm:$0xff] %vm16_vm0, %v166_v19  ;;  %v164_v22 = vpop.f32.mrb[3].mxu0 }
 0x10e   :  { %v172_v23 = vld [vmem:[#allocation2] sm:$0xff] }
 0x10f   :  { %v173_v24 = vpack.c.bf16 %v172_v23, %v172_v23 }
 0x111   :  { %175 = vst.msk [vmem:[%s274_s2] sm:$0xf] %vm174_vm2, %v173_v24 }

// kernel: clip_wrapper_forward.27
= control target key start
LH: loop header
LB: loop body
LE: loop exit
PB: predicated region body
PF: predicated region fallthrough
CT: control target
= control target key end

     0   :  { %s827_s6 = smov 0   ;;  %s936_s0 = inlined_call_operand.vmem [shape: bf16[2,5,96], index: 0, kind: input, shape index: {}]   ;;  %s937_s1 = inlined_call_operand.vmem [shape: bf16[2,5,32], index: 1, kind: output, shape index: {}]  }
   0x1 LB: > { %s662_s7 = sadd.s32 4294967295, %s798_s6   ;;  %p666_p0 = scmp.ge.s32.totalorder %s798_s6, 1  ;;  %s798_s6 = sphi %s827_s6, %s11_s6  }
   0x2   : > { %p86_p1 = scmp.lt.s32.totalorder %s798_s6, 3 }
   0x4   : > { %p87_p2 = pnand %p666_p0, %p86_p1 }
   0x5   : > { %p104_p3 = scmp.lt.s32.totalorder (!%p87_p2), %s662_s7, 1  ;;  %v800_v0 = vmov (!%p87_p2), 0.0   ;;  %vm801_vm0 = vmmov (!%p87_p2), 0   ;;  %s802_s12 = smov (!%p87_p2), 96   ;;  %vm119_vm1 = vcmask (!%p87_p2), 64512   ;;  %vm167_vm2 = vcmask (!%p87_p2), 36864  }
   0x6   : > { %90 = sbr.rel (%p87_p2) target bundleno = 1249 (0x4e1), region = 24  ;;  %702 = vmatprep.subr.bf16.mxu0 (!%p87_p2), %v800_v0  ;;  %704 = vmatprep.mubr.msk.bf16.mxu0 (!%p87_p2), %vm801_vm0, %v800_v0  ;;  %s803_s13 = smov (!%p87_p2), 64   ;;  %vm184_vm3 = vcmask (!%p87_p2), 1041408   ;;  %vm185_vm4 = vcmask (!%p87_p2), 1042432   ;;  %v810_v12 = vmov (!%p87_p2), 65535   ;;  %vm180_vm5 = vcmask (!%p87_p2), 39936  }
   0x7   : > { %708 = vmatprep.subr.bf16.mxu1 (!%p87_p2), %v800_v0  ;;  %710 = vmatprep.mubr.msk.bf16.mxu1 (!%p87_p2), %vm801_vm0, %v800_v0  ;;  %s804_s14 = smov (!%p87_p2), 88   ;;  %s805_s15 = smov (!%p87_p2), 120   ;;  %v186_v13 = vsel (!%p87_p2), %vm184_vm3, 4294967295, %v810_v12  ;;  %vm234_vm6 = vcmask (!%p87_p2), 59392   ;;  %vm235_vm7 = vsmask.f32 (!%p87_p2), 2304 }
   0x8   : > { %s806_s16 = smov (!%p87_p2), 80   ;;  %s807_s17 = smov (!%p87_p2), 112   ;;  %v865_v14 = vsel (!%p87_p2), %vm185_vm4, %v186_v13, 0  ;;  %vm236_vm8 = vmand (!%p87_p2), %vm234_vm6, %vm235_vm7  ;;  %vm358_vm9 = vcmask (!%p87_p2), 124992   ;;  %vm481_vm11 = vcmask (!%p87_p2), 190592   ;;  %vm604_vm13 = vcmask (!%p87_p2), 256192  }
   0x9   : > { %s808_s18 = smov (!%p87_p2), 72   ;;  %s809_s19 = smov (!%p87_p2), 104   ;;  %vm359_vm10 = vmand (!%p87_p2), %vm358_vm9, %vm235_vm7 }
   0xa   : > { %s811_s20 = smov (!%p87_p2), 56   ;;  %s812_s21 = smov (!%p87_p2), 48   ;;  %vm482_vm12 = vmand (!%p87_p2), %vm481_vm11, %vm235_vm7 }
   0xb   : > { %s813_s22 = smov (!%p87_p2), 40   ;;  %s814_s26 = smov (!%p87_p2), 8   ;;  %vm605_vm14 = vmand (!%p87_p2), %vm604_vm13, %vm235_vm7 }
   0xc   : > { %s815_s27 = smov (!%p87_p2), 16   ;;  %s816_s28 = smov (!%p87_p2), 24  }
   0xd   : > { %s939_s7 = smov (!%p104_p3, %s662_s7), 1 }
   0xe   : > { %s667_s8 = sshll.u32 %s939_s7, 2 }
   0xf   : > { %s107_s11 = scalar_lea.vmem %s936_s0, %s667_s8  ;;  %s918_s25 = scalar_lea.vmem %s937_s1, %s667_s8 }
  0x10   : > { %v113_v1 = vld [vmem:[%s107_s11] sm:$0x7] }
  0x11   : > { %v849_v2 = vcombine.low %v113_v1, %v113_v1 }
  0x13   : > { %117 = vrot.lane.b32.xlu0 %v849_v2, %s802_s12  ;;  %178 = vrot.lane.b32.xlu1 %v849_v2, %s803_s13 }
  0x17   : > { %242 = vrot.lane.b32.xlu1 %v849_v2, %s804_s14 }
  0x1b   : > { %240 = vrot.lane.b32.xlu1 %v849_v2, %s805_s15 }
  0x1f   : > { %365 = vrot.lane.b32.xlu1 %v849_v2, %s806_s16 }
  0x23   : > { %363 = vrot.lane.b32.xlu1 %v849_v2, %s807_s17 }
  0x27   : > { %488 = vrot.lane.b32.xlu1 %v849_v2, %s808_s18 }
  0x2b   : > { %486 = vrot.lane.b32.xlu1 %v849_v2, %s809_s19 }
  0x85   : > { %v118_v3 = vpop.permute.xlu0 %117  ;;  %v179_v11 = vpop.permute.xlu1 %178 }
  0x86   : > { %v124_v4 = vsel %vm119_vm1, %v118_v3, 0  ;;  %v189_v15 = vand.u32 %v865_v14, %v179_v11 }
  0x87   : > { %703 = vmatpush3.bf16.xpose.msra.mxu0 %v124_v4 }
  0x88   : > { %720 = vmatprep.subr.bf16.mxu0 %v800_v0  ;;  %709 = vmatpush3.bf16.msra.mxu1 %v189_v15 }
  0x89   : > { %714 = vmatprep.subr.bf16.mxu1 %v800_v0  ;;  %v243_v19 = vpop.permute.xlu1 %242 }
  0x8a   : > { %v248_v22 = vsel %vm119_vm1, %v243_v19, 0 }
  0x8d   : > { %v241_v20 = vpop.permute.xlu1 %240 }
  0x8e   : > { %705 = vmatmul.mubr.msk.bf16.vlgmr.msra.gmra.mrb[0].mxu0 %vm119_vm1, %v113_v1 }
  0x8f   : > { %722 = vmatprep.mubr.msk.bf16.mxu0 %vm801_vm0, %v800_v0 }
  0x91   : > { %v366_v24 = vpop.permute.xlu1 %365 }
  0x92   : > { %v371_v26 = vsel %vm119_vm1, %v366_v24, 0 }
  0x95   : > { %v364_v25 = vpop.permute.xlu1 %363 }
  0x99   : > { %v489_v27 = vpop.permute.xlu1 %488 }
  0x9a   : > { %v494_v28 = vsel %vm119_vm1, %v489_v27, 0 }
  0x9d   : > { %v487_v29 = vpop.permute.xlu1 %486 }
 0x161   : > { %v160_v5 = vpop.f32.mrb[0].mxu0 }
 0x162   : > { %v166_v6 = vmul.f32 0.35355338, %v160_v5  ;;  %v706_v7 = vpop.f32.mrb[1].mxu0 }
 0x163   : > { %v163_v8 = vpop.f32.mrb[2].mxu0 }
 0x164   : > { %v707_v9 = vpop.f32.mrb[3].mxu0  ;;  %v168_v10 = vsel %vm167_vm2, %v166_v6, -inf }
 0x165   : > { %169 = vmax.xlane.f32.xlu0 %v168_v10 }
 0x17b   : > { %301 = vrot.lane.b32.xlu0 %v849_v2, %s811_s20 }
 0x1f2   : > { %v170_v16 = vpop.xlane.xlu0 %169 }
 0x1f3   : > { %v171_v17 = vsub.f32 %v166_v6, %v170_v16 }
 0x1f5   : > { %v172_v18 = vmul.f32 1.442695, %v171_v17 }
 0x1f6   : > { %v302_v30 = vpop.permute.xlu0 %301 }
 0x1f7   : > { %776 = vpow2.f32 %v172_v18  ;;  %v307_v31 = vand.u32 %v302_v30, %v865_v14  ;;  %v237_v18 = vld [vmem:[%s918_s25] sm:$0x7] }
 0x1f9   : > { %721 = vmatpush3.bf16.msra.mxu0 %v307_v31 }
 0x1fa   : > { %732 = vmatprep.subr.bf16.mxu0 %v800_v0 }
 0x201   : > { %v870_v21 = vpop.eup %776 }
 0x202   : > { %v177_v23 = vpack.c.bf16 %v870_v21, %v870_v21  ;;  %v174_v13 = vsel %vm167_vm2, %v870_v21, 0.0 }
 0x204   : > { %711 = vmatmul.mubr.msk.bf16.vlgmr.msra.gmra.mrb[0].mxu1 %vm180_vm5, %v177_v23 }
 0x205   : > { %715 = vmatpush3.bf16.xpose.msra.mxu1 %v248_v22  ;;  %716 = vmatprep.mubr.msk.bf16.mxu1 %vm801_vm0, %v800_v0 }
 0x206   : > { %726 = vmatprep.subr.bf16.mxu1 %v800_v0 }
 0x20c   : > { %717 = vmatmul.mubr.msk.bf16.vlgmr.msra.gmra.mrb[4].mxu1 %vm119_vm1, %v241_v20 }
 0x20d   : > { %727 = vmatpush3.bf16.xpose.msra.mxu1 %v371_v26  ;;  %728 = vmatprep.mubr.msk.bf16.mxu1 %vm801_vm0, %v800_v0 }
 0x20e   : > { %738 = vmatprep.subr.bf16.mxu1 %v800_v0 }
 0x214   : > { %729 = vmatmul.mubr.msk.bf16.vlgmr.msra.gmra.mrb[8].mxu1 %vm119_vm1, %v364_v25 }
 0x215   : > { %739 = vmatpush3.bf16.xpose.msra.mxu1 %v494_v28  ;;  %740 = vmatprep.mubr.msk.bf16.mxu1 %vm801_vm0, %v800_v0 }
 0x21c   : > { %741 = vmatmul.mubr.msk.bf16.vlgmr.msra.gmra.mrb[12].mxu1 %vm119_vm1, %v487_v29 }
 0x2d7   : > { %v891_v32 = vpop.f32.mrb[0].mxu1 }
 0x2d8   : > { %v712_v33 = vpop.f32.mrb[1].mxu1 }
 0x2d9   : > { %v228_v34 = vpop.f32.mrb[2].mxu1 }
 0x2da   : > { %v713_v35 = vpop.f32.mrb[3].mxu1 }
 0x2df   : > { %v284_v36 = vpop.f32.mrb[4].mxu1 }
 0x2e0   : > { %v290_v37 = vmul.f32 0.35355338, %v284_v36  ;;  %v718_v38 = vpop.f32.mrb[5].mxu1 }
 0x2e1   : > { %v287_v39 = vpop.f32.mrb[6].mxu1 }
 0x2e2   : > { %v719_v40 = vpop.f32.mrb[7].mxu1  ;;  %v291_v41 = vsel %vm167_vm2, %v290_v37, -inf }
 0x2e3   : > { %292 = vmax.xlane.f32.xlu1 %v291_v41 }
 0x2e7   : > { %v407_v42 = vpop.f32.mrb[8].mxu1 }
 0x2e8   : > { %v413_v43 = vmul.f32 0.35355338, %v407_v42  ;;  %v730_v44 = vpop.f32.mrb[9].mxu1 }
 0x2e9   : > { %v410_v45 = vpop.f32.mrb[10].mxu1 }
 0x2ea   : > { %v731_v46 = vpop.f32.mrb[11].mxu1  ;;  %v414_v47 = vsel %vm167_vm2, %v413_v43, -inf }
 0x2eb   : > { %415 = vmax.xlane.f32.xlu0 %v414_v47 }
 0x2ef   : > { %v530_v48 = vpop.f32.mrb[12].mxu1 }
 0x2f0   : > { %v536_v49 = vmul.f32 0.35355338, %v530_v48  ;;  %v742_v50 = vpop.f32.mrb[13].mxu1 }
 0x2f1   : > { %v533_v51 = vpop.f32.mrb[14].mxu1 }
 0x2f2   : > { %v743_v52 = vpop.f32.mrb[15].mxu1  ;;  %v537_v53 = vsel %vm167_vm2, %v536_v49, -inf }
 0x2f3   : > { %538 = vmax.xlane.f32.xlu0 %v537_v53 }
 0x2f4   : > { %424 = vrot.lane.b32.xlu1 %v849_v2, %s812_s21 }
 0x309   : > { %547 = vrot.lane.b32.xlu0 %v849_v2, %s813_s22 }
 0x370   : > { %v293_v54 = vpop.xlane.xlu1 %292 }
 0x371   : > { %v294_v55 = vsub.f32 %v290_v37, %v293_v54 }
 0x373   : > { %v295_v56 = vmul.f32 1.442695, %v294_v55 }
 0x374   : > { %v425_v60 = vpop.permute.xlu1 %424 }
 0x375   : > { %778 = vpow2.f32 %v295_v56  ;;  %v430_v62 = vand.u32 %v425_v60, %v865_v14 }
 0x378   : > { %v416_v57 = vpop.xlane.xlu0 %415 }
 0x379   : > { %v417_v58 = vsub.f32 %v413_v43, %v416_v57 }
 0x37b   : > { %v418_v59 = vmul.f32 1.442695, %v417_v58 }
 0x37d   : > { %780 = vpow2.f32 %v418_v59 }
 0x37f   : > { %v779_v61 = vpop.eup %778 }
 0x380   : > { %v539_v63 = vpop.xlane.xlu0 %538  ;;  %v297_v1 = vsel %vm167_vm2, %v779_v61, 0.0  ;;  %v300_v3 = vpack.c.bf16 %v779_v61, %v779_v61 }
 0x381   : > { %v540_v4 = vsub.f32 %v536_v49, %v539_v63  ;;  %298 = vadd.xlane.f32.xlu0 %v297_v1 }
 0x382   : > { %723 = vmatmul.mubr.msk.bf16.vlgmr.msra.gmra.mrb[4].mxu0 %vm180_vm5, %v300_v3 }
 0x383   : > { %v541_v2 = vmul.f32 1.442695, %v540_v4  ;;  %733 = vmatpush3.bf16.msra.mxu0 %v430_v62  ;;  %734 = vmatprep.mubr.msk.bf16.mxu0 %vm801_vm0, %v800_v0 }
 0x384   : > { %v548_v5 = vpop.permute.xlu0 %547  ;;  %744 = vmatprep.subr.bf16.mxu0 %v800_v0 }
 0x385   : > { %782 = vpow2.f32 %v541_v2  ;;  %v553_v7 = vand.u32 %v548_v5, %v865_v14 }
 0x387   : > { %v781_v6 = vpop.eup %780 }
 0x388   : > { %v420_v8 = vsel %vm167_vm2, %v781_v6, 0.0  ;;  %v423_v9 = vpack.c.bf16 %v781_v6, %v781_v6 }
 0x389   : > { %421 = vadd.xlane.f32.xlu1 %v420_v8 }
 0x38a   : > { %735 = vmatmul.mubr.msk.bf16.vlgmr.msra.gmra.mrb[8].mxu0 %vm180_vm5, %v423_v9 }
 0x38b   : > { %745 = vmatpush3.bf16.msra.mxu0 %v553_v7  ;;  %746 = vmatprep.mubr.msk.bf16.mxu0 %vm801_vm0, %v800_v0 }
 0x38f   : > { %v783_v10 = vpop.eup %782 }
 0x390   : > { %v543_v11 = vsel %vm167_vm2, %v783_v10, 0.0  ;;  %v546_v12 = vpack.c.bf16 %v783_v10, %v783_v10 }
 0x391   : > { %544 = vadd.xlane.f32.xlu0 %v543_v11 }
 0x392   : > { %747 = vmatmul.mubr.msk.bf16.vlgmr.msra.gmra.mrb[12].mxu0 %vm180_vm5, %v546_v12 }
 0x395   : > { %175 = vadd.xlane.f32.xlu0 %v174_v13 }
 0x40e   : > { %v299_v14 = vpop.xlane.xlu0 %298 }
 0x416   : > { %v422_v21 = vpop.xlane.xlu1 %421 }
 0x41e   : > { %v545_v15 = vpop.xlane.xlu0 %544 }
 0x422   : > { %v176_v16 = vpop.xlane.xlu0 %175 }
 0x423   : > { %784 = vrcp.f32 %v176_v16 }
 0x424   : > { %786 = vrcp.f32 %v299_v14 }
 0x425   : > { %788 = vrcp.f32 %v422_v21 }
 0x426   : > { %790 = vrcp.f32 %v545_v15 }
 0x42d   : > { %v785_v0 = vpop.eup %784 }
 0x42e   : > { %v232_v17 = vmul.f32 %v785_v0, %v891_v32  ;;  %v787_v22 = vpop.eup %786 }
 0x42f   : > { %v789_v29 = vpop.eup %788 }
 0x430   : > { %v233_v19 = vpack.c.bf16 %v232_v17, %v232_v17  ;;  %v791_v36 = vpop.eup %790 }
 0x432   : > { %v238_v20 = vsel %vm236_vm8, %v233_v19, %v237_v18 }
 0x433   : > { %239 = vst [vmem:[%s918_s25] sm:$0x7] %v238_v20 }
 0x43a   : > { %v360_v43 = vld [vmem:[%s918_s25] sm:$0x7] }
 0x455   : > { %v343_v23 = vpop.f32.mrb[4].mxu0 }
 0x456   : > { %v350_v24 = vmul.f32 %v787_v22, %v343_v23  ;;  %v724_v25 = vpop.f32.mrb[5].mxu0 }
 0x457   : > { %v346_v26 = vpop.f32.mrb[6].mxu0 }
 0x458   : > { %v683_v27 = vpack.c.bf16 %v350_v24, %v350_v24  ;;  %v725_v28 = vpop.f32.mrb[7].mxu0 }
 0x45a   : > { %355 = vrot.lane.b32.xlu0 %v683_v27, %s814_s26 }
 0x45d   : > { %v466_v30 = vpop.f32.mrb[8].mxu0 }
 0x45e   : > { %v473_v31 = vmul.f32 %v789_v29, %v466_v30  ;;  %v736_v32 = vpop.f32.mrb[9].mxu0 }
 0x45f   : > { %v469_v33 = vpop.f32.mrb[10].mxu0 }
 0x460   : > { %v684_v34 = vpack.c.bf16 %v473_v31, %v473_v31  ;;  %v737_v35 = vpop.f32.mrb[11].mxu0 }
 0x462   : > { %478 = vrot.lane.b32.xlu1 %v684_v34, %s815_s27 }
 0x465   : > { %v589_v37 = vpop.f32.mrb[12].mxu0 }
 0x466   : > { %v596_v38 = vmul.f32 %v791_v36, %v589_v37  ;;  %v748_v39 = vpop.f32.mrb[13].mxu0 }
 0x467   : > { %v592_v40 = vpop.f32.mrb[14].mxu0 }
 0x468   : > { %v685_v41 = vpack.c.bf16 %v596_v38, %v596_v38  ;;  %v749_v42 = vpop.f32.mrb[15].mxu0 }
 0x46a   : > { %601 = vrot.lane.b32.xlu0 %v685_v41, %s816_s28 }
 0x4cc   : > { %v356_v44 = vpop.permute.xlu0 %355 }
 0x4cd   : > { %v361_v45 = vsel %vm359_vm10, %v356_v44, %v360_v43 }
 0x4ce   : > { %362 = vst [vmem:[%s918_s25] sm:$0x7] %v361_v45 }
 0x4d4   : > { %v479_v46 = vpop.permute.xlu1 %478 }
 0x4d5   : > { %v483_v47 = vld [vmem:[%s918_s25] sm:$0x7] }
 0x4d6   : > { %v484_v48 = vsel %vm482_vm12, %v479_v46, %v483_v47 }
 0x4d7   : > { %485 = vst [vmem:[%s918_s25] sm:$0x7] %v484_v48 }
 0x4dc   : > { %v602_v50 = vpop.permute.xlu0 %601 }
 0x4de   : > { %v606_v49 = vld [vmem:[%s918_s25] sm:$0x7] }
 0x4df   : > { %v607_v51 = vsel %vm605_vm14, %v602_v50, %v606_v49 }
 0x4e0   : > { %608 = vst [vmem:[%s918_s25] sm:$0x7] %v607_v51 }
 0x4e1 PF: > { %s11_s6 = sadd.s32 1, %s798_s6  }
 0x4e2   : > { %p8_p4 = scmp.ge.s32.totalorder %s11_s6, 4  }
 0x4e4   :  { %10 = sbr.rel (!%p8_p4) target bundleno = 1 (0x1), region = 54 }

// kernel: clip_wrapper_forward.28
= control target key start
LH: loop header
LB: loop body
LE: loop exit
PB: predicated region body
PF: predicated region fallthrough
CT: control target
= control target key end

     0   :  { %vm22_vm0 = vcmask 261120   ;;  %v162_v0 = vmov 0.0   ;;  %vm163_vm1 = vmmov 0   ;;  %vm24_vm2 = vcmask 254976   ;;  %s216_s1 = inlined_call_operand.vmem [shape: bf16[32,32], index: 1, kind: input, shape index: {}]   ;;  %s217_s0 = inlined_call_operand.vmem [shape: bf16[10,32], index: 0, kind: input, shape index: {}]   ;;  %s218_s3 = inlined_call_operand.vmem [shape: bf16[10,32], index: 3, kind: input, shape index: {}]   ;;  %s219_s2 = inlined_call_operand.vmem [shape: f32[1,32], index: 2, kind: input, shape index: {}]   ;;  %s220_s4 = inlined_call_operand.vmem [shape: bf16[10,32], index: 4, kind: output, shape index: {}]  }
   0x1   :  { %149 = vmatprep.subr.bf16.mxu0 %v162_v0  ;;  %v159_v1 = vld [vmem:[%s216_s1] sm:$0xff]   ;;  %153 = vmatprep.mubr.msk.bf16.mxu0 %vm163_vm1, %v162_v0  ;;  %23 = vst.msk [vmem:[#allocation2] sm:$0xff] %vm22_vm0, %v162_v0  ;;  %v160_v2 = vld [vmem:[%s216_s1 + $0x8] sm:$0xff]   ;;  %vm129_vm3 = vcmask 257024   ;;  %vm131_vm4 = vcmask 253952  }
   0x2   :  { %150 = vmatpush3.bf16.msra.mxu0 %v159_v1  ;;  %v161_v3 = vld [vmem:[%s217_s0] sm:$0x1f]   ;;  %25 = vst.msk [vmem:[#allocation2 + $0x8] sm:$0x3] %vm24_vm2, %v162_v0 }
   0x3   :  { %151 = vmatprep.subr.bf16.mxu0 %v162_v0  ;;  %v115_v12 = vld [vmem:[%s218_s3] sm:$0xf]  ;;  %v116_v14 = vld [vmem:[%s218_s3 + $0x4] sm:$0x1] }
   0x4   :  { %v141_v13 = vld [vmem:[%s219_s2] ss:$0 sm:$0xff]  ;;  %v117_v15 = vunpack.c.l.bf16 %v115_v12  ;;  %v118_v18 = vunpack.c.l.bf16 %v116_v14 }
   0x6   :  { %152 = vmatpush3.bf16.msra.mxu0 %v160_v2 }
   0x8   :  { %v26_v4 = vld [vmem:[#allocation2] sm:$0xff] }
   0x9   :  { %154 = vmatmul.mubr.msk.bf16.vlgmr.msra.gmra.mrb[0].mxu0 %vm22_vm0, %v161_v3  ;;  %v27_v6 = vld [vmem:[#allocation2 + $0x8] sm:$0x3] }
  0xdc   :  { %v89_v5 = vpop.f32.mrb[0].mxu0 }
  0xdd   :  { %v96_v7 = vadd.f32 %v89_v5, %v26_v4  ;;  %v155_v8 = vpop.f32.mrb[1].mxu0 }
  0xde   :  { %v92_v9 = vpop.f32.mrb[2].mxu0 }
  0xdf   :  { %98 = vst.msk [vmem:[#allocation2] sm:$0xff] %vm22_vm0, %v96_v7  ;;  %v97_v10 = vadd.f32 %v92_v9, %v27_v6  ;;  %v156_v11 = vpop.f32.mrb[3].mxu0 }
  0xe1   :  { %100 = vst.msk [vmem:[#allocation2 + $0x8] sm:$0x3] %vm24_vm2, %v97_v10 }
  0xe6   :  { %v104_v16 = vld [vmem:[#allocation2] sm:$0xff] }
  0xe7   :  { %v113_v17 = vadd.f32 %v141_v13, %v104_v16 }
  0xe8   :  { %v105_v19 = vld [vmem:[#allocation2 + $0x8] sm:$0x3] }
  0xe9   :  { %v119_v20 = vadd.f32 %v117_v15, %v113_v17  ;;  %v114_v21 = vadd.f32 %v141_v13, %v105_v19 }
  0xeb   :  { %v144_v22 = vpack.c.bf16 %v119_v20, %v119_v20  ;;  %v120_v23 = vadd.f32 %v118_v18, %v114_v21 }
  0xed   :  { %130 = vst.msk [vmem:[%s220_s4] sm:$0xf] %vm129_vm3, %v144_v22  ;;  %v145_v24 = vpack.c.bf16 %v120_v23, %v120_v23 }
  0xef   :  { %132 = vst.msk [vmem:[%s220_s4 + $0x4] sm:$0x1] %vm131_vm4, %v145_v24 }

// kernel: clip_wrapper_forward.29
= control target key start
LH: loop header
LB: loop body
LE: loop exit
PB: predicated region body
PF: predicated region fallthrough
CT: control target
= control target key end

     0   :  { %vm29_vm0 = vcmask 261120   ;;  %vm33_vm1 = vcmask 254976   ;;  %v238_v17 = vmov 0.0   ;;  %vm239_vm2 = vmmov 0   ;;  %s300_s0 = inlined_call_operand.vmem [shape: bf16[10,32], index: 0, kind: input, shape index: {}]   ;;  %s301_s3 = inlined_call_operand.vmem [shape: bf16[32,128], index: 3, kind: input, shape index: {}]   ;;  %s302_s1 = inlined_call_operand.vmem [shape: f32[1,32], index: 1, kind: input, shape index: {}]   ;;  %s303_s2 = inlined_call_operand.vmem [shape: f32[1,32], index: 2, kind: input, shape index: {}]   ;;  %s304_s4 = inlined_call_operand.vmem [shape: f32[1,128], index: 4, kind: input, shape index: {}]   ;;  %s305_s5 = inlined_call_operand.vmem [shape: bf16[10,128], index: 5, kind: output, shape index: {}]  }
   0x1   :  { %v25_v0 = vld [vmem:[%s300_s0] sm:$0xf]  ;;  %v26_v1 = vld [vmem:[%s300_s0 + $0x4] sm:$0x1]  ;;  %213 = vmatprep.subr.bf16.mxu0 %v238_v17  ;;  %v224_v18 = vld [vmem:[%s301_s3 + $0x8] sm:$0xff]   ;;  %217 = vmatprep.mubr.msk.bf16.mxu0 %vm239_vm2, %v238_v17  ;;  %vm84_vm3 = vcmask 257024  }
   0x2   :  { %v27_v2 = vunpack.c.l.bf16 %v25_v0  ;;  %v28_v3 = vunpack.c.l.bf16 %v26_v1  ;;  %v223_v16 = vld [vmem:[%s301_s3] sm:$0xff]   ;;  %vm86_vm4 = vcmask 253952  }
   0x3   :  { %214 = vmatpush3.bf16.msra.mxu0 %v223_v16  ;;  %v193_v26 = vld [vmem:[%s302_s1] ss:$0 sm:$0xff] }
   0x4   :  { %v30_v4 = vsel %vm29_vm0, %v27_v2, 0.0  ;;  %v34_v5 = vsel %vm33_vm1, %v28_v3, 0.0  ;;  %215 = vmatprep.subr.bf16.mxu0 %v238_v17  ;;  %v194_v28 = vld [vmem:[%s303_s2] ss:$0 sm:$0xff] }
   0x5   :  { %31 = vadd.xlane.f32.xlu0 %v30_v4  ;;  %v197_v38 = vld [vmem:[%s304_s4] ss:$0 sm:$0xff] }
   0x7   :  { %216 = vmatpush3.bf16.msra.mxu0 %v224_v18 }
   0x9   :  { %35 = vadd.xlane.f32.xlu0 %v34_v5 }
  0x92   :  { %v32_v6 = vpop.xlane.xlu0 %31 }
  0x93   :  { %v38_v7 = vmul.f32 0.03125, %v32_v6 }
  0x95   :  { %v40_v8 = vsub.f32 %v27_v2, %v38_v7 }
  0x96   :  { %v36_v9 = vpop.xlane.xlu0 %35 }
  0x97   :  { %v39_v10 = vmul.f32 0.03125, %v36_v9  ;;  %v42_v11 = vmul.f32 %v40_v8, %v40_v8 }
  0x99   :  { %v41_v12 = vsub.f32 %v28_v3, %v39_v10  ;;  %v44_v13 = vsel %vm29_vm0, %v42_v11, 0.0 }
  0x9a   :  { %45 = vadd.xlane.f32.xlu1 %v44_v13 }
  0x9b   :  { %v43_v14 = vmul.f32 %v41_v12, %v41_v12 }
  0x9d   :  { %v47_v15 = vsel %vm33_vm1, %v43_v14, 0.0 }
  0x9e   :  { %48 = vadd.xlane.f32.xlu1 %v47_v15 }
 0x127   :  { %v46_v19 = vpop.xlane.xlu1 %45 }
 0x128   :  { %v50_v20 = vmul.f32 0.03125, %v46_v19 }
 0x12a   :  { %v52_v21 = vadd.f32 1e-05, %v50_v20 }
 0x12b   :  { %v49_v22 = vpop.xlane.xlu1 %48 }
 0x12c   :  { %226 = vrsqrt.f32 %v52_v21  ;;  %v51_v23 = vmul.f32 0.03125, %v49_v22 }
 0x12e   :  { %v53_v24 = vadd.f32 1e-05, %v51_v23 }
 0x130   :  { %228 = vrsqrt.f32 %v53_v24 }
 0x136   :  { %v227_v25 = vpop.eup %226 }
 0x137   :  { %v56_v27 = vmul.f32 %v227_v25, %v40_v8 }
 0x139   :  { %v65_v29 = vmul.f32 %v193_v26, %v56_v27 }
 0x13a   :  { %v229_v30 = vpop.eup %228 }
 0x13b   :  { %v74_v31 = vadd.f32 %v194_v28, %v65_v29  ;;  %v57_v32 = vmul.f32 %v229_v30, %v41_v12 }
 0x13d   :  { %v206_v33 = vpack.c.bf16 %v74_v31, %v74_v31  ;;  %v66_v34 = vmul.f32 %v193_v26, %v57_v32 }
 0x13f   :  { %85 = vst.msk [vmem:[#allocation2] sm:$0xf] %vm84_vm3, %v206_v33  ;;  %v75_v35 = vadd.f32 %v194_v28, %v66_v34 }
 0x141   :  { %v207_v36 = vpack.c.bf16 %v75_v35, %v75_v35 }
 0x143   :  { %87 = vst.msk [vmem:[#allocation2 + $0x4] sm:$0x1] %vm86_vm4, %v207_v36 }
 0x14a   :  { %v225_v37 = vld [vmem:[#allocation2] sm:$0x1f]  }
 0x14b   :  { %218 = vmatmul.mubr.msk.bf16.vlgmr.msra.gmra.mrb[0].mxu0 %vm29_vm0, %v225_v37 }
 0x21e   :  { %v156_v39 = vpop.f32.mrb[0].mxu0 }
 0x21f   :  { %v157_v40 = vadd.f32 %v197_v38, %v156_v39  ;;  %v219_v41 = vpop.f32.mrb[1].mxu0 }
 0x220   :  { %v159_v42 = vpop.f32.mrb[2].mxu0 }
 0x221   :  { %v202_v43 = vmul.f32 -1.702, %v157_v40  ;;  %v160_v44 = vadd.f32 %v197_v38, %v159_v42  ;;  %v220_v45 = vpop.f32.mrb[3].mxu0 }
 0x223   :  { %v167_v46 = vmul.f32 1.442695, %v202_v43  ;;  %v203_v47 = vmul.f32 -1.702, %v160_v44 }
 0x225   :  { %230 = vpow2.f32 %v167_v46  ;;  %v169_v48 = vmul.f32 1.442695, %v203_v47 }
 0x227   :  { %232 = vpow2.f32 %v169_v48 }
 0x22f   :  { %v231_v49 = vpop.eup %230 }
 0x230   :  { %v171_v50 = vadd.f32 1.0, %v231_v49 }
 0x231   :  { %v233_v51 = vpop.eup %232 }
 0x232   :  { %234 = vrcp.f32 %v171_v50  ;;  %v172_v52 = vadd.f32 1.0, %v233_v51 }
 0x234   :  { %236 = vrcp.f32 %v172_v52 }
 0x23c   :  { %v235_v53 = vpop.eup %234 }
 0x23d   :  { %v177_v54 = vmul.f32 %v235_v53, %v157_v40 }
 0x23e   :  { %v237_v55 = vpop.eup %236 }
 0x23f   :  { %v208_v56 = vpack.c.bf16 %v177_v54, %v177_v54  ;;  %v178_v57 = vmul.f32 %v237_v55, %v160_v44 }
 0x241   :  { %187 = vst [vmem:[%s305_s5] sm:$0xf] %v208_v56  ;;  %v209_v58 = vpack.c.bf16 %v178_v57, %v178_v57 }
 0x243   :  { %188 = vst [vmem:[%s305_s5 + $0x4] sm:$0x1] %v209_v58 }

// kernel: clip_wrapper_forward.30
= control target key start
LH: loop header
LB: loop body
LE: loop exit
PB: predicated region body
PF: predicated region fallthrough
CT: control target
= control target key end

     0   :  { %vm22_vm0 = vcmask 261120   ;;  %v237_v0 = vmov 0.0   ;;  %vm238_vm1 = vmmov 0   ;;  %vm24_vm2 = vcmask 254976   ;;  %s308_s1 = inlined_call_operand.vmem [shape: bf16[128,32], index: 1, kind: input, shape index: {}]   ;;  %s309_s0 = inlined_call_operand.vmem [shape: bf16[10,128], index: 0, kind: input, shape index: {}]   ;;  %s310_s3 = inlined_call_operand.vmem [shape: bf16[10,32], index: 3, kind: input, shape index: {}]   ;;  %s311_s2 = inlined_call_operand.vmem [shape: f32[1,32], index: 2, kind: input, shape index: {}]   ;;  %s312_s4 = inlined_call_operand.vmem [shape: bf16[10,32], index: 4, kind: output, shape index: {}]  }
   0x1   :  { %206 = vmatprep.subr.bf16.mxu0 %v237_v0  ;;  %v228_v1 = vld [vmem:[%s308_s1] sm:$0xff]   ;;  %222 = vmatprep.mubr.msk.bf16.mxu0 %vm238_vm1, %v237_v0  ;;  %23 = vst.msk [vmem:[#allocation2] sm:$0xff] %vm22_vm0, %v237_v0  ;;  %v229_v2 = vld [vmem:[%s308_s1 + $0x8] sm:$0xff]   ;;  %v230_v3 = vld [vmem:[%s308_s1 + $0x10] sm:$0xff]   ;;  %vm175_vm3 = vcmask 257024   ;;  %vm177_vm4 = vcmask 253952  }
   0x2   :  { %207 = vmatpush3.bf16.msra.mxu0 %v228_v1  ;;  %v231_v4 = vld [vmem:[%s308_s1 + $0x18] sm:$0xff]   ;;  %v232_v5 = vld [vmem:[%s308_s1 + $0x20] sm:$0xff]   ;;  %v233_v6 = vld [vmem:[%s308_s1 + $0x28] sm:$0xff]   ;;  %25 = vst.msk [vmem:[#allocation2 + $0x8] sm:$0x3] %vm24_vm2, %v237_v0 }
   0x3   :  { %208 = vmatprep.subr.bf16.mxu0 %v237_v0  ;;  %v234_v7 = vld [vmem:[%s308_s1 + $0x30] sm:$0xff]   ;;  %v235_v8 = vld [vmem:[%s308_s1 + $0x38] sm:$0xff]   ;;  %v236_v9 = vld [vmem:[%s309_s0] sm:$0x1f]  }
   0x4   :  { %v161_v18 = vld [vmem:[%s310_s3] sm:$0xf]  ;;  %v162_v20 = vld [vmem:[%s310_s3 + $0x4] sm:$0x1] }
   0x5   :  { %v192_v19 = vld [vmem:[%s311_s2] ss:$0 sm:$0xff]  ;;  %v163_v21 = vunpack.c.l.bf16 %v161_v18  ;;  %v164_v24 = vunpack.c.l.bf16 %v162_v20 }
   0x6   :  { %209 = vmatpush3.bf16.msra.mxu0 %v229_v2 }
   0x7   :  { %210 = vmatprep.subr.bf16.mxu0 %v237_v0 }
   0x8   :  { %v26_v10 = vld [vmem:[#allocation2] sm:$0xff] }
   0x9   :  { %v27_v12 = vld [vmem:[#allocation2 + $0x8] sm:$0x3] }
   0xa   :  { %211 = vmatpush3.bf16.msra.mxu0 %v230_v3 }
   0xb   :  { %212 = vmatprep.subr.bf16.mxu0 %v237_v0 }
   0xe   :  { %213 = vmatpush3.bf16.msra.mxu0 %v231_v4 }
   0xf   :  { %214 = vmatprep.subr.bf16.mxu0 %v237_v0 }
  0x12   :  { %215 = vmatpush3.bf16.msra.mxu0 %v232_v5 }
  0x13   :  { %216 = vmatprep.subr.bf16.mxu0 %v237_v0 }
  0x16   :  { %217 = vmatpush3.bf16.msra.mxu0 %v233_v6 }
  0x17   :  { %218 = vmatprep.subr.bf16.mxu0 %v237_v0 }
  0x1a   :  { %219 = vmatpush3.bf16.msra.mxu0 %v234_v7 }
  0x1b   :  { %220 = vmatprep.subr.bf16.mxu0 %v237_v0 }
  0x1e   :  { %221 = vmatpush3.bf16.msra.mxu0 %v235_v8 }
  0x21   :  { %223 = vmatmul.mubr.bf16.vlgmr.msra.gmra.mrb[0].mxu0 %v236_v9 }
  0xf4   :  { %v134_v11 = vpop.f32.mrb[0].mxu0 }
  0xf5   :  { %v141_v13 = vadd.f32 %v134_v11, %v26_v10  ;;  %v224_v14 = vpop.f32.mrb[1].mxu0 }
  0xf6   :  { %v137_v15 = vpop.f32.mrb[2].mxu0 }
  0xf7   :  { %144 = vst.msk [vmem:[#allocation2] sm:$0xff] %vm22_vm0, %v141_v13  ;;  %v142_v16 = vadd.f32 %v137_v15, %v27_v12  ;;  %v225_v17 = vpop.f32.mrb[3].mxu0 }
  0xf9   :  { %146 = vst.msk [vmem:[#allocation2 + $0x8] sm:$0x3] %vm24_vm2, %v142_v16 }
  0xfe   :  { %v150_v22 = vld [vmem:[#allocation2] sm:$0xff] }
  0xff   :  { %v159_v23 = vadd.f32 %v192_v19, %v150_v22 }
 0x100   :  { %v151_v25 = vld [vmem:[#allocation2 + $0x8] sm:$0x3] }
 0x101   :  { %v165_v26 = vadd.f32 %v163_v21, %v159_v23  ;;  %v160_v27 = vadd.f32 %v192_v19, %v151_v25 }
 0x103   :  { %v195_v28 = vpack.c.bf16 %v165_v26, %v165_v26  ;;  %v166_v29 = vadd.f32 %v164_v24, %v160_v27 }
 0x105   :  { %176 = vst.msk [vmem:[%s312_s4] sm:$0xf] %vm175_vm3, %v195_v28  ;;  %v196_v30 = vpack.c.bf16 %v166_v29, %v166_v29 }
 0x107   :  { %178 = vst.msk [vmem:[%s312_s4 + $0x4] sm:$0x1] %vm177_vm4, %v196_v30 }

// kernel: clip_wrapper_forward.36
= control target key start
LH: loop header
LB: loop body
LE: loop exit
PB: predicated region body
PF: predicated region fallthrough
CT: control target
= control target key end

     0   :  { %vm25_vm0 = vcmask 254976   ;;  %s238_s0 = inlined_call_operand.vmem [shape: bf16[2,32], index: 0, kind: input, shape index: {}]   ;;  %s239_s1 = inlined_call_operand.vmem [shape: f32[1,32], index: 1, kind: input, shape index: {}]   ;;  %s240_s2 = inlined_call_operand.vmem [shape: f32[1,32], index: 2, kind: input, shape index: {}]   ;;  %s241_s3 = inlined_call_operand.vmem [shape: bf16[32,16], index: 3, kind: input, shape index: {}]   ;;  %s242_s4 = inlined_call_operand.hbm [shape: f32[2,16], index: 4, kind: output, shape index: {}]  }
   0x1   :  { %v23_v0 = vld [vmem:[%s238_s0] sm:$0x1] }
   0x2   :  { %v24_v1 = vunpack.c.l.bf16 %v23_v0 }
   0x3   :  { %9 = vsyncpa [#allocation4], 0  ;;  %v155_v8 = vld [vmem:[%s241_s3] sm:$0xff]   ;;  %v183_v9 = vmov 0.0   ;;  %v156_v10 = vld [vmem:[%s241_s3 + $0x8] sm:$0xff]   ;;  %vm184_vm1 = vmmov 0  }
   0x4   :  { %v26_v2 = vsel %vm25_vm0, %v24_v1, 0.0  ;;  %144 = vmatprep.subr.bf16.mxu0 %v183_v9  ;;  %148 = vmatprep.mubr.msk.bf16.mxu0 %vm184_vm1, %v183_v9  ;;  %v136_v15 = vld [vmem:[%s239_s1] ss:$0 sm:$0xff]  ;;  %vm57_vm2 = vcmask 253952   ;;  %vm76_vm3 = vcmask 261120   ;;  %s185_s3 = smov [#allocation3]  }
   0x5   :  { %27 = vadd.xlane.f32.xlu0 %v26_v2  ;;  %145 = vmatpush3.bf16.msra.mxu0 %v155_v8  ;;  %v137_v17 = vld [vmem:[%s240_s2] ss:$0 sm:$0xff]  ;;  %s128_s24 = sshll.u32 %s185_s3, 4  ;;  %vm120_vm4 = vcmask 123904   ;;  %s129_s24 = int_to_ptr.vmem [resolvable:$true] %s128_s24 }
   0x6   :  { %146 = vmatprep.subr.bf16.mxu0 %v183_v9  ;;  %s159_s1 = scalar_lea.vmem %s129_s24, 32  ;;  %p164_p1 = scmp.lt.s32.totalorder %s129_s24, %s129_s24 }
   0x7   :  { %p160_p0 = scmp.ne.s32.totalorder %s129_s24, %s159_s1  ;;  %p165_p2 = scmp.lt.s32.totalorder %s159_s1, %s159_s1 }
   0x9   :  { %147 = vmatpush3.bf16.msra.mxu0 %v156_v10  ;;  %p166_p3 = por %p165_p2, %p164_p1 }
   0xb   :  { %p167_p4 = pnand %p166_p3, %p160_p0 }
  0x92   :  { %v28_v3 = vpop.xlane.xlu0 %27 }
  0x93   :  { %v30_v4 = vmul.f32 0.03125, %v28_v3 }
  0x95   :  { %v31_v5 = vsub.f32 %v24_v1, %v30_v4 }
  0x97   :  { %v32_v6 = vmul.f32 %v31_v5, %v31_v5 }
  0x99   :  { %v33_v7 = vsel %vm25_vm0, %v32_v6, 0.0 }
  0x9a   :  { %34 = vadd.xlane.f32.xlu0 %v33_v7 }
 0x127   :  { %v35_v11 = vpop.xlane.xlu0 %34 }
 0x128   :  { %v36_v12 = vmul.f32 0.03125, %v35_v11 }
 0x12a   :  { %v37_v13 = vadd.f32 1e-05, %v36_v12 }
 0x12c   :  { %157 = vrsqrt.f32 %v37_v13 }
 0x136   :  { %v158_v14 = vpop.eup %157 }
 0x137   :  { %v39_v16 = vmul.f32 %v158_v14, %v31_v5 }
 0x139   :  { %v47_v18 = vmul.f32 %v136_v15, %v39_v16 }
 0x13b   :  { %v55_v19 = vadd.f32 %v137_v17, %v47_v18 }
 0x13d   :  { %v56_v20 = vpack.c.bf16 %v55_v19, %v55_v19 }
 0x13f   :  { %58 = vst.msk [vmem:[#allocation2] sm:$0x1] %vm57_vm2, %v56_v20 }
 0x146   :  { %v59_v21 = vld [vmem:[#allocation2] sm:$0x1] }
 0x147   :  { %149 = vmatmul.mubr.msk.bf16.vlgmr.msra.gmra.mrb[0].mxu0 %vm76_vm3, %v59_v21 }
 0x21a   :  { %v114_v22 = vpop.f32.mrb[0].mxu0 }
 0x21b   :  { %121 = vst.msk [vmem:[#allocation3] sm:$0x3] %vm120_vm4, %v114_v22  ;;  %v150_v23 = vpop.f32.mrb[1].mxu0 }
 0x21c   :  { %v117_v24 = vpop.f32.mrb[2].mxu0 }
 0x21d   :  { %170 = shalt.err (!%p167_p4)
}
 0x21e   :  { %s171_s26 = scalar_lea.hbm %s242_s4, 32 }
 0x21f   :  { %p172_p5 = scmp.ne.s32.totalorder %s242_s4, %s171_s26  ;;  %p175_p6 = scmp.lt.u32.totalorder %s171_s26, %s242_s4 }
 0x221   :  { %p177_p7 = pnand %p175_p6, %p172_p5 }
 0x223   :  { %180 = shalt.err (!%p177_p7)
}
 0x224   :  { %131 = dma.vmem_to_hbm [thread:$0]  %s129_s24, 32, %s242_s4, [#allocation4]   ;;  %v151_v25 = vpop.f32.mrb[3].mxu0 }
 0x225   :  { %181 = dma.done.wait [#allocation4], 32  }
 0x226   :  { %182 = vsyncadd [#allocation4], 4294967264 }
 0x227   :  { %135 = vsyncpa [#allocation4], 1 }

// kernel: clip_wrapper_forward.39
= control target key start
LH: loop header
LB: loop body
LE: loop exit
PB: predicated region body
PF: predicated region fallthrough
CT: control target
= control target key end

     0   :  { %vm22_vm0 = vcmask 261120   ;;  %v163_v0 = vmov 0.0   ;;  %vm164_vm1 = vmmov 0   ;;  %vm127_vm2 = vcmask 257024   ;;  %s216_s1 = inlined_call_operand.vmem [shape: bf16[32,32], index: 1, kind: input, shape index: {}]   ;;  %s217_s0 = inlined_call_operand.vmem [shape: bf16[16,32], index: 0, kind: input, shape index: {}]   ;;  %s218_s3 = inlined_call_operand.vmem [shape: bf16[16,32], index: 3, kind: input, shape index: {}]   ;;  %s219_s2 = inlined_call_operand.vmem [shape: f32[1,32], index: 2, kind: input, shape index: {}]   ;;  %s220_s4 = inlined_call_operand.vmem [shape: bf16[16,32], index: 4, kind: output, shape index: {}]  }
   0x1   :  { %150 = vmatprep.subr.bf16.mxu0 %v163_v0  ;;  %v160_v1 = vld [vmem:[%s216_s1] sm:$0xff]   ;;  %154 = vmatprep.mubr.msk.bf16.mxu0 %vm164_vm1, %v163_v0  ;;  %23 = vst.msk [vmem:[#allocation2] sm:$0xff] %vm22_vm0, %v163_v0  ;;  %24 = vst.msk [vmem:[#allocation2 + $0x8] sm:$0xff] %vm22_vm0, %v163_v0  ;;  %v161_v2 = vld [vmem:[%s216_s1 + $0x8] sm:$0xff]  }
   0x2   :  { %151 = vmatpush3.bf16.msra.mxu0 %v160_v1  ;;  %v162_v3 = vld [vmem:[%s217_s0] sm:$0xff]  }
   0x3   :  { %152 = vmatprep.subr.bf16.mxu0 %v163_v0  ;;  %v144_v12 = vld [vmem:[%s218_s3] sm:$0xff]  }
   0x4   :  { %v138_v13 = vld [vmem:[%s219_s2] ss:$0 sm:$0xff]  ;;  %v145_v14 = vunpack.c.l.bf16 %v144_v12  ;;  %v146_v17 = vunpack.c.h.bf16 %v144_v12 }
   0x6   :  { %153 = vmatpush3.bf16.msra.mxu0 %v161_v2 }
   0x8   :  { %v25_v4 = vld [vmem:[#allocation2] sm:$0xff]  ;;  %v26_v6 = vld [vmem:[#allocation2 + $0x8] sm:$0xff] }
   0x9   :  { %155 = vmatmul.mubr.msk.bf16.vlgmr.msra.gmra.mrb[0].mxu0 %vm22_vm0, %v162_v3 }
  0xdc   :  { %v88_v5 = vpop.f32.mrb[0].mxu0 }
  0xdd   :  { %v95_v7 = vadd.f32 %v88_v5, %v25_v4  ;;  %v156_v8 = vpop.f32.mrb[1].mxu0 }
  0xde   :  { %v91_v9 = vpop.f32.mrb[2].mxu0 }
  0xdf   :  { %97 = vst.msk [vmem:[#allocation2] sm:$0xff] %vm22_vm0, %v95_v7  ;;  %v96_v10 = vadd.f32 %v91_v9, %v26_v6  ;;  %v157_v11 = vpop.f32.mrb[3].mxu0 }
  0xe1   :  { %98 = vst.msk [vmem:[#allocation2 + $0x8] sm:$0xff] %vm22_vm0, %v96_v10 }
  0xe6   :  { %v102_v15 = vld [vmem:[#allocation2] sm:$0xff] }
  0xe7   :  { %v111_v16 = vadd.f32 %v138_v13, %v102_v15 }
  0xe8   :  { %v103_v18 = vld [vmem:[#allocation2 + $0x8] sm:$0xff] }
  0xe9   :  { %v117_v19 = vadd.f32 %v145_v14, %v111_v16  ;;  %v112_v20 = vadd.f32 %v138_v13, %v103_v18 }
  0xeb   :  { %v141_v21 = vpack.c.bf16 %v117_v19, %v117_v19  ;;  %v118_v22 = vadd.f32 %v146_v17, %v112_v20 }
  0xed   :  { %128 = vst.msk [vmem:[%s220_s4] sm:$0xf] %vm127_vm2, %v141_v21  ;;  %v142_v23 = vpack.c.bf16 %v118_v22, %v118_v22 }
  0xef   :  { %129 = vst.msk [vmem:[%s220_s4 + $0x4] sm:$0xf] %vm127_vm2, %v142_v23 }

// kernel: clip_wrapper_forward.38
= control target key start
LH: loop header
LB: loop body
LE: loop exit
PB: predicated region body
PF: predicated region fallthrough
CT: control target
= control target key end

     0   :  { %s816_s6 = smov 0   ;;  %s933_s0 = inlined_call_operand.vmem [shape: bf16[2,8,96], index: 0, kind: input, shape index: {}]   ;;  %s934_s1 = inlined_call_operand.vmem [shape: bf16[2,8,32], index: 1, kind: output, shape index: {}]  }
   0x1 LB: > { %s653_s7 = sadd.s32 4294967295, %s788_s6   ;;  %p657_p0 = scmp.ge.s32.totalorder %s788_s6, 1  ;;  %s788_s6 = sphi %s816_s6, %s11_s6  }
   0x2   : > { %p86_p1 = scmp.lt.s32.totalorder %s788_s6, 3 }
   0x4   : > { %p87_p2 = pnand %p657_p0, %p86_p1 }
   0x5   : > { %p104_p3 = scmp.lt.s32.totalorder (!%p87_p2), %s653_s7, 1  ;;  %v790_v0 = vmov (!%p87_p2), 0.0   ;;  %vm791_vm0 = vmmov (!%p87_p2), 0   ;;  %s792_s12 = smov (!%p87_p2), 96   ;;  %vm124_vm1 = vcmask (!%p87_p2), 64512   ;;  %v114_v5 = vlaneseq (!%p87_p2) }
   0x6   : > { %90 = sbr.rel (%p87_p2) target bundleno = 1248 (0x4e0), region = 24  ;;  %693 = vmatprep.subr.bf16.mxu0 (!%p87_p2), %v790_v0  ;;  %695 = vmatprep.mubr.msk.bf16.mxu0 (!%p87_p2), %vm791_vm0, %v790_v0  ;;  %s793_s13 = smov (!%p87_p2), 64   ;;  %vm188_vm3 = vcmask (!%p87_p2), 1043456   ;;  %vm235_vm4 = vcmask (!%p87_p2), 60416   ;;  %vm356_vm5 = vcmask (!%p87_p2), 126016   ;;  %vm477_vm6 = vcmask (!%p87_p2), 191616  }
   0x7   : > { %699 = vmatprep.subr.bf16.mxu1 (!%p87_p2), %v790_v0  ;;  %701 = vmatprep.mubr.msk.bf16.mxu1 (!%p87_p2), %vm791_vm0, %v790_v0  ;;  %s794_s14 = smov (!%p87_p2), 88   ;;  %s795_s15 = smov (!%p87_p2), 120   ;;  %v853_v6 = vshrl.u32 (!%p87_p2), %v114_v5, 7  ;;  %v855_v7 = vand.u32 (!%p87_p2), 127, %v114_v5  ;;  %vm598_vm7 = vcmask (!%p87_p2), 257216  }
   0x8   : > { %s796_s16 = smov (!%p87_p2), 80   ;;  %s797_s17 = smov (!%p87_p2), 112  }
   0x9   : > { %s798_s18 = smov (!%p87_p2), 72   ;;  %s799_s19 = smov (!%p87_p2), 104   ;;  %vm118_vm2 = vcmp.le.s32.totalorder (!%p87_p2), %v855_v7, %v853_v6 }
   0xa   : > { %s800_s20 = smov (!%p87_p2), 56   ;;  %s801_s21 = smov (!%p87_p2), 48  }
   0xb   : > { %s802_s22 = smov (!%p87_p2), 40   ;;  %s803_s26 = smov (!%p87_p2), 8  }
   0xc   : > { %s804_s27 = smov (!%p87_p2), 16   ;;  %s805_s28 = smov (!%p87_p2), 24  }
   0xd   : > { %s936_s7 = smov (!%p104_p3, %s653_s7), 1 }
   0xe   : > { %s658_s8 = sshll.u32 %s936_s7, 2 }
   0xf   : > { %s107_s11 = scalar_lea.vmem %s933_s0, %s658_s8  ;;  %s924_s25 = scalar_lea.vmem %s934_s1, %s658_s8 }
  0x10   : > { %v113_v1 = vld [vmem:[%s107_s11] sm:$0xf] }
  0x11   : > { %v838_v2 = vcombine.low %v113_v1, %v113_v1 }
  0x13   : > { %122 = vrot.lane.b32.xlu0 %v838_v2, %s792_s12  ;;  %183 = vrot.lane.b32.xlu1 %v838_v2, %s793_s13 }
  0x17   : > { %239 = vrot.lane.b32.xlu1 %v838_v2, %s794_s14 }
  0x1b   : > { %237 = vrot.lane.b32.xlu1 %v838_v2, %s795_s15 }
  0x1f   : > { %360 = vrot.lane.b32.xlu1 %v838_v2, %s796_s16 }
  0x23   : > { %358 = vrot.lane.b32.xlu1 %v838_v2, %s797_s17 }
  0x27   : > { %481 = vrot.lane.b32.xlu1 %v838_v2, %s798_s18 }
  0x2b   : > { %479 = vrot.lane.b32.xlu1 %v838_v2, %s799_s19 }
  0x85   : > { %v123_v3 = vpop.permute.xlu0 %122  ;;  %v184_v15 = vpop.permute.xlu1 %183 }
  0x86   : > { %v129_v4 = vsel %vm124_vm1, %v123_v3, 0  ;;  %v190_v16 = vsel %vm188_vm3, %v184_v15, 0 }
  0x87   : > { %694 = vmatpush3.bf16.xpose.msra.mxu0 %v129_v4  ;;  %700 = vmatpush3.bf16.msra.mxu1 %v190_v16 }
  0x88   : > { %711 = vmatprep.subr.bf16.mxu0 %v790_v0  ;;  %705 = vmatprep.subr.bf16.mxu1 %v790_v0 }
  0x89   : > { %v240_v20 = vpop.permute.xlu1 %239 }
  0x8a   : > { %v245_v23 = vsel %vm124_vm1, %v240_v20, 0 }
  0x8d   : > { %v238_v21 = vpop.permute.xlu1 %237 }
  0x8e   : > { %696 = vmatmul.mubr.msk.bf16.vlgmr.msra.gmra.mrb[0].mxu0 %vm124_vm1, %v113_v1 }
  0x8f   : > { %713 = vmatprep.mubr.msk.bf16.mxu0 %vm791_vm0, %v790_v0 }
  0x91   : > { %v361_v25 = vpop.permute.xlu1 %360 }
  0x92   : > { %v366_v27 = vsel %vm124_vm1, %v361_v25, 0 }
  0x95   : > { %v359_v26 = vpop.permute.xlu1 %358 }
  0x99   : > { %v482_v28 = vpop.permute.xlu1 %481 }
  0x9a   : > { %v487_v29 = vsel %vm124_vm1, %v482_v28, 0 }
  0x9d   : > { %v480_v30 = vpop.permute.xlu1 %479 }
 0x161   : > { %v165_v8 = vpop.f32.mrb[0].mxu0 }
 0x162   : > { %v171_v9 = vmul.f32 0.35355338, %v165_v8  ;;  %v697_v10 = vpop.f32.mrb[1].mxu0 }
 0x163   : > { %v168_v11 = vpop.f32.mrb[2].mxu0 }
 0x164   : > { %v698_v12 = vpop.f32.mrb[3].mxu0  ;;  %v172_v13 = vsel %vm118_vm2, %v171_v9, -1e+09 }
 0x165   : > { %v173_v14 = vsel %vm124_vm1, %v172_v13, -inf }
 0x166   : > { %174 = vmax.xlane.f32.xlu0 %v173_v14 }
 0x17c   : > { %299 = vrot.lane.b32.xlu0 %v838_v2, %s800_s20 }
 0x1f3   : > { %v175_v17 = vpop.xlane.xlu0 %174 }
 0x1f4   : > { %v176_v18 = vsub.f32 %v172_v13, %v175_v17 }
 0x1f6   : > { %v177_v19 = vmul.f32 1.442695, %v176_v18 }
 0x1f7   : > { %v300_v31 = vpop.permute.xlu0 %299 }
 0x1f8   : > { %766 = vpow2.f32 %v177_v19  ;;  %v305_v32 = vsel %vm188_vm3, %v300_v31, 0 }
 0x1f9   : > { %712 = vmatpush3.bf16.msra.mxu0 %v305_v32 }
 0x1fa   : > { %723 = vmatprep.subr.bf16.mxu0 %v790_v0 }
 0x202   : > { %v866_v22 = vpop.eup %766 }
 0x203   : > { %v182_v24 = vpack.c.bf16 %v866_v22, %v866_v22  ;;  %v179_v17 = vsel %vm124_vm1, %v866_v22, 0.0 }
 0x205   : > { %702 = vmatmul.mubr.msk.bf16.vlgmr.msra.gmra.mrb[0].mxu1 %vm124_vm1, %v182_v24 }
 0x206   : > { %706 = vmatpush3.bf16.xpose.msra.mxu1 %v245_v23  ;;  %707 = vmatprep.mubr.msk.bf16.mxu1 %vm791_vm0, %v790_v0 }
 0x207   : > { %717 = vmatprep.subr.bf16.mxu1 %v790_v0 }
 0x20d   : > { %708 = vmatmul.mubr.msk.bf16.vlgmr.msra.gmra.mrb[4].mxu1 %vm124_vm1, %v238_v21 }
 0x20e   : > { %718 = vmatpush3.bf16.xpose.msra.mxu1 %v366_v27  ;;  %719 = vmatprep.mubr.msk.bf16.mxu1 %vm791_vm0, %v790_v0 }
 0x20f   : > { %729 = vmatprep.subr.bf16.mxu1 %v790_v0 }
 0x215   : > { %720 = vmatmul.mubr.msk.bf16.vlgmr.msra.gmra.mrb[8].mxu1 %vm124_vm1, %v359_v26 }
 0x216   : > { %730 = vmatpush3.bf16.xpose.msra.mxu1 %v487_v29  ;;  %731 = vmatprep.mubr.msk.bf16.mxu1 %vm791_vm0, %v790_v0 }
 0x21d   : > { %732 = vmatmul.mubr.msk.bf16.vlgmr.msra.gmra.mrb[12].mxu1 %vm124_vm1, %v480_v30 }
 0x2d8   : > { %v887_v33 = vpop.f32.mrb[0].mxu1 }
 0x2d9   : > { %v703_v34 = vpop.f32.mrb[1].mxu1 }
 0x2da   : > { %v229_v35 = vpop.f32.mrb[2].mxu1 }
 0x2db   : > { %v704_v36 = vpop.f32.mrb[3].mxu1 }
 0x2e0   : > { %v281_v37 = vpop.f32.mrb[4].mxu1 }
 0x2e1   : > { %v287_v38 = vmul.f32 0.35355338, %v281_v37  ;;  %v709_v39 = vpop.f32.mrb[5].mxu1 }
 0x2e2   : > { %v284_v40 = vpop.f32.mrb[6].mxu1 }
 0x2e3   : > { %v710_v41 = vpop.f32.mrb[7].mxu1  ;;  %v288_v42 = vsel %vm118_vm2, %v287_v38, -1e+09 }
 0x2e4   : > { %v289_v43 = vsel %vm124_vm1, %v288_v42, -inf }
 0x2e5   : > { %290 = vmax.xlane.f32.xlu1 %v289_v43 }
 0x2e8   : > { %v402_v44 = vpop.f32.mrb[8].mxu1 }
 0x2e9   : > { %v408_v45 = vmul.f32 0.35355338, %v402_v44  ;;  %v721_v46 = vpop.f32.mrb[9].mxu1 }
 0x2ea   : > { %v405_v47 = vpop.f32.mrb[10].mxu1 }
 0x2eb   : > { %v722_v48 = vpop.f32.mrb[11].mxu1  ;;  %v409_v49 = vsel %vm118_vm2, %v408_v45, -1e+09 }
 0x2ec   : > { %v410_v50 = vsel %vm124_vm1, %v409_v49, -inf }
 0x2ed   : > { %411 = vmax.xlane.f32.xlu0 %v410_v50 }
 0x2f0   : > { %v523_v51 = vpop.f32.mrb[12].mxu1 }
 0x2f1   : > { %v529_v52 = vmul.f32 0.35355338, %v523_v51  ;;  %v733_v53 = vpop.f32.mrb[13].mxu1 }
 0x2f2   : > { %v526_v54 = vpop.f32.mrb[14].mxu1 }
 0x2f3   : > { %v734_v55 = vpop.f32.mrb[15].mxu1  ;;  %v530_v56 = vsel %vm118_vm2, %v529_v52, -1e+09 }
 0x2f4   : > { %v531_v57 = vsel %vm124_vm1, %v530_v56, -inf }
 0x2f5   : > { %532 = vmax.xlane.f32.xlu0 %v531_v57 }
 0x2f6   : > { %420 = vrot.lane.b32.xlu1 %v838_v2, %s801_s21 }
 0x30b   : > { %541 = vrot.lane.b32.xlu0 %v838_v2, %s802_s22 }
 0x372   : > { %v291_v58 = vpop.xlane.xlu1 %290 }
 0x373   : > { %v292_v59 = vsub.f32 %v288_v42, %v291_v58 }
 0x375   : > { %v293_v60 = vmul.f32 1.442695, %v292_v59 }
 0x376   : > { %v421_v1 = vpop.permute.xlu1 %420 }
 0x377   : > { %768 = vpow2.f32 %v293_v60  ;;  %v426_v4 = vsel %vm188_vm3, %v421_v1, 0 }
 0x37a   : > { %v412_v61 = vpop.xlane.xlu0 %411 }
 0x37b   : > { %v413_v62 = vsub.f32 %v409_v49, %v412_v61 }
 0x37d   : > { %v414_v63 = vmul.f32 1.442695, %v413_v62 }
 0x37f   : > { %770 = vpow2.f32 %v414_v63 }
 0x381   : > { %v769_v3 = vpop.eup %768 }
 0x382   : > { %v533_v5 = vpop.xlane.xlu0 %532  ;;  %v295_v6 = vsel %vm124_vm1, %v769_v3, 0.0  ;;  %v298_v7 = vpack.c.bf16 %v769_v3, %v769_v3 }
 0x383   : > { %v534_v8 = vsub.f32 %v530_v56, %v533_v5  ;;  %296 = vadd.xlane.f32.xlu0 %v295_v6 }
 0x384   : > { %714 = vmatmul.mubr.msk.bf16.vlgmr.msra.gmra.mrb[4].mxu0 %vm124_vm1, %v298_v7 }
 0x385   : > { %v535_v2 = vmul.f32 1.442695, %v534_v8  ;;  %724 = vmatpush3.bf16.msra.mxu0 %v426_v4  ;;  %725 = vmatprep.mubr.msk.bf16.mxu0 %vm791_vm0, %v790_v0 }
 0x386   : > { %735 = vmatprep.subr.bf16.mxu0 %v790_v0  ;;  %v542_v9 = vpop.permute.xlu0 %541 }
 0x387   : > { %772 = vpow2.f32 %v535_v2  ;;  %v547_v11 = vsel %vm188_vm3, %v542_v9, 0 }
 0x389   : > { %v771_v10 = vpop.eup %770 }
 0x38a   : > { %v416_v12 = vsel %vm124_vm1, %v771_v10, 0.0  ;;  %v419_v13 = vpack.c.bf16 %v771_v10, %v771_v10 }
 0x38b   : > { %417 = vadd.xlane.f32.xlu1 %v416_v12 }
 0x38c   : > { %726 = vmatmul.mubr.msk.bf16.vlgmr.msra.gmra.mrb[8].mxu0 %vm124_vm1, %v419_v13 }
 0x38d   : > { %736 = vmatpush3.bf16.msra.mxu0 %v547_v11  ;;  %737 = vmatprep.mubr.msk.bf16.mxu0 %vm791_vm0, %v790_v0 }
 0x391   : > { %v773_v14 = vpop.eup %772 }
 0x392   : > { %v537_v15 = vsel %vm124_vm1, %v773_v14, 0.0  ;;  %v540_v16 = vpack.c.bf16 %v773_v14, %v773_v14 }
 0x393   : > { %538 = vadd.xlane.f32.xlu0 %v537_v15 }
 0x394   : > { %738 = vmatmul.mubr.msk.bf16.vlgmr.msra.gmra.mrb[12].mxu0 %vm124_vm1, %v540_v16 }
 0x397   : > { %180 = vadd.xlane.f32.xlu0 %v179_v17 }
 0x410   : > { %v297_v18 = vpop.xlane.xlu0 %296 }
 0x418   : > { %v418_v22 = vpop.xlane.xlu1 %417 }
 0x420   : > { %v539_v19 = vpop.xlane.xlu0 %538 }
 0x424   : > { %v181_v20 = vpop.xlane.xlu0 %180 }
 0x425   : > { %774 = vrcp.f32 %v181_v20 }
 0x426   : > { %776 = vrcp.f32 %v297_v18 }
 0x427   : > { %778 = vrcp.f32 %v418_v22 }
 0x428   : > { %780 = vrcp.f32 %v539_v19 }
 0x42f   : > { %v775_v21 = vpop.eup %774 }
 0x430   : > { %v233_v23 = vmul.f32 %v775_v21, %v887_v33  ;;  %v777_v24 = vpop.eup %776 }
 0x431   : > { %v779_v31 = vpop.eup %778 }
 0x432   : > { %v234_v0 = vpack.c.bf16 %v233_v23, %v233_v23  ;;  %v781_v38 = vpop.eup %780 }
 0x434   : > { %236 = vst.msk [vmem:[%s924_s25] sm:$0xf] %vm235_vm4, %v234_v0 }
 0x457   : > { %v341_v25 = vpop.f32.mrb[4].mxu0 }
 0x458   : > { %v348_v26 = vmul.f32 %v777_v24, %v341_v25  ;;  %v715_v27 = vpop.f32.mrb[5].mxu0 }
 0x459   : > { %v344_v28 = vpop.f32.mrb[6].mxu0 }
 0x45a   : > { %v674_v29 = vpack.c.bf16 %v348_v26, %v348_v26  ;;  %v716_v30 = vpop.f32.mrb[7].mxu0 }
 0x45c   : > { %353 = vrot.lane.b32.xlu0 %v674_v29, %s803_s26 }
 0x45f   : > { %v462_v32 = vpop.f32.mrb[8].mxu0 }
 0x460   : > { %v469_v33 = vmul.f32 %v779_v31, %v462_v32  ;;  %v727_v34 = vpop.f32.mrb[9].mxu0 }
 0x461   : > { %v465_v35 = vpop.f32.mrb[10].mxu0 }
 0x462   : > { %v675_v36 = vpack.c.bf16 %v469_v33, %v469_v33  ;;  %v728_v37 = vpop.f32.mrb[11].mxu0 }
 0x464   : > { %474 = vrot.lane.b32.xlu1 %v675_v36, %s804_s27 }
 0x467   : > { %v583_v39 = vpop.f32.mrb[12].mxu0 }
 0x468   : > { %v590_v40 = vmul.f32 %v781_v38, %v583_v39  ;;  %v739_v41 = vpop.f32.mrb[13].mxu0 }
 0x469   : > { %v586_v42 = vpop.f32.mrb[14].mxu0 }
 0x46a   : > { %v676_v43 = vpack.c.bf16 %v590_v40, %v590_v40  ;;  %v740_v44 = vpop.f32.mrb[15].mxu0 }
 0x46c   : > { %595 = vrot.lane.b32.xlu0 %v676_v43, %s805_s28 }
 0x4ce   : > { %v354_v45 = vpop.permute.xlu0 %353 }
 0x4cf   : > { %357 = vst.msk [vmem:[%s924_s25] sm:$0xf] %vm356_vm5, %v354_v45 }
 0x4d6   : > { %v475_v46 = vpop.permute.xlu1 %474 }
 0x4d7   : > { %478 = vst.msk [vmem:[%s924_s25] sm:$0xf] %vm477_vm6, %v475_v46 }
 0x4de   : > { %v596_v47 = vpop.permute.xlu0 %595 }
 0x4df   : > { %599 = vst.msk [vmem:[%s924_s25] sm:$0xf] %vm598_vm7, %v596_v47 }
 0x4e0 PF: > { %s11_s6 = sadd.s32 1, %s788_s6  }
 0x4e1   : > { %p8_p4 = scmp.ge.s32.totalorder %s11_s6, 4  }
 0x4e3   :  { %10 = sbr.rel (!%p8_p4) target bundleno = 1 (0x1), region = 54 }

// kernel: clip_wrapper_forward.37
= control target key start
LH: loop header
LB: loop body
LE: loop exit
PB: predicated region body
PF: predicated region fallthrough
CT: control target
= control target key end

     0   :  { %vm29_vm0 = vcmask 261120   ;;  %v194_v16 = vmov 0.0   ;;  %vm195_vm1 = vmmov 0   ;;  %vm154_vm2 = vcmask 781312   ;;  %s256_s0 = inlined_call_operand.vmem [shape: bf16[16,32], index: 0, kind: input, shape index: {}]   ;;  %s257_s3 = inlined_call_operand.vmem [shape: bf16[32,96], index: 3, kind: input, shape index: {}]   ;;  %s258_s1 = inlined_call_operand.vmem [shape: f32[1,32], index: 1, kind: input, shape index: {}]   ;;  %s259_s2 = inlined_call_operand.vmem [shape: f32[1,32], index: 2, kind: input, shape index: {}]   ;;  %s260_s4 = inlined_call_operand.vmem [shape: f32[1,96], index: 4, kind: input, shape index: {}]   ;;  %s261_s5 = inlined_call_operand.vmem [shape: bf16[16,96], index: 5, kind: output, shape index: {}]  }
   0x1   :  { %v172_v0 = vld [vmem:[%s256_s0] sm:$0xff]   ;;  %178 = vmatprep.subr.bf16.mxu0 %v194_v16  ;;  %v189_v17 = vld [vmem:[%s257_s3 + $0x8] sm:$0xff]   ;;  %182 = vmatprep.mubr.msk.bf16.mxu0 %vm195_vm1, %v194_v16 }
   0x2   :  { %v173_v1 = vunpack.c.l.bf16 %v172_v0  ;;  %v174_v2 = vunpack.c.h.bf16 %v172_v0  ;;  %v188_v15 = vld [vmem:[%s257_s3] sm:$0xff]  }
   0x3   :  { %179 = vmatpush3.bf16.msra.mxu0 %v188_v15  ;;  %v161_v26 = vld [vmem:[%s258_s1] ss:$0 sm:$0xff] }
   0x4   :  { %v30_v3 = vsel %vm29_vm0, %v173_v1, 0.0  ;;  %v33_v4 = vsel %vm29_vm0, %v174_v2, 0.0  ;;  %180 = vmatprep.subr.bf16.mxu0 %v194_v16  ;;  %v162_v30 = vld [vmem:[%s259_s2] ss:$0 sm:$0xff] }
   0x5   :  { %31 = vadd.xlane.f32.xlu0 %v30_v3  ;;  %v163_v36 = vld [vmem:[%s260_s4] ss:$0 sm:$0xff] }
   0x7   :  { %181 = vmatpush3.bf16.msra.mxu0 %v189_v17 }
   0x9   :  { %34 = vadd.xlane.f32.xlu0 %v33_v4 }
  0x92   :  { %v32_v5 = vpop.xlane.xlu0 %31 }
  0x93   :  { %v37_v6 = vmul.f32 0.03125, %v32_v5 }
  0x95   :  { %v39_v7 = vsub.f32 %v173_v1, %v37_v6 }
  0x96   :  { %v35_v8 = vpop.xlane.xlu0 %34 }
  0x97   :  { %v38_v9 = vmul.f32 0.03125, %v35_v8  ;;  %v41_v10 = vmul.f32 %v39_v7, %v39_v7 }
  0x99   :  { %v40_v11 = vsub.f32 %v174_v2, %v38_v9  ;;  %v43_v12 = vsel %vm29_vm0, %v41_v10, 0.0 }
  0x9a   :  { %44 = vadd.xlane.f32.xlu1 %v43_v12 }
  0x9b   :  { %v42_v13 = vmul.f32 %v40_v11, %v40_v11 }
  0x9d   :  { %v46_v14 = vsel %vm29_vm0, %v42_v13, 0.0 }
  0x9e   :  { %47 = vadd.xlane.f32.xlu1 %v46_v14 }
 0x127   :  { %v45_v18 = vpop.xlane.xlu1 %44 }
 0x128   :  { %v49_v19 = vmul.f32 0.03125, %v45_v18 }
 0x12a   :  { %v51_v20 = vadd.f32 1e-05, %v49_v19 }
 0x12b   :  { %v48_v21 = vpop.xlane.xlu1 %47 }
 0x12c   :  { %190 = vrsqrt.f32 %v51_v20  ;;  %v50_v22 = vmul.f32 0.03125, %v48_v21 }
 0x12e   :  { %v52_v23 = vadd.f32 1e-05, %v50_v22 }
 0x130   :  { %192 = vrsqrt.f32 %v52_v23 }
 0x136   :  { %v191_v24 = vpop.eup %190 }
 0x137   :  { %v55_v25 = vmul.f32 %v191_v24, %v39_v7 }
 0x139   :  { %v64_v28 = vmul.f32 %v161_v26, %v55_v25 }
 0x13a   :  { %v193_v27 = vpop.eup %192 }
 0x13b   :  { %v56_v29 = vmul.f32 %v193_v27, %v40_v11  ;;  %v73_v32 = vadd.f32 %v162_v30, %v64_v28 }
 0x13d   :  { %v65_v31 = vmul.f32 %v161_v26, %v56_v29 }
 0x13f   :  { %v74_v33 = vadd.f32 %v162_v30, %v65_v31 }
 0x141   :  { %v75_v34 = vpack.c.bf16 %v74_v33, %v73_v32 }
 0x143   :  { %76 = vst.msk [vmem:[#allocation2] sm:$0xff] %vm29_vm0, %v75_v34 }
 0x14a   :  { %v77_v35 = vld [vmem:[#allocation2] sm:$0xff] }
 0x14b   :  { %183 = vmatmul.mubr.msk.bf16.vlgmr.msra.gmra.mrb[0].mxu0 %vm29_vm0, %v77_v35 }
 0x21e   :  { %v139_v37 = vpop.f32.mrb[0].mxu0 }
 0x21f   :  { %v140_v38 = vadd.f32 %v163_v36, %v139_v37  ;;  %v184_v39 = vpop.f32.mrb[1].mxu0 }
 0x220   :  { %v142_v40 = vpop.f32.mrb[2].mxu0 }
 0x221   :  { %v169_v41 = vpack.c.bf16 %v140_v38, %v140_v38  ;;  %v143_v42 = vadd.f32 %v163_v36, %v142_v40  ;;  %v185_v43 = vpop.f32.mrb[3].mxu0 }
 0x223   :  { %155 = vst.msk [vmem:[%s261_s5] sm:$0xf] %vm154_vm2, %v169_v41  ;;  %v170_v44 = vpack.c.bf16 %v143_v42, %v143_v42 }
 0x225   :  { %156 = vst.msk [vmem:[%s261_s5 + $0x4] sm:$0xf] %vm154_vm2, %v170_v44 }

// kernel: clip_wrapper_forward.40
= control target key start
LH: loop header
LB: loop body
LE: loop exit
PB: predicated region body
PF: predicated region fallthrough
CT: control target
= control target key end

     0   :  { %vm29_vm0 = vcmask 261120   ;;  %v224_v16 = vmov 0.0   ;;  %vm225_vm1 = vmmov 0   ;;  %s283_s0 = inlined_call_operand.vmem [shape: bf16[16,32], index: 0, kind: input, shape index: {}]   ;;  %s284_s3 = inlined_call_operand.vmem [shape: bf16[32,128], index: 3, kind: input, shape index: {}]   ;;  %s285_s1 = inlined_call_operand.vmem [shape: f32[1,32], index: 1, kind: input, shape index: {}]   ;;  %s286_s2 = inlined_call_operand.vmem [shape: f32[1,32], index: 2, kind: input, shape index: {}]   ;;  %s287_s4 = inlined_call_operand.vmem [shape: f32[1,128], index: 4, kind: input, shape index: {}]   ;;  %s288_s5 = inlined_call_operand.vmem [shape: bf16[16,128], index: 5, kind: output, shape index: {}]  }
   0x1   :  { %v189_v0 = vld [vmem:[%s283_s0] sm:$0xff]   ;;  %200 = vmatprep.subr.bf16.mxu0 %v224_v16  ;;  %v211_v17 = vld [vmem:[%s284_s3 + $0x8] sm:$0xff]   ;;  %204 = vmatprep.mubr.msk.bf16.mxu0 %vm225_vm1, %v224_v16 }
   0x2   :  { %v190_v1 = vunpack.c.l.bf16 %v189_v0  ;;  %v191_v2 = vunpack.c.h.bf16 %v189_v0  ;;  %v210_v15 = vld [vmem:[%s284_s3] sm:$0xff]  }
   0x3   :  { %201 = vmatpush3.bf16.msra.mxu0 %v210_v15  ;;  %v176_v26 = vld [vmem:[%s285_s1] ss:$0 sm:$0xff] }
   0x4   :  { %v30_v3 = vsel %vm29_vm0, %v190_v1, 0.0  ;;  %v33_v4 = vsel %vm29_vm0, %v191_v2, 0.0  ;;  %202 = vmatprep.subr.bf16.mxu0 %v224_v16  ;;  %v177_v30 = vld [vmem:[%s286_s2] ss:$0 sm:$0xff] }
   0x5   :  { %31 = vadd.xlane.f32.xlu0 %v30_v3  ;;  %v178_v36 = vld [vmem:[%s287_s4] ss:$0 sm:$0xff] }
   0x7   :  { %203 = vmatpush3.bf16.msra.mxu0 %v211_v17 }
   0x9   :  { %34 = vadd.xlane.f32.xlu0 %v33_v4 }
  0x92   :  { %v32_v5 = vpop.xlane.xlu0 %31 }
  0x93   :  { %v37_v6 = vmul.f32 0.03125, %v32_v5 }
  0x95   :  { %v39_v7 = vsub.f32 %v190_v1, %v37_v6 }
  0x96   :  { %v35_v8 = vpop.xlane.xlu0 %34 }
  0x97   :  { %v38_v9 = vmul.f32 0.03125, %v35_v8  ;;  %v41_v10 = vmul.f32 %v39_v7, %v39_v7 }
  0x99   :  { %v40_v11 = vsub.f32 %v191_v2, %v38_v9  ;;  %v43_v12 = vsel %vm29_vm0, %v41_v10, 0.0 }
  0x9a   :  { %44 = vadd.xlane.f32.xlu1 %v43_v12 }
  0x9b   :  { %v42_v13 = vmul.f32 %v40_v11, %v40_v11 }
  0x9d   :  { %v46_v14 = vsel %vm29_vm0, %v42_v13, 0.0 }
  0x9e   :  { %47 = vadd.xlane.f32.xlu1 %v46_v14 }
 0x127   :  { %v45_v18 = vpop.xlane.xlu1 %44 }
 0x128   :  { %v49_v19 = vmul.f32 0.03125, %v45_v18 }
 0x12a   :  { %v51_v20 = vadd.f32 1e-05, %v49_v19 }
 0x12b   :  { %v48_v21 = vpop.xlane.xlu1 %47 }
 0x12c   :  { %212 = vrsqrt.f32 %v51_v20  ;;  %v50_v22 = vmul.f32 0.03125, %v48_v21 }
 0x12e   :  { %v52_v23 = vadd.f32 1e-05, %v50_v22 }
 0x130   :  { %214 = vrsqrt.f32 %v52_v23 }
 0x136   :  { %v213_v24 = vpop.eup %212 }
 0x137   :  { %v55_v25 = vmul.f32 %v213_v24, %v39_v7 }
 0x139   :  { %v64_v28 = vmul.f32 %v176_v26, %v55_v25 }
 0x13a   :  { %v215_v27 = vpop.eup %214 }
 0x13b   :  { %v56_v29 = vmul.f32 %v215_v27, %v40_v11  ;;  %v73_v32 = vadd.f32 %v177_v30, %v64_v28 }
 0x13d   :  { %v65_v31 = vmul.f32 %v176_v26, %v56_v29 }
 0x13f   :  { %v74_v33 = vadd.f32 %v177_v30, %v65_v31 }
 0x141   :  { %v75_v34 = vpack.c.bf16 %v74_v33, %v73_v32 }
 0x143   :  { %76 = vst.msk [vmem:[#allocation2] sm:$0xff] %vm29_vm0, %v75_v34 }
 0x14a   :  { %v77_v35 = vld [vmem:[#allocation2] sm:$0xff] }
 0x14b   :  { %205 = vmatmul.mubr.msk.bf16.vlgmr.msra.gmra.mrb[0].mxu0 %vm29_vm0, %v77_v35 }
 0x21e   :  { %v139_v37 = vpop.f32.mrb[0].mxu0 }
 0x21f   :  { %v140_v38 = vadd.f32 %v178_v36, %v139_v37  ;;  %v206_v39 = vpop.f32.mrb[1].mxu0 }
 0x220   :  { %v142_v40 = vpop.f32.mrb[2].mxu0 }
 0x221   :  { %v182_v41 = vmul.f32 -1.702, %v140_v38  ;;  %v143_v42 = vadd.f32 %v178_v36, %v142_v40  ;;  %v207_v43 = vpop.f32.mrb[3].mxu0 }
 0x223   :  { %v150_v44 = vmul.f32 1.442695, %v182_v41  ;;  %v183_v45 = vmul.f32 -1.702, %v143_v42 }
 0x225   :  { %216 = vpow2.f32 %v150_v44  ;;  %v152_v46 = vmul.f32 1.442695, %v183_v45 }
 0x227   :  { %218 = vpow2.f32 %v152_v46 }
 0x22f   :  { %v217_v47 = vpop.eup %216 }
 0x230   :  { %v154_v48 = vadd.f32 1.0, %v217_v47 }
 0x231   :  { %v219_v49 = vpop.eup %218 }
 0x232   :  { %220 = vrcp.f32 %v154_v48  ;;  %v155_v50 = vadd.f32 1.0, %v219_v49 }
 0x234   :  { %222 = vrcp.f32 %v155_v50 }
 0x23c   :  { %v221_v51 = vpop.eup %220 }
 0x23d   :  { %v160_v53 = vmul.f32 %v221_v51, %v140_v38 }
 0x23e   :  { %v223_v52 = vpop.eup %222 }
 0x23f   :  { %v161_v54 = vmul.f32 %v223_v52, %v143_v42 }
 0x241   :  { %v195_v55 = vpack.c.bf16 %v161_v54, %v160_v53 }
 0x243   :  { %196 = vst [vmem:[%s288_s5] sm:$0xff] %v195_v55  }

// kernel: clip_wrapper_forward.41
= control target key start
LH: loop header
LB: loop body
LE: loop exit
PB: predicated region body
PF: predicated region fallthrough
CT: control target
= control target key end

     0   :  { %vm22_vm0 = vcmask 261120   ;;  %v238_v0 = vmov 0.0   ;;  %vm239_vm1 = vmmov 0   ;;  %vm173_vm2 = vcmask 257024   ;;  %s308_s1 = inlined_call_operand.vmem [shape: bf16[128,32], index: 1, kind: input, shape index: {}]   ;;  %s309_s0 = inlined_call_operand.vmem [shape: bf16[16,128], index: 0, kind: input, shape index: {}]   ;;  %s310_s3 = inlined_call_operand.vmem [shape: bf16[16,32], index: 3, kind: input, shape index: {}]   ;;  %s311_s2 = inlined_call_operand.vmem [shape: f32[1,32], index: 2, kind: input, shape index: {}]   ;;  %s312_s4 = inlined_call_operand.vmem [shape: bf16[16,32], index: 4, kind: output, shape index: {}]  }
   0x1   :  { %207 = vmatprep.subr.bf16.mxu0 %v238_v0  ;;  %v229_v1 = vld [vmem:[%s308_s1] sm:$0xff]   ;;  %223 = vmatprep.mubr.msk.bf16.mxu0 %vm239_vm1, %v238_v0  ;;  %23 = vst.msk [vmem:[#allocation2] sm:$0xff] %vm22_vm0, %v238_v0  ;;  %24 = vst.msk [vmem:[#allocation2 + $0x8] sm:$0xff] %vm22_vm0, %v238_v0  ;;  %v230_v2 = vld [vmem:[%s308_s1 + $0x8] sm:$0xff]  }
   0x2   :  { %208 = vmatpush3.bf16.msra.mxu0 %v229_v1  ;;  %v231_v3 = vld [vmem:[%s308_s1 + $0x10] sm:$0xff]   ;;  %v232_v4 = vld [vmem:[%s308_s1 + $0x18] sm:$0xff]   ;;  %v233_v5 = vld [vmem:[%s308_s1 + $0x20] sm:$0xff]  }
   0x3   :  { %209 = vmatprep.subr.bf16.mxu0 %v238_v0  ;;  %v234_v6 = vld [vmem:[%s308_s1 + $0x28] sm:$0xff]   ;;  %v235_v7 = vld [vmem:[%s308_s1 + $0x30] sm:$0xff]   ;;  %v236_v8 = vld [vmem:[%s308_s1 + $0x38] sm:$0xff]  }
   0x4   :  { %v237_v9 = vld [vmem:[%s309_s0] sm:$0xff]  }
   0x5   :  { %v195_v18 = vld [vmem:[%s310_s3] sm:$0xff]  }
   0x6   :  { %210 = vmatpush3.bf16.msra.mxu0 %v230_v2  ;;  %v189_v19 = vld [vmem:[%s311_s2] ss:$0 sm:$0xff]  ;;  %v196_v20 = vunpack.c.l.bf16 %v195_v18  ;;  %v197_v23 = vunpack.c.h.bf16 %v195_v18 }
   0x7   :  { %211 = vmatprep.subr.bf16.mxu0 %v238_v0 }
   0x8   :  { %v25_v10 = vld [vmem:[#allocation2] sm:$0xff]  ;;  %v26_v12 = vld [vmem:[#allocation2 + $0x8] sm:$0xff] }
   0xa   :  { %212 = vmatpush3.bf16.msra.mxu0 %v231_v3 }
   0xb   :  { %213 = vmatprep.subr.bf16.mxu0 %v238_v0 }
   0xe   :  { %214 = vmatpush3.bf16.msra.mxu0 %v232_v4 }
   0xf   :  { %215 = vmatprep.subr.bf16.mxu0 %v238_v0 }
  0x12   :  { %216 = vmatpush3.bf16.msra.mxu0 %v233_v5 }
  0x13   :  { %217 = vmatprep.subr.bf16.mxu0 %v238_v0 }
  0x16   :  { %218 = vmatpush3.bf16.msra.mxu0 %v234_v6 }
  0x17   :  { %219 = vmatprep.subr.bf16.mxu0 %v238_v0 }
  0x1a   :  { %220 = vmatpush3.bf16.msra.mxu0 %v235_v7 }
  0x1b   :  { %221 = vmatprep.subr.bf16.mxu0 %v238_v0 }
  0x1e   :  { %222 = vmatpush3.bf16.msra.mxu0 %v236_v8 }
  0x21   :  { %224 = vmatmul.mubr.bf16.vlgmr.msra.gmra.mrb[0].mxu0 %v237_v9 }
  0xf4   :  { %v133_v11 = vpop.f32.mrb[0].mxu0 }
  0xf5   :  { %v140_v13 = vadd.f32 %v133_v11, %v25_v10  ;;  %v225_v14 = vpop.f32.mrb[1].mxu0 }
  0xf6   :  { %v136_v15 = vpop.f32.mrb[2].mxu0 }
  0xf7   :  { %143 = vst.msk [vmem:[#allocation2] sm:$0xff] %vm22_vm0, %v140_v13  ;;  %v141_v16 = vadd.f32 %v136_v15, %v26_v12  ;;  %v226_v17 = vpop.f32.mrb[3].mxu0 }
  0xf9   :  { %144 = vst.msk [vmem:[#allocation2 + $0x8] sm:$0xff] %vm22_vm0, %v141_v16 }
  0xfe   :  { %v148_v21 = vld [vmem:[#allocation2] sm:$0xff] }
  0xff   :  { %v157_v22 = vadd.f32 %v189_v19, %v148_v21 }
 0x100   :  { %v149_v24 = vld [vmem:[#allocation2 + $0x8] sm:$0xff] }
 0x101   :  { %v163_v25 = vadd.f32 %v196_v20, %v157_v22  ;;  %v158_v26 = vadd.f32 %v189_v19, %v149_v24 }
 0x103   :  { %v192_v27 = vpack.c.bf16 %v163_v25, %v163_v25  ;;  %v164_v28 = vadd.f32 %v197_v23, %v158_v26 }
 0x105   :  { %174 = vst.msk [vmem:[%s312_s4] sm:$0xf] %vm173_vm2, %v192_v27  ;;  %v193_v29 = vpack.c.bf16 %v164_v28, %v164_v28 }
 0x107   :  { %175 = vst.msk [vmem:[%s312_s4 + $0x4] sm:$0xf] %vm173_vm2, %v193_v29 }

</bundles_post_ra>
